<compile_context>
chip_gen: v7x
topology: tpu7x:2x2x1
jax: 0.10.0
libtpu: 0.0.40
codegen_flags: <defaults>
</compile_context>

<pallas_src>
import math
from functools import partial

import jax
import jax.numpy as jnp
from jax import lax
from jax.experimental import pallas as pl
from jax.experimental.pallas import tpu as pltpu

n_embed = 384  # fixed by the PyTorch module


# ---------------------------------------------------------------------------
# Kernel: whole (flattened) batch end-to-end, single grid step.
#   x_ref    : (B*T, C)  input activations (f32)
#   wqkv_ref : (C, 3C)   bf16, fused [Wq | Wk | Wv] in (in, out) layout,
#                        head h occupies columns h*hs:(h+1)*hs of each C block
#   wp_ref   : (C, C)    bf16, output projection, (in, out) layout
#   b_ref    : (1, C)    f32 output-projection bias
#   o_ref    : (B*T, C)
# ---------------------------------------------------------------------------
def mha_fused_kernel(x_ref, wqkv_ref, wp_ref, b_ref, o_ref, *,
                     batch, seq_len, num_heads, head_size):
    C = num_heads * head_size
    scale = jnp.float32(C ** -0.5)            # module uses C**-0.5 with C = n_embed

    # Fused QKV projection: (B*T, C) @ (C, 3C), bf16 operands, f32 accumulate.
    xb = x_ref[...].astype(jnp.bfloat16)
    qkv = jnp.dot(xb, wqkv_ref[...], preferred_element_type=jnp.float32)  # (B*T, 3C)

    # Causal mask built once, reused by every (batch, head).
    row = lax.broadcasted_iota(jnp.int32, (seq_len, seq_len), 0)
    col = lax.broadcasted_iota(jnp.int32, (seq_len, seq_len), 1)
    causal = col <= row
    neg_big = jnp.float32(-1e30)              # large finite negative (NaN-safe vs -inf)

    att_rows = []
    for b in range(batch):                    # static unroll, batch is tiny
        rows = slice(b * seq_len, (b + 1) * seq_len)
        q = qkv[rows, 0 * C:1 * C]            # lane-aligned 384-wide slices
        k = qkv[rows, 1 * C:2 * C]
        v = qkv[rows, 2 * C:3 * C]
        head_outs = []
        for h in range(num_heads):            # static unroll, H = 6
            sl = slice(h * head_size, (h + 1) * head_size)
            qh = q[:, sl].astype(jnp.bfloat16)
            kh = k[:, sl].astype(jnp.bfloat16)
            vh = v[:, sl].astype(jnp.bfloat16)
            # scores = qh @ kh^T without an explicit in-kernel transpose.
            s = lax.dot_general(qh, kh, (((1,), (1,)), ((), ())),
                                preferred_element_type=jnp.float32) * scale  # (T, T)
            s = jnp.where(causal, s, neg_big)
            # Softmax statistics in f32; reciprocal on the (otherwise idle) EUP.
            m = jnp.max(s, axis=-1, keepdims=True)
            p = jnp.exp(s - m)
            denom = jnp.sum(p, axis=-1, keepdims=True)
            p = p * pl.reciprocal(denom, approx=True)
            # TODO(synk): attention-weight dropout omitted (eval-mode forward).
            head_outs.append(jnp.dot(p.astype(jnp.bfloat16), vh,
                                     preferred_element_type=jnp.float32))   # (T, hs)
        att_rows.append(jnp.concatenate(head_outs, axis=-1))                # (T, C)

    att = jnp.concatenate(att_rows, axis=0)                                 # (B*T, C)

    # Fused output projection + bias on the full flattened slab.
    y = jnp.dot(att.astype(jnp.bfloat16), wp_ref[...],
                preferred_element_type=jnp.float32)
    y = y + b_ref[...].astype(jnp.float32)
    # TODO(synk): output dropout omitted (eval-mode forward).
    o_ref[...] = y.astype(o_ref.dtype)


# ---------------------------------------------------------------------------
# Parameter prep: run ONCE at load time (NOT in the per-call path).
# ---------------------------------------------------------------------------
def prepare_mha_params(wq, wk, wv, wp, bp, *, compute_dtype=jnp.bfloat16):
    """wq/wk/wv: (H, hs, C) PyTorch nn.Linear weight layout; wp: (C, C); bp: (1, C)."""
    H, hs, C = wq.shape
    # (C_in, H*hs): column block h*hs:(h+1)*hs holds head h's W^T.
    wq_all = jnp.transpose(wq, (2, 0, 1)).reshape(C, H * hs)
    wk_all = jnp.transpose(wk, (2, 0, 1)).reshape(C, H * hs)
    wv_all = jnp.transpose(wv, (2, 0, 1)).reshape(C, H * hs)
    w_qkv = jnp.concatenate([wq_all, wk_all, wv_all], axis=1).astype(compute_dtype)
    wp_t = wp.T.astype(compute_dtype)                      # (C_in, C_out)
    b = bp.reshape(1, C).astype(jnp.float32)
    return w_qkv, wp_t, b


def multi_head_attention(x, w_qkv, wp_t, b, *, num_heads, head_size):
    """x: (B, T, C); w_qkv: (C, 3C) bf16; wp_t: (C, C) bf16; b: (1, C) f32."""
    B, T, C = x.shape
    assert num_heads * head_size == C
    x2d = x.reshape(B * T, C)                              # layout-free reshape

    kernel = partial(mha_fused_kernel, batch=B, seq_len=T,
                     num_heads=num_heads, head_size=head_size)

    y2d = pl.pallas_call(
        kernel,
        out_shape=jax.ShapeDtypeStruct((B * T, C), x.dtype),
        # Single grid step: whole problem in VMEM, weights DMA'd exactly once
        # (no per-TensorCore weight duplication for a tiny batch).
        in_specs=[
            pl.BlockSpec(memory_space=pltpu.MemorySpace.VMEM),   # x (B*T, C)
            pl.BlockSpec(memory_space=pltpu.MemorySpace.VMEM),   # W_qkv (C, 3C)
            pl.BlockSpec(memory_space=pltpu.MemorySpace.VMEM),   # Wp^T (C, C)
            pl.BlockSpec(memory_space=pltpu.MemorySpace.VMEM),   # bias (1, C)
        ],
        out_specs=pl.BlockSpec(memory_space=pltpu.MemorySpace.VMEM),
        compiler_params=pltpu.CompilerParams(
            vmem_limit_bytes=32 * 1024 * 1024),
    )(x2d, w_qkv, wp_t, b)
    return y2d.reshape(B, T, C)


# -------------------------- pure-JAX f32 reference --------------------------
def reference(x, wq, wk, wv, wp, bp):
    B, T, C = x.shape
    H = wq.shape[0]
    outs = []
    mask = jnp.tril(jnp.ones((T, T), dtype=bool))
    for h in range(H):
        q = x @ wq[h].T
        k = x @ wk[h].T
        v = x @ wv[h].T
        w = (q @ jnp.swapaxes(k, -2, -1)) * (C ** -0.5)
        w = jnp.where(mask, w, -jnp.inf)
        w = jax.nn.softmax(w, axis=-1)
        outs.append(w @ v)
    cat = jnp.concatenate(outs, axis=-1)
    return cat @ wp.T + bp[0]


if __name__ == "__main__":
    B, T = 2, 16
    num_heads, head_size = 6, 64             # 6 * 64 == n_embed == 384
    key = jax.random.PRNGKey(0)
    k_x, k_q, k_k, k_v, k_p, k_b = jax.random.split(key, 6)

    bound = 1.0 / math.sqrt(n_embed)          # PyTorch nn.Linear default init range
    x = jax.random.normal(k_x, (B, T, n_embed), dtype=jnp.float32)
    wq = jax.random.uniform(k_q, (num_heads, head_size, n_embed), jnp.float32, -bound, bound)
    wk = jax.random.uniform(k_k, (num_heads, head_size, n_embed), jnp.float32, -bound, bound)
    wv = jax.random.uniform(k_v, (num_heads, head_size, n_embed), jnp.float32, -bound, bound)
    wp = jax.random.uniform(k_p, (n_embed, n_embed), jnp.float32, -bound, bound)
    bp = jax.random.uniform(k_b, (1, n_embed), jnp.float32, -bound, bound)

    # Parameter prep happens ONCE (outside the per-call path).
    w_qkv, wp_t, b = prepare_mha_params(wq, wk, wv, wp, bp)
    w_qkv, wp_t, b = jax.block_until_ready((w_qkv, wp_t, b))

    out = multi_head_attention(x, w_qkv, wp_t, b,
                               num_heads=num_heads, head_size=head_size)
    out = jax.block_until_ready(out)

    ref = reference(x, wq, wk, wv, wp, bp)
    assert out.shape == (B, T, n_embed)
    # Tolerance accounts for bf16 dot operands + the approx (EUP) reciprocal.
    assert jnp.allclose(out, ref, atol=3e-2, rtol=3e-2), "mismatch vs reference"
    print("KERNEL_OK")
</pallas_src>

<mosaic_0001>
module attributes {stable_mosaic.version = 11 : i64} {
  func.func @mha_fused_kernel(%arg0: memref<32x384xf32, #tpu.memory_space<vmem>>, %arg1: memref<384x1152xbf16, #tpu.memory_space<vmem>>, %arg2: memref<384x384xbf16, #tpu.memory_space<vmem>>, %arg3: memref<1x384xf32, #tpu.memory_space<vmem>>, %arg4: memref<32x384xf32, #tpu.memory_space<vmem>>) attributes {dimension_semantics = [], scalar_prefetch = 0 : i64, scratch_operands = 0 : i64, tpu.core_type = #tpu.core_type<tc>} {
    %c0 = arith.constant 0 : index
    %c0_0 = arith.constant 0 : index
    %0 = vector.load %arg0[%c0, %c0_0] : memref<32x384xf32, #tpu.memory_space<vmem>>, vector<32x384xf32>
    %1 = arith.truncf %0 : vector<32x384xf32> to vector<32x384xbf16>
    %c0_1 = arith.constant 0 : index
    %c0_2 = arith.constant 0 : index
    %2 = vector.load %arg1[%c0_1, %c0_2] : memref<384x1152xbf16, #tpu.memory_space<vmem>>, vector<384x1152xbf16>
    %cst = arith.constant dense<0.000000e+00> : vector<32x1152xf32>
    %3 = tpu.matmul %1, %2, %cst {dimension_numbers = #tpu.dot_dimension_numbers<[1], [0], [0], [1], [0, 0, 1, 1], [], []>} : vector<32x384xbf16>, vector<384x1152xbf16>, vector<32x1152xf32> -> vector<32x1152xf32>
    %4 = tpu.iota {dimensions = array<i32: 0>} : vector<16x16xi32>
    %5 = tpu.iota {dimensions = array<i32: 1>} : vector<16x16xi32>
    %6 = arith.cmpi sle, %5, %4 : vector<16x16xi32>
    %7 = vector.extract_strided_slice %3 {offsets = [0, 0], sizes = [16, 384], strides = [1, 1]} : vector<32x1152xf32> to vector<16x384xf32>
    %8 = vector.extract_strided_slice %3 {offsets = [0, 384], sizes = [16, 384], strides = [1, 1]} : vector<32x1152xf32> to vector<16x384xf32>
    %9 = vector.extract_strided_slice %3 {offsets = [0, 768], sizes = [16, 384], strides = [1, 1]} : vector<32x1152xf32> to vector<16x384xf32>
    %10 = vector.extract_strided_slice %7 {offsets = [0, 0], sizes = [16, 64], strides = [1, 1]} : vector<16x384xf32> to vector<16x64xf32>
    %11 = arith.truncf %10 : vector<16x64xf32> to vector<16x64xbf16>
    %12 = vector.extract_strided_slice %8 {offsets = [0, 0], sizes = [16, 64], strides = [1, 1]} : vector<16x384xf32> to vector<16x64xf32>
    %13 = arith.truncf %12 : vector<16x64xf32> to vector<16x64xbf16>
    %14 = vector.extract_strided_slice %9 {offsets = [0, 0], sizes = [16, 64], strides = [1, 1]} : vector<16x384xf32> to vector<16x64xf32>
    %15 = arith.truncf %14 : vector<16x64xf32> to vector<16x64xbf16>
    %cst_3 = arith.constant dense<0.000000e+00> : vector<16x16xf32>
    %16 = tpu.matmul %11, %13, %cst_3 {dimension_numbers = #tpu.dot_dimension_numbers<[1], [1], [0], [0], [0, 0, 1, 0], [], []>} : vector<16x64xbf16>, vector<16x64xbf16>, vector<16x16xf32> -> vector<16x16xf32>
    %cst_4 = arith.constant 0.0510310382 : f32
    %17 = vector.broadcast %cst_4 : f32 to vector<16x16xf32>
    %18 = arith.mulf %16, %17 : vector<16x16xf32>
    %cst_5 = arith.constant -1.000000e+30 : f32
    %19 = vector.broadcast %cst_5 : f32 to vector<16x16xf32>
    %20 = arith.select %6, %18, %19 : vector<16x16xi1>, vector<16x16xf32>
    %cst_6 = arith.constant dense<0xFF800000> : vector<16xf32>
    %21 = vector.multi_reduction <maximumf>, %20, %cst_6 [1] : vector<16x16xf32> to vector<16xf32>
    %22 = vector.shape_cast %21 : vector<16xf32> to vector<16x1xf32>
    %23 = vector.broadcast %22 : vector<16x1xf32> to vector<16x16xf32>
    %24 = arith.subf %20, %23 : vector<16x16xf32>
    %25 = math.exp %24 : vector<16x16xf32>
    %cst_7 = arith.constant dense<0.000000e+00> : vector<16xf32>
    %26 = vector.multi_reduction <add>, %25, %cst_7 [1] : vector<16x16xf32> to vector<16xf32>
    %27 = vector.shape_cast %26 : vector<16xf32> to vector<16x1xf32>
    %28 = tpu.reciprocal %27 {approx = true} : vector<16x1xf32> -> vector<16x1xf32>
    %29 = vector.broadcast %28 : vector<16x1xf32> to vector<16x16xf32>
    %30 = arith.mulf %25, %29 : vector<16x16xf32>
    %31 = arith.truncf %30 : vector<16x16xf32> to vector<16x16xbf16>
    %cst_8 = arith.constant dense<0.000000e+00> : vector<16x64xf32>
    %32 = tpu.matmul %31, %15, %cst_8 {dimension_numbers = #tpu.dot_dimension_numbers<[1], [0], [0], [1], [0, 0, 1, 1], [], []>} : vector<16x16xbf16>, vector<16x64xbf16>, vector<16x64xf32> -> vector<16x64xf32>
    %33 = vector.extract_strided_slice %7 {offsets = [0, 64], sizes = [16, 64], strides = [1, 1]} : vector<16x384xf32> to vector<16x64xf32>
    %34 = arith.truncf %33 : vector<16x64xf32> to vector<16x64xbf16>
    %35 = vector.extract_strided_slice %8 {offsets = [0, 64], sizes = [16, 64], strides = [1, 1]} : vector<16x384xf32> to vector<16x64xf32>
    %36 = arith.truncf %35 : vector<16x64xf32> to vector<16x64xbf16>
    %37 = vector.extract_strided_slice %9 {offsets = [0, 64], sizes = [16, 64], strides = [1, 1]} : vector<16x384xf32> to vector<16x64xf32>
    %38 = arith.truncf %37 : vector<16x64xf32> to vector<16x64xbf16>
    %cst_9 = arith.constant dense<0.000000e+00> : vector<16x16xf32>
    %39 = tpu.matmul %34, %36, %cst_9 {dimension_numbers = #tpu.dot_dimension_numbers<[1], [1], [0], [0], [0, 0, 1, 0], [], []>} : vector<16x64xbf16>, vector<16x64xbf16>, vector<16x16xf32> -> vector<16x16xf32>
    %cst_10 = arith.constant 0.0510310382 : f32
    %40 = vector.broadcast %cst_10 : f32 to vector<16x16xf32>
    %41 = arith.mulf %39, %40 : vector<16x16xf32>
    %cst_11 = arith.constant -1.000000e+30 : f32
    %42 = vector.broadcast %cst_11 : f32 to vector<16x16xf32>
    %43 = arith.select %6, %41, %42 : vector<16x16xi1>, vector<16x16xf32>
    %cst_12 = arith.constant dense<0xFF800000> : vector<16xf32>
    %44 = vector.multi_reduction <maximumf>, %43, %cst_12 [1] : vector<16x16xf32> to vector<16xf32>
    %45 = vector.shape_cast %44 : vector<16xf32> to vector<16x1xf32>
    %46 = vector.broadcast %45 : vector<16x1xf32> to vector<16x16xf32>
    %47 = arith.subf %43, %46 : vector<16x16xf32>
    %48 = math.exp %47 : vector<16x16xf32>
    %cst_13 = arith.constant dense<0.000000e+00> : vector<16xf32>
    %49 = vector.multi_reduction <add>, %48, %cst_13 [1] : vector<16x16xf32> to vector<16xf32>
    %50 = vector.shape_cast %49 : vector<16xf32> to vector<16x1xf32>
    %51 = tpu.reciprocal %50 {approx = true} : vector<16x1xf32> -> vector<16x1xf32>
    %52 = vector.broadcast %51 : vector<16x1xf32> to vector<16x16xf32>
    %53 = arith.mulf %48, %52 : vector<16x16xf32>
    %54 = arith.truncf %53 : vector<16x16xf32> to vector<16x16xbf16>
    %cst_14 = arith.constant dense<0.000000e+00> : vector<16x64xf32>
    %55 = tpu.matmul %54, %38, %cst_14 {dimension_numbers = #tpu.dot_dimension_numbers<[1], [0], [0], [1], [0, 0, 1, 1], [], []>} : vector<16x16xbf16>, vector<16x64xbf16>, vector<16x64xf32> -> vector<16x64xf32>
    %56 = vector.extract_strided_slice %7 {offsets = [0, 128], sizes = [16, 64], strides = [1, 1]} : vector<16x384xf32> to vector<16x64xf32>
    %57 = arith.truncf %56 : vector<16x64xf32> to vector<16x64xbf16>
    %58 = vector.extract_strided_slice %8 {offsets = [0, 128], sizes = [16, 64], strides = [1, 1]} : vector<16x384xf32> to vector<16x64xf32>
    %59 = arith.truncf %58 : vector<16x64xf32> to vector<16x64xbf16>
    %60 = vector.extract_strided_slice %9 {offsets = [0, 128], sizes = [16, 64], strides = [1, 1]} : vector<16x384xf32> to vector<16x64xf32>
    %61 = arith.truncf %60 : vector<16x64xf32> to vector<16x64xbf16>
    %cst_15 = arith.constant dense<0.000000e+00> : vector<16x16xf32>
    %62 = tpu.matmul %57, %59, %cst_15 {dimension_numbers = #tpu.dot_dimension_numbers<[1], [1], [0], [0], [0, 0, 1, 0], [], []>} : vector<16x64xbf16>, vector<16x64xbf16>, vector<16x16xf32> -> vector<16x16xf32>
    %cst_16 = arith.constant 0.0510310382 : f32
    %63 = vector.broadcast %cst_16 : f32 to vector<16x16xf32>
    %64 = arith.mulf %62, %63 : vector<16x16xf32>
    %cst_17 = arith.constant -1.000000e+30 : f32
    %65 = vector.broadcast %cst_17 : f32 to vector<16x16xf32>
    %66 = arith.select %6, %64, %65 : vector<16x16xi1>, vector<16x16xf32>
    %cst_18 = arith.constant dense<0xFF800000> : vector<16xf32>
    %67 = vector.multi_reduction <maximumf>, %66, %cst_18 [1] : vector<16x16xf32> to vector<16xf32>
    %68 = vector.shape_cast %67 : vector<16xf32> to vector<16x1xf32>
    %69 = vector.broadcast %68 : vector<16x1xf32> to vector<16x16xf32>
    %70 = arith.subf %66, %69 : vector<16x16xf32>
    %71 = math.exp %70 : vector<16x16xf32>
    %cst_19 = arith.constant dense<0.000000e+00> : vector<16xf32>
    %72 = vector.multi_reduction <add>, %71, %cst_19 [1] : vector<16x16xf32> to vector<16xf32>
    %73 = vector.shape_cast %72 : vector<16xf32> to vector<16x1xf32>
    %74 = tpu.reciprocal %73 {approx = true} : vector<16x1xf32> -> vector<16x1xf32>
    %75 = vector.broadcast %74 : vector<16x1xf32> to vector<16x16xf32>
    %76 = arith.mulf %71, %75 : vector<16x16xf32>
    %77 = arith.truncf %76 : vector<16x16xf32> to vector<16x16xbf16>
    %cst_20 = arith.constant dense<0.000000e+00> : vector<16x64xf32>
    %78 = tpu.matmul %77, %61, %cst_20 {dimension_numbers = #tpu.dot_dimension_numbers<[1], [0], [0], [1], [0, 0, 1, 1], [], []>} : vector<16x16xbf16>, vector<16x64xbf16>, vector<16x64xf32> -> vector<16x64xf32>
    %79 = vector.extract_strided_slice %7 {offsets = [0, 192], sizes = [16, 64], strides = [1, 1]} : vector<16x384xf32> to vector<16x64xf32>
    %80 = arith.truncf %79 : vector<16x64xf32> to vector<16x64xbf16>
    %81 = vector.extract_strided_slice %8 {offsets = [0, 192], sizes = [16, 64], strides = [1, 1]} : vector<16x384xf32> to vector<16x64xf32>
    %82 = arith.truncf %81 : vector<16x64xf32> to vector<16x64xbf16>
    %83 = vector.extract_strided_slice %9 {offsets = [0, 192], sizes = [16, 64], strides = [1, 1]} : vector<16x384xf32> to vector<16x64xf32>
    %84 = arith.truncf %83 : vector<16x64xf32> to vector<16x64xbf16>
    %cst_21 = arith.constant dense<0.000000e+00> : vector<16x16xf32>
    %85 = tpu.matmul %80, %82, %cst_21 {dimension_numbers = #tpu.dot_dimension_numbers<[1], [1], [0], [0], [0, 0, 1, 0], [], []>} : vector<16x64xbf16>, vector<16x64xbf16>, vector<16x16xf32> -> vector<16x16xf32>
    %cst_22 = arith.constant 0.0510310382 : f32
    %86 = vector.broadcast %cst_22 : f32 to vector<16x16xf32>
    %87 = arith.mulf %85, %86 : vector<16x16xf32>
    %cst_23 = arith.constant -1.000000e+30 : f32
    %88 = vector.broadcast %cst_23 : f32 to vector<16x16xf32>
    %89 = arith.select %6, %87, %88 : vector<16x16xi1>, vector<16x16xf32>
    %cst_24 = arith.constant dense<0xFF800000> : vector<16xf32>
    %90 = vector.multi_reduction <maximumf>, %89, %cst_24 [1] : vector<16x16xf32> to vector<16xf32>
    %91 = vector.shape_cast %90 : vector<16xf32> to vector<16x1xf32>
    %92 = vector.broadcast %91 : vector<16x1xf32> to vector<16x16xf32>
    %93 = arith.subf %89, %92 : vector<16x16xf32>
    %94 = math.exp %93 : vector<16x16xf32>
    %cst_25 = arith.constant dense<0.000000e+00> : vector<16xf32>
    %95 = vector.multi_reduction <add>, %94, %cst_25 [1] : vector<16x16xf32> to vector<16xf32>
    %96 = vector.shape_cast %95 : vector<16xf32> to vector<16x1xf32>
    %97 = tpu.reciprocal %96 {approx = true} : vector<16x1xf32> -> vector<16x1xf32>
    %98 = vector.broadcast %97 : vector<16x1xf32> to vector<16x16xf32>
    %99 = arith.mulf %94, %98 : vector<16x16xf32>
    %100 = arith.truncf %99 : vector<16x16xf32> to vector<16x16xbf16>
    %cst_26 = arith.constant dense<0.000000e+00> : vector<16x64xf32>
    %101 = tpu.matmul %100, %84, %cst_26 {dimension_numbers = #tpu.dot_dimension_numbers<[1], [0], [0], [1], [0, 0, 1, 1], [], []>} : vector<16x16xbf16>, vector<16x64xbf16>, vector<16x64xf32> -> vector<16x64xf32>
    %102 = vector.extract_strided_slice %7 {offsets = [0, 256], sizes = [16, 64], strides = [1, 1]} : vector<16x384xf32> to vector<16x64xf32>
    %103 = arith.truncf %102 : vector<16x64xf32> to vector<16x64xbf16>
    %104 = vector.extract_strided_slice %8 {offsets = [0, 256], sizes = [16, 64], strides = [1, 1]} : vector<16x384xf32> to vector<16x64xf32>
    %105 = arith.truncf %104 : vector<16x64xf32> to vector<16x64xbf16>
    %106 = vector.extract_strided_slice %9 {offsets = [0, 256], sizes = [16, 64], strides = [1, 1]} : vector<16x384xf32> to vector<16x64xf32>
    %107 = arith.truncf %106 : vector<16x64xf32> to vector<16x64xbf16>
    %cst_27 = arith.constant dense<0.000000e+00> : vector<16x16xf32>
    %108 = tpu.matmul %103, %105, %cst_27 {dimension_numbers = #tpu.dot_dimension_numbers<[1], [1], [0], [0], [0, 0, 1, 0], [], []>} : vector<16x64xbf16>, vector<16x64xbf16>, vector<16x16xf32> -> vector<16x16xf32>
    %cst_28 = arith.constant 0.0510310382 : f32
    %109 = vector.broadcast %cst_28 : f32 to vector<16x16xf32>
    %110 = arith.mulf %108, %109 : vector<16x16xf32>
    %cst_29 = arith.constant -1.000000e+30 : f32
    %111 = vector.broadcast %cst_29 : f32 to vector<16x16xf32>
    %112 = arith.select %6, %110, %111 : vector<16x16xi1>, vector<16x16xf32>
    %cst_30 = arith.constant dense<0xFF800000> : vector<16xf32>
    %113 = vector.multi_reduction <maximumf>, %112, %cst_30 [1] : vector<16x16xf32> to vector<16xf32>
    %114 = vector.shape_cast %113 : vector<16xf32> to vector<16x1xf32>
    %115 = vector.broadcast %114 : vector<16x1xf32> to vector<16x16xf32>
    %116 = arith.subf %112, %115 : vector<16x16xf32>
    %117 = math.exp %116 : vector<16x16xf32>
    %cst_31 = arith.constant dense<0.000000e+00> : vector<16xf32>
    %118 = vector.multi_reduction <add>, %117, %cst_31 [1] : vector<16x16xf32> to vector<16xf32>
    %119 = vector.shape_cast %118 : vector<16xf32> to vector<16x1xf32>
    %120 = tpu.reciprocal %119 {approx = true} : vector<16x1xf32> -> vector<16x1xf32>
    %121 = vector.broadcast %120 : vector<16x1xf32> to vector<16x16xf32>
    %122 = arith.mulf %117, %121 : vector<16x16xf32>
    %123 = arith.truncf %122 : vector<16x16xf32> to vector<16x16xbf16>
    %cst_32 = arith.constant dense<0.000000e+00> : vector<16x64xf32>
    %124 = tpu.matmul %123, %107, %cst_32 {dimension_numbers = #tpu.dot_dimension_numbers<[1], [0], [0], [1], [0, 0, 1, 1], [], []>} : vector<16x16xbf16>, vector<16x64xbf16>, vector<16x64xf32> -> vector<16x64xf32>
    %125 = vector.extract_strided_slice %7 {offsets = [0, 320], sizes = [16, 64], strides = [1, 1]} : vector<16x384xf32> to vector<16x64xf32>
    %126 = arith.truncf %125 : vector<16x64xf32> to vector<16x64xbf16>
    %127 = vector.extract_strided_slice %8 {offsets = [0, 320], sizes = [16, 64], strides = [1, 1]} : vector<16x384xf32> to vector<16x64xf32>
    %128 = arith.truncf %127 : vector<16x64xf32> to vector<16x64xbf16>
    %129 = vector.extract_strided_slice %9 {offsets = [0, 320], sizes = [16, 64], strides = [1, 1]} : vector<16x384xf32> to vector<16x64xf32>
    %130 = arith.truncf %129 : vector<16x64xf32> to vector<16x64xbf16>
    %cst_33 = arith.constant dense<0.000000e+00> : vector<16x16xf32>
    %131 = tpu.matmul %126, %128, %cst_33 {dimension_numbers = #tpu.dot_dimension_numbers<[1], [1], [0], [0], [0, 0, 1, 0], [], []>} : vector<16x64xbf16>, vector<16x64xbf16>, vector<16x16xf32> -> vector<16x16xf32>
    %cst_34 = arith.constant 0.0510310382 : f32
    %132 = vector.broadcast %cst_34 : f32 to vector<16x16xf32>
    %133 = arith.mulf %131, %132 : vector<16x16xf32>
    %cst_35 = arith.constant -1.000000e+30 : f32
    %134 = vector.broadcast %cst_35 : f32 to vector<16x16xf32>
    %135 = arith.select %6, %133, %134 : vector<16x16xi1>, vector<16x16xf32>
    %cst_36 = arith.constant dense<0xFF800000> : vector<16xf32>
    %136 = vector.multi_reduction <maximumf>, %135, %cst_36 [1] : vector<16x16xf32> to vector<16xf32>
    %137 = vector.shape_cast %136 : vector<16xf32> to vector<16x1xf32>
    %138 = vector.broadcast %137 : vector<16x1xf32> to vector<16x16xf32>
    %139 = arith.subf %135, %138 : vector<16x16xf32>
    %140 = math.exp %139 : vector<16x16xf32>
    %cst_37 = arith.constant dense<0.000000e+00> : vector<16xf32>
    %141 = vector.multi_reduction <add>, %140, %cst_37 [1] : vector<16x16xf32> to vector<16xf32>
    %142 = vector.shape_cast %141 : vector<16xf32> to vector<16x1xf32>
    %143 = tpu.reciprocal %142 {approx = true} : vector<16x1xf32> -> vector<16x1xf32>
    %144 = vector.broadcast %143 : vector<16x1xf32> to vector<16x16xf32>
    %145 = arith.mulf %140, %144 : vector<16x16xf32>
    %146 = arith.truncf %145 : vector<16x16xf32> to vector<16x16xbf16>
    %cst_38 = arith.constant dense<0.000000e+00> : vector<16x64xf32>
    %147 = tpu.matmul %146, %130, %cst_38 {dimension_numbers = #tpu.dot_dimension_numbers<[1], [0], [0], [1], [0, 0, 1, 1], [], []>} : vector<16x16xbf16>, vector<16x64xbf16>, vector<16x64xf32> -> vector<16x64xf32>
    %148 = tpu.concatenate %32, %55, %78, %101, %124, %147 in 1 : vector<16x64xf32>, vector<16x64xf32>, vector<16x64xf32>, vector<16x64xf32>, vector<16x64xf32>, vector<16x64xf32> -> vector<16x384xf32>
    %149 = vector.extract_strided_slice %3 {offsets = [16, 0], sizes = [16, 384], strides = [1, 1]} : vector<32x1152xf32> to vector<16x384xf32>
    %150 = vector.extract_strided_slice %3 {offsets = [16, 384], sizes = [16, 384], strides = [1, 1]} : vector<32x1152xf32> to vector<16x384xf32>
    %151 = vector.extract_strided_slice %3 {offsets = [16, 768], sizes = [16, 384], strides = [1, 1]} : vector<32x1152xf32> to vector<16x384xf32>
    %152 = vector.extract_strided_slice %149 {offsets = [0, 0], sizes = [16, 64], strides = [1, 1]} : vector<16x384xf32> to vector<16x64xf32>
    %153 = arith.truncf %152 : vector<16x64xf32> to vector<16x64xbf16>
    %154 = vector.extract_strided_slice %150 {offsets = [0, 0], sizes = [16, 64], strides = [1, 1]} : vector<16x384xf32> to vector<16x64xf32>
    %155 = arith.truncf %154 : vector<16x64xf32> to vector<16x64xbf16>
    %156 = vector.extract_strided_slice %151 {offsets = [0, 0], sizes = [16, 64], strides = [1, 1]} : vector<16x384xf32> to vector<16x64xf32>
    %157 = arith.truncf %156 : vector<16x64xf32> to vector<16x64xbf16>
    %cst_39 = arith.constant dense<0.000000e+00> : vector<16x16xf32>
    %158 = tpu.matmul %153, %155, %cst_39 {dimension_numbers = #tpu.dot_dimension_numbers<[1], [1], [0], [0], [0, 0, 1, 0], [], []>} : vector<16x64xbf16>, vector<16x64xbf16>, vector<16x16xf32> -> vector<16x16xf32>
    %cst_40 = arith.constant 0.0510310382 : f32
    %159 = vector.broadcast %cst_40 : f32 to vector<16x16xf32>
    %160 = arith.mulf %158, %159 : vector<16x16xf32>
    %cst_41 = arith.constant -1.000000e+30 : f32
    %161 = vector.broadcast %cst_41 : f32 to vector<16x16xf32>
    %162 = arith.select %6, %160, %161 : vector<16x16xi1>, vector<16x16xf32>
    %cst_42 = arith.constant dense<0xFF800000> : vector<16xf32>
    %163 = vector.multi_reduction <maximumf>, %162, %cst_42 [1] : vector<16x16xf32> to vector<16xf32>
    %164 = vector.shape_cast %163 : vector<16xf32> to vector<16x1xf32>
    %165 = vector.broadcast %164 : vector<16x1xf32> to vector<16x16xf32>
    %166 = arith.subf %162, %165 : vector<16x16xf32>
    %167 = math.exp %166 : vector<16x16xf32>
    %cst_43 = arith.constant dense<0.000000e+00> : vector<16xf32>
    %168 = vector.multi_reduction <add>, %167, %cst_43 [1] : vector<16x16xf32> to vector<16xf32>
    %169 = vector.shape_cast %168 : vector<16xf32> to vector<16x1xf32>
    %170 = tpu.reciprocal %169 {approx = true} : vector<16x1xf32> -> vector<16x1xf32>
    %171 = vector.broadcast %170 : vector<16x1xf32> to vector<16x16xf32>
    %172 = arith.mulf %167, %171 : vector<16x16xf32>
    %173 = arith.truncf %172 : vector<16x16xf32> to vector<16x16xbf16>
    %cst_44 = arith.constant dense<0.000000e+00> : vector<16x64xf32>
    %174 = tpu.matmul %173, %157, %cst_44 {dimension_numbers = #tpu.dot_dimension_numbers<[1], [0], [0], [1], [0, 0, 1, 1], [], []>} : vector<16x16xbf16>, vector<16x64xbf16>, vector<16x64xf32> -> vector<16x64xf32>
    %175 = vector.extract_strided_slice %149 {offsets = [0, 64], sizes = [16, 64], strides = [1, 1]} : vector<16x384xf32> to vector<16x64xf32>
    %176 = arith.truncf %175 : vector<16x64xf32> to vector<16x64xbf16>
    %177 = vector.extract_strided_slice %150 {offsets = [0, 64], sizes = [16, 64], strides = [1, 1]} : vector<16x384xf32> to vector<16x64xf32>
    %178 = arith.truncf %177 : vector<16x64xf32> to vector<16x64xbf16>
    %179 = vector.extract_strided_slice %151 {offsets = [0, 64], sizes = [16, 64], strides = [1, 1]} : vector<16x384xf32> to vector<16x64xf32>
    %180 = arith.truncf %179 : vector<16x64xf32> to vector<16x64xbf16>
    %cst_45 = arith.constant dense<0.000000e+00> : vector<16x16xf32>
    %181 = tpu.matmul %176, %178, %cst_45 {dimension_numbers = #tpu.dot_dimension_numbers<[1], [1], [0], [0], [0, 0, 1, 0], [], []>} : vector<16x64xbf16>, vector<16x64xbf16>, vector<16x16xf32> -> vector<16x16xf32>
    %cst_46 = arith.constant 0.0510310382 : f32
    %182 = vector.broadcast %cst_46 : f32 to vector<16x16xf32>
    %183 = arith.mulf %181, %182 : vector<16x16xf32>
    %cst_47 = arith.constant -1.000000e+30 : f32
    %184 = vector.broadcast %cst_47 : f32 to vector<16x16xf32>
    %185 = arith.select %6, %183, %184 : vector<16x16xi1>, vector<16x16xf32>
    %cst_48 = arith.constant dense<0xFF800000> : vector<16xf32>
    %186 = vector.multi_reduction <maximumf>, %185, %cst_48 [1] : vector<16x16xf32> to vector<16xf32>
    %187 = vector.shape_cast %186 : vector<16xf32> to vector<16x1xf32>
    %188 = vector.broadcast %187 : vector<16x1xf32> to vector<16x16xf32>
    %189 = arith.subf %185, %188 : vector<16x16xf32>
    %190 = math.exp %189 : vector<16x16xf32>
    %cst_49 = arith.constant dense<0.000000e+00> : vector<16xf32>
    %191 = vector.multi_reduction <add>, %190, %cst_49 [1] : vector<16x16xf32> to vector<16xf32>
    %192 = vector.shape_cast %191 : vector<16xf32> to vector<16x1xf32>
    %193 = tpu.reciprocal %192 {approx = true} : vector<16x1xf32> -> vector<16x1xf32>
    %194 = vector.broadcast %193 : vector<16x1xf32> to vector<16x16xf32>
    %195 = arith.mulf %190, %194 : vector<16x16xf32>
    %196 = arith.truncf %195 : vector<16x16xf32> to vector<16x16xbf16>
    %cst_50 = arith.constant dense<0.000000e+00> : vector<16x64xf32>
    %197 = tpu.matmul %196, %180, %cst_50 {dimension_numbers = #tpu.dot_dimension_numbers<[1], [0], [0], [1], [0, 0, 1, 1], [], []>} : vector<16x16xbf16>, vector<16x64xbf16>, vector<16x64xf32> -> vector<16x64xf32>
    %198 = vector.extract_strided_slice %149 {offsets = [0, 128], sizes = [16, 64], strides = [1, 1]} : vector<16x384xf32> to vector<16x64xf32>
    %199 = arith.truncf %198 : vector<16x64xf32> to vector<16x64xbf16>
    %200 = vector.extract_strided_slice %150 {offsets = [0, 128], sizes = [16, 64], strides = [1, 1]} : vector<16x384xf32> to vector<16x64xf32>
    %201 = arith.truncf %200 : vector<16x64xf32> to vector<16x64xbf16>
    %202 = vector.extract_strided_slice %151 {offsets = [0, 128], sizes = [16, 64], strides = [1, 1]} : vector<16x384xf32> to vector<16x64xf32>
    %203 = arith.truncf %202 : vector<16x64xf32> to vector<16x64xbf16>
    %cst_51 = arith.constant dense<0.000000e+00> : vector<16x16xf32>
    %204 = tpu.matmul %199, %201, %cst_51 {dimension_numbers = #tpu.dot_dimension_numbers<[1], [1], [0], [0], [0, 0, 1, 0], [], []>} : vector<16x64xbf16>, vector<16x64xbf16>, vector<16x16xf32> -> vector<16x16xf32>
    %cst_52 = arith.constant 0.0510310382 : f32
    %205 = vector.broadcast %cst_52 : f32 to vector<16x16xf32>
    %206 = arith.mulf %204, %205 : vector<16x16xf32>
    %cst_53 = arith.constant -1.000000e+30 : f32
    %207 = vector.broadcast %cst_53 : f32 to vector<16x16xf32>
    %208 = arith.select %6, %206, %207 : vector<16x16xi1>, vector<16x16xf32>
    %cst_54 = arith.constant dense<0xFF800000> : vector<16xf32>
    %209 = vector.multi_reduction <maximumf>, %208, %cst_54 [1] : vector<16x16xf32> to vector<16xf32>
    %210 = vector.shape_cast %209 : vector<16xf32> to vector<16x1xf32>
    %211 = vector.broadcast %210 : vector<16x1xf32> to vector<16x16xf32>
    %212 = arith.subf %208, %211 : vector<16x16xf32>
    %213 = math.exp %212 : vector<16x16xf32>
    %cst_55 = arith.constant dense<0.000000e+00> : vector<16xf32>
    %214 = vector.multi_reduction <add>, %213, %cst_55 [1] : vector<16x16xf32> to vector<16xf32>
    %215 = vector.shape_cast %214 : vector<16xf32> to vector<16x1xf32>
    %216 = tpu.reciprocal %215 {approx = true} : vector<16x1xf32> -> vector<16x1xf32>
    %217 = vector.broadcast %216 : vector<16x1xf32> to vector<16x16xf32>
    %218 = arith.mulf %213, %217 : vector<16x16xf32>
    %219 = arith.truncf %218 : vector<16x16xf32> to vector<16x16xbf16>
    %cst_56 = arith.constant dense<0.000000e+00> : vector<16x64xf32>
    %220 = tpu.matmul %219, %203, %cst_56 {dimension_numbers = #tpu.dot_dimension_numbers<[1], [0], [0], [1], [0, 0, 1, 1], [], []>} : vector<16x16xbf16>, vector<16x64xbf16>, vector<16x64xf32> -> vector<16x64xf32>
    %221 = vector.extract_strided_slice %149 {offsets = [0, 192], sizes = [16, 64], strides = [1, 1]} : vector<16x384xf32> to vector<16x64xf32>
    %222 = arith.truncf %221 : vector<16x64xf32> to vector<16x64xbf16>
    %223 = vector.extract_strided_slice %150 {offsets = [0, 192], sizes = [16, 64], strides = [1, 1]} : vector<16x384xf32> to vector<16x64xf32>
    %224 = arith.truncf %223 : vector<16x64xf32> to vector<16x64xbf16>
    %225 = vector.extract_strided_slice %151 {offsets = [0, 192], sizes = [16, 64], strides = [1, 1]} : vector<16x384xf32> to vector<16x64xf32>
    %226 = arith.truncf %225 : vector<16x64xf32> to vector<16x64xbf16>
    %cst_57 = arith.constant dense<0.000000e+00> : vector<16x16xf32>
    %227 = tpu.matmul %222, %224, %cst_57 {dimension_numbers = #tpu.dot_dimension_numbers<[1], [1], [0], [0], [0, 0, 1, 0], [], []>} : vector<16x64xbf16>, vector<16x64xbf16>, vector<16x16xf32> -> vector<16x16xf32>
    %cst_58 = arith.constant 0.0510310382 : f32
    %228 = vector.broadcast %cst_58 : f32 to vector<16x16xf32>
    %229 = arith.mulf %227, %228 : vector<16x16xf32>
    %cst_59 = arith.constant -1.000000e+30 : f32
    %230 = vector.broadcast %cst_59 : f32 to vector<16x16xf32>
    %231 = arith.select %6, %229, %230 : vector<16x16xi1>, vector<16x16xf32>
    %cst_60 = arith.constant dense<0xFF800000> : vector<16xf32>
    %232 = vector.multi_reduction <maximumf>, %231, %cst_60 [1] : vector<16x16xf32> to vector<16xf32>
    %233 = vector.shape_cast %232 : vector<16xf32> to vector<16x1xf32>
    %234 = vector.broadcast %233 : vector<16x1xf32> to vector<16x16xf32>
    %235 = arith.subf %231, %234 : vector<16x16xf32>
    %236 = math.exp %235 : vector<16x16xf32>
    %cst_61 = arith.constant dense<0.000000e+00> : vector<16xf32>
    %237 = vector.multi_reduction <add>, %236, %cst_61 [1] : vector<16x16xf32> to vector<16xf32>
    %238 = vector.shape_cast %237 : vector<16xf32> to vector<16x1xf32>
    %239 = tpu.reciprocal %238 {approx = true} : vector<16x1xf32> -> vector<16x1xf32>
    %240 = vector.broadcast %239 : vector<16x1xf32> to vector<16x16xf32>
    %241 = arith.mulf %236, %240 : vector<16x16xf32>
    %242 = arith.truncf %241 : vector<16x16xf32> to vector<16x16xbf16>
    %cst_62 = arith.constant dense<0.000000e+00> : vector<16x64xf32>
    %243 = tpu.matmul %242, %226, %cst_62 {dimension_numbers = #tpu.dot_dimension_numbers<[1], [0], [0], [1], [0, 0, 1, 1], [], []>} : vector<16x16xbf16>, vector<16x64xbf16>, vector<16x64xf32> -> vector<16x64xf32>
    %244 = vector.extract_strided_slice %149 {offsets = [0, 256], sizes = [16, 64], strides = [1, 1]} : vector<16x384xf32> to vector<16x64xf32>
    %245 = arith.truncf %244 : vector<16x64xf32> to vector<16x64xbf16>
    %246 = vector.extract_strided_slice %150 {offsets = [0, 256], sizes = [16, 64], strides = [1, 1]} : vector<16x384xf32> to vector<16x64xf32>
    %247 = arith.truncf %246 : vector<16x64xf32> to vector<16x64xbf16>
    %248 = vector.extract_strided_slice %151 {offsets = [0, 256], sizes = [16, 64], strides = [1, 1]} : vector<16x384xf32> to vector<16x64xf32>
    %249 = arith.truncf %248 : vector<16x64xf32> to vector<16x64xbf16>
    %cst_63 = arith.constant dense<0.000000e+00> : vector<16x16xf32>
    %250 = tpu.matmul %245, %247, %cst_63 {dimension_numbers = #tpu.dot_dimension_numbers<[1], [1], [0], [0], [0, 0, 1, 0], [], []>} : vector<16x64xbf16>, vector<16x64xbf16>, vector<16x16xf32> -> vector<16x16xf32>
    %cst_64 = arith.constant 0.0510310382 : f32
    %251 = vector.broadcast %cst_64 : f32 to vector<16x16xf32>
    %252 = arith.mulf %250, %251 : vector<16x16xf32>
    %cst_65 = arith.constant -1.000000e+30 : f32
    %253 = vector.broadcast %cst_65 : f32 to vector<16x16xf32>
    %254 = arith.select %6, %252, %253 : vector<16x16xi1>, vector<16x16xf32>
    %cst_66 = arith.constant dense<0xFF800000> : vector<16xf32>
    %255 = vector.multi_reduction <maximumf>, %254, %cst_66 [1] : vector<16x16xf32> to vector<16xf32>
    %256 = vector.shape_cast %255 : vector<16xf32> to vector<16x1xf32>
    %257 = vector.broadcast %256 : vector<16x1xf32> to vector<16x16xf32>
    %258 = arith.subf %254, %257 : vector<16x16xf32>
    %259 = math.exp %258 : vector<16x16xf32>
    %cst_67 = arith.constant dense<0.000000e+00> : vector<16xf32>
    %260 = vector.multi_reduction <add>, %259, %cst_67 [1] : vector<16x16xf32> to vector<16xf32>
    %261 = vector.shape_cast %260 : vector<16xf32> to vector<16x1xf32>
    %262 = tpu.reciprocal %261 {approx = true} : vector<16x1xf32> -> vector<16x1xf32>
    %263 = vector.broadcast %262 : vector<16x1xf32> to vector<16x16xf32>
    %264 = arith.mulf %259, %263 : vector<16x16xf32>
    %265 = arith.truncf %264 : vector<16x16xf32> to vector<16x16xbf16>
    %cst_68 = arith.constant dense<0.000000e+00> : vector<16x64xf32>
    %266 = tpu.matmul %265, %249, %cst_68 {dimension_numbers = #tpu.dot_dimension_numbers<[1], [0], [0], [1], [0, 0, 1, 1], [], []>} : vector<16x16xbf16>, vector<16x64xbf16>, vector<16x64xf32> -> vector<16x64xf32>
    %267 = vector.extract_strided_slice %149 {offsets = [0, 320], sizes = [16, 64], strides = [1, 1]} : vector<16x384xf32> to vector<16x64xf32>
    %268 = arith.truncf %267 : vector<16x64xf32> to vector<16x64xbf16>
    %269 = vector.extract_strided_slice %150 {offsets = [0, 320], sizes = [16, 64], strides = [1, 1]} : vector<16x384xf32> to vector<16x64xf32>
    %270 = arith.truncf %269 : vector<16x64xf32> to vector<16x64xbf16>
    %271 = vector.extract_strided_slice %151 {offsets = [0, 320], sizes = [16, 64], strides = [1, 1]} : vector<16x384xf32> to vector<16x64xf32>
    %272 = arith.truncf %271 : vector<16x64xf32> to vector<16x64xbf16>
    %cst_69 = arith.constant dense<0.000000e+00> : vector<16x16xf32>
    %273 = tpu.matmul %268, %270, %cst_69 {dimension_numbers = #tpu.dot_dimension_numbers<[1], [1], [0], [0], [0, 0, 1, 0], [], []>} : vector<16x64xbf16>, vector<16x64xbf16>, vector<16x16xf32> -> vector<16x16xf32>
    %cst_70 = arith.constant 0.0510310382 : f32
    %274 = vector.broadcast %cst_70 : f32 to vector<16x16xf32>
    %275 = arith.mulf %273, %274 : vector<16x16xf32>
    %cst_71 = arith.constant -1.000000e+30 : f32
    %276 = vector.broadcast %cst_71 : f32 to vector<16x16xf32>
    %277 = arith.select %6, %275, %276 : vector<16x16xi1>, vector<16x16xf32>
    %cst_72 = arith.constant dense<0xFF800000> : vector<16xf32>
    %278 = vector.multi_reduction <maximumf>, %277, %cst_72 [1] : vector<16x16xf32> to vector<16xf32>
    %279 = vector.shape_cast %278 : vector<16xf32> to vector<16x1xf32>
    %280 = vector.broadcast %279 : vector<16x1xf32> to vector<16x16xf32>
    %281 = arith.subf %277, %280 : vector<16x16xf32>
    %282 = math.exp %281 : vector<16x16xf32>
    %cst_73 = arith.constant dense<0.000000e+00> : vector<16xf32>
    %283 = vector.multi_reduction <add>, %282, %cst_73 [1] : vector<16x16xf32> to vector<16xf32>
    %284 = vector.shape_cast %283 : vector<16xf32> to vector<16x1xf32>
    %285 = tpu.reciprocal %284 {approx = true} : vector<16x1xf32> -> vector<16x1xf32>
    %286 = vector.broadcast %285 : vector<16x1xf32> to vector<16x16xf32>
    %287 = arith.mulf %282, %286 : vector<16x16xf32>
    %288 = arith.truncf %287 : vector<16x16xf32> to vector<16x16xbf16>
    %cst_74 = arith.constant dense<0.000000e+00> : vector<16x64xf32>
    %289 = tpu.matmul %288, %272, %cst_74 {dimension_numbers = #tpu.dot_dimension_numbers<[1], [0], [0], [1], [0, 0, 1, 1], [], []>} : vector<16x16xbf16>, vector<16x64xbf16>, vector<16x64xf32> -> vector<16x64xf32>
    %290 = tpu.concatenate %174, %197, %220, %243, %266, %289 in 1 : vector<16x64xf32>, vector<16x64xf32>, vector<16x64xf32>, vector<16x64xf32>, vector<16x64xf32>, vector<16x64xf32> -> vector<16x384xf32>
    %291 = tpu.concatenate %148, %290 in 0 : vector<16x384xf32>, vector<16x384xf32> -> vector<32x384xf32>
    %292 = arith.truncf %291 : vector<32x384xf32> to vector<32x384xbf16>
    %c0_75 = arith.constant 0 : index
    %c0_76 = arith.constant 0 : index
    %293 = vector.load %arg2[%c0_75, %c0_76] : memref<384x384xbf16, #tpu.memory_space<vmem>>, vector<384x384xbf16>
    %cst_77 = arith.constant dense<0.000000e+00> : vector<32x384xf32>
    %294 = tpu.matmul %292, %293, %cst_77 {dimension_numbers = #tpu.dot_dimension_numbers<[1], [0], [0], [1], [0, 0, 1, 1], [], []>} : vector<32x384xbf16>, vector<384x384xbf16>, vector<32x384xf32> -> vector<32x384xf32>
    %c0_78 = arith.constant 0 : index
    %c0_79 = arith.constant 0 : index
    %295 = vector.load %arg3[%c0_78, %c0_79] : memref<1x384xf32, #tpu.memory_space<vmem>>, vector<1x384xf32>
    %296 = vector.broadcast %295 : vector<1x384xf32> to vector<32x384xf32>
    %297 = arith.addf %294, %296 : vector<32x384xf32>
    %c0_80 = arith.constant 0 : index
    %c0_81 = arith.constant 0 : index
    %298 = vector.load %arg4[%c0_80, %c0_81] : memref<32x384xf32, #tpu.memory_space<vmem>>, vector<32x384xf32>
    tpu.vector_store %arg4[%c0_80, %c0_81], %297 {strides = array<i32>} : memref<32x384xf32, #tpu.memory_space<vmem>>, vector<32x384xf32>,
    return
  }
}

</mosaic_0001>

<bundles_post_ra>
// kernel: tpu_custom_call.1
= control target key start
LH: loop header
LB: loop body
LE: loop exit
PB: predicated region body
PF: predicated region fallthrough
CT: control target
= control target key end

     0   :  { %9 = vsyncpa [#allocation3], 0  ;;  %s6255_s0 = inlined_call_operand.hbm [shape: f32[32,384], index: 0, kind: input, shape index: {}]   ;;  %s6256_s1 = inlined_call_operand.hbm [shape: bf16[384,1152], index: 1, kind: input, shape index: {}]   ;;  %s6257_s2 = inlined_call_operand.hbm [shape: bf16[384,384], index: 2, kind: input, shape index: {}]   ;;  %s6258_s3 = inlined_call_operand.vmem [shape: f32[1,384], index: 3, kind: input, shape index: {}]   ;;  %s6259_s4 = inlined_call_operand.hbm [shape: f32[32,384], index: 4, kind: output, shape index: {}]  }
   0x1   :  { %10 = vsyncpa [#allocation6], 0 }
   0x2   :  { %11 = vsyncpa [#allocation4], 0  ;;  %s5554_s15 = smov [#allocation5]   ;;  %s5460_s19 = scalar_lea.hbm %s6256_s1, 27648 }
   0x3   :  { %s29_s16 = sshll.u32 %s5554_s15, 4  ;;  %p5461_p0 = scmp.ne.s32.totalorder %s6256_s1, %s5460_s19  ;;  %s30_s16 = int_to_ptr.vmem [resolvable:$true] %s29_s16 }
   0x4   :  { %p5464_p1 = scmp.lt.u32.totalorder %s5460_s19, %s6256_s1 }
   0x6   :  { %p5466_p2 = pnand %p5464_p1, %p5461_p0 }
   0x8   :  { %5469 = shalt.err (!%p5466_p2)
}
   0x9   :  { %s5470_s24 = scalar_lea.vmem %s30_s16, 27648  ;;  %p5475_p4 = scmp.lt.s32.totalorder %s30_s16, %s30_s16 }
   0xa   :  { %p5471_p3 = scmp.ne.s32.totalorder %s30_s16, %s5470_s24  ;;  %p5476_p5 = scmp.lt.s32.totalorder %s5470_s24, %s5470_s24 }
   0xc   :  { %p5477_p6 = por %p5476_p5, %p5475_p4 }
   0xe   :  { %p5478_p7 = pnand %p5477_p6, %p5471_p3 }
  0x10   :  { %5481 = shalt.err (!%p5478_p7)
}
  0x11   :  { %s5555_s25 = smov 576   ;;  %s5556_s26 = smov 36  }
  0x12   :  { %35 = dma.hbm_to_vmem [thread:$0]  %s6256_s1, 27648, %s30_s16, [#allocation6], %s5555_s25, %s5555_s25, %s5556_s26  }
  0x13   :  { %s5557_s29 = smov [#allocation2]   ;;  %s5482_s7 = scalar_lea.hbm %s6255_s0, 1536 }
  0x14   :  { %s17_s30 = sshll.u32 %s5557_s29, 4  ;;  %p5483_p8 = scmp.ne.s32.totalorder %s6255_s0, %s5482_s7  ;;  %s18_s30 = int_to_ptr.vmem [resolvable:$true] %s17_s30 }
  0x15   :  { %p5486_p9 = scmp.lt.u32.totalorder %s5482_s7, %s6255_s0 }
  0x17   :  { %p5488_p10 = pnand %p5486_p9, %p5483_p8 }
  0x19   :  { %5491 = shalt.err (!%p5488_p10)
}
  0x1a   :  { %s5492_s12 = scalar_lea.vmem %s18_s30, 1536  ;;  %p5497_p12 = scmp.lt.s32.totalorder %s18_s30, %s18_s30 }
  0x1b   :  { %p5493_p11 = scmp.ne.s32.totalorder %s18_s30, %s5492_s12  ;;  %p5498_p13 = scmp.lt.s32.totalorder %s5492_s12, %s5492_s12 }
  0x1d   :  { %p5499_p0 = por %p5498_p13, %p5497_p12 }
  0x1f   :  { %p5500_p1 = pnand %p5499_p0, %p5493_p11 }
  0x21   :  { %5503 = shalt.err (!%p5500_p1)
}
  0x22   :  { %s5558_s1 = smov 384   ;;  %s5559_s13 = smov 24  }
  0x23   :  { %23 = dma.hbm_to_vmem [thread:$0]  %s6255_s0, 1536, %s18_s30, [#allocation3], %s5558_s1, %s5558_s1, %s5559_s13  }
  0x24   :  { %s5560_s16 = smov [#allocation7]   ;;  %s5504_s20 = scalar_lea.hbm %s6257_s2, 9216 }
  0x25   :  { %s41_s17 = sshll.u32 %s5560_s16, 4  ;;  %p5505_p2 = scmp.ne.s32.totalorder %s6257_s2, %s5504_s20  ;;  %s42_s17 = int_to_ptr.vmem [resolvable:$true] %s41_s17 }
  0x26   :  { %p5508_p3 = scmp.lt.u32.totalorder %s5504_s20, %s6257_s2 }
  0x28   :  { %p5510_p4 = pnand %p5508_p3, %p5505_p2 }
  0x2a   :  { %5513 = shalt.err (!%p5510_p4)
}
  0x2b   :  { %s5514_s25 = scalar_lea.vmem %s42_s17, 9216  ;;  %p5519_p6 = scmp.lt.s32.totalorder %s42_s17, %s42_s17 }
  0x2c   :  { %p5515_p5 = scmp.ne.s32.totalorder %s42_s17, %s5514_s25  ;;  %p5520_p7 = scmp.lt.s32.totalorder %s5514_s25, %s5514_s25 }
  0x2e   :  { %p5521_p8 = por %p5520_p7, %p5519_p6 }
  0x30   :  { %p5522_p9 = pnand %p5521_p8, %p5515_p5 }
  0x32   :  { %5525 = shalt.err (!%p5522_p9)
}
  0x33   :  { %s5561_s0 = smov 192   ;;  %s5562_s26 = smov 12  }
  0x34   :  { %47 = dma.hbm_to_vmem [thread:$0]  %s6257_s2, 9216, %s42_s17, [#allocation6], %s5561_s0, %s5561_s0, %s5562_s26  }
  0x35   :  { %5548 = dma.done.wait [#allocation3], 1536  }
  0x36   :  { %5549 = vsyncadd [#allocation3], 4294965760 }
  0x37   :  { %5550 = dma.done.wait [#allocation6], 36864  }
  0x38   :  { %5551 = vsyncadd [#allocation6], 4294930432  ;;  %v4956_v0 = vld [vmem:[#allocation5 + $0x4] ss:$36 sps:$4 sm:$0xff]   ;;  %v4958_v1 = vld [vmem:[#allocation5 + $0xc] ss:$36 sps:$4 sm:$0xff]  }
  0x39   :  { %1422 = vmatprep.subr.bf16.mxu0 %v4956_v0  ;;  %v4960_v2 = vld [vmem:[#allocation5] ss:$36 sps:$4 sm:$0xff]   ;;  %v4961_v3 = vld [vmem:[#allocation5 + $0x8] ss:$36 sps:$4 sm:$0xff]   ;;  %1528 = vmatprep.subr.bf16.mxu1 %v4958_v1  ;;  %v4964_v5 = vld [vmem:[#allocation5 + $0x54] ss:$36 sps:$4 sm:$0xff]  }
  0x3a   :  { %v4962_v4 = vld [vmem:[#allocation5 + $0x4c] ss:$36 sps:$4 sm:$0xff]   ;;  %1423 = vmatpush1.bf16.msra.mxu0 %v4960_v2  ;;  %1529 = vmatpush1.bf16.msra.mxu1 %v4961_v3  ;;  %v4968_v8 = vld [vmem:[#allocation5 + $0x94] ss:$36 sps:$4 sm:$0xff]   ;;  %v4970_v9 = vld [vmem:[#allocation5 + $0x9c] ss:$36 sps:$4 sm:$0xff]  }
  0x3b   :  { %v4966_v6 = vld [vmem:[#allocation5 + $0x48] ss:$36 sps:$4 sm:$0xff]   ;;  %1424 = vmatprep.subr.bf16.mxu0 %v4962_v4  ;;  %v4967_v7 = vld [vmem:[#allocation5 + $0x50] ss:$36 sps:$4 sm:$0xff]   ;;  %1530 = vmatprep.subr.bf16.mxu1 %v4964_v5  ;;  %v4973_v11 = vld [vmem:[#allocation5 + $0x98] ss:$36 sps:$4 sm:$0xff]  }
  0x3c   :  { %v4972_v10 = vld [vmem:[#allocation5 + $0x90] ss:$36 sps:$4 sm:$0xff]   ;;  %v4974_v12 = vld [vmem:[#allocation5 + $0xdc] ss:$36 sps:$4 sm:$0xff]   ;;  %v4976_v13 = vld [vmem:[#allocation5 + $0xe4] ss:$36 sps:$4 sm:$0xff]  }
  0x3d   :  { %v4978_v14 = vld [vmem:[#allocation5 + $0xd8] ss:$36 sps:$4 sm:$0xff]   ;;  %v4979_v15 = vld [vmem:[#allocation5 + $0xe0] ss:$36 sps:$4 sm:$0xff]   ;;  %v4982_v17 = vld [vmem:[#allocation5 + $0x12c] ss:$36 sps:$4 sm:$0xff]  }
  0x3e   :  { %1425 = vmatpush1.bf16.msra.mxu0 %v4966_v6  ;;  %1531 = vmatpush1.bf16.msra.mxu1 %v4967_v7  ;;  %v4980_v16 = vld [vmem:[#allocation5 + $0x124] ss:$36 sps:$4 sm:$0xff]   ;;  %v4986_v20 = vld [vmem:[#allocation5 + $0x16c] ss:$36 sps:$4 sm:$0xff]   ;;  %v4988_v21 = vld [vmem:[#allocation5 + $0x174] ss:$36 sps:$4 sm:$0xff]  }
  0x3f   :  { %1426 = vmatprep.subr.bf16.mxu0 %v4968_v8  ;;  %1532 = vmatprep.subr.bf16.mxu1 %v4970_v9  ;;  %v4984_v18 = vld [vmem:[#allocation5 + $0x120] ss:$36 sps:$4 sm:$0xff]   ;;  %v4985_v19 = vld [vmem:[#allocation5 + $0x128] ss:$36 sps:$4 sm:$0xff]   ;;  %v4991_v23 = vld [vmem:[#allocation5 + $0x170] ss:$36 sps:$4 sm:$0xff]  }
  0x40   :  { %v4990_v22 = vld [vmem:[#allocation5 + $0x168] ss:$36 sps:$4 sm:$0xff]   ;;  %v4992_v24 = vld [vmem:[#allocation5 + $0x1b4] ss:$36 sps:$4 sm:$0xff]   ;;  %v4994_v25 = vld [vmem:[#allocation5 + $0x1bc] ss:$36 sps:$4 sm:$0xff]  }
  0x41   :  { %v4996_v26 = vld [vmem:[#allocation5 + $0x1b0] ss:$36 sps:$4 sm:$0xff]   ;;  %v4997_v27 = vld [vmem:[#allocation5 + $0x1b8] ss:$36 sps:$4 sm:$0xff]   ;;  %v5000_v29 = vld [vmem:[#allocation5 + $0x204] ss:$36 sps:$4 sm:$0xff]  }
  0x42   :  { %1427 = vmatpush1.bf16.msra.mxu0 %v4972_v10  ;;  %1533 = vmatpush1.bf16.msra.mxu1 %v4973_v11  ;;  %v4998_v28 = vld [vmem:[#allocation5 + $0x1fc] ss:$36 sps:$4 sm:$0xff]   ;;  %v5004_v32 = vld [vmem:[#allocation5 + $0x244] ss:$36 sps:$4 sm:$0xff]   ;;  %v5006_v33 = vld [vmem:[#allocation5 + $0x24c] ss:$36 sps:$4 sm:$0xff]  }
  0x43   :  { %1428 = vmatprep.subr.bf16.mxu0 %v4974_v12  ;;  %1534 = vmatprep.subr.bf16.mxu1 %v4976_v13  ;;  %v5002_v30 = vld [vmem:[#allocation5 + $0x1f8] ss:$36 sps:$4 sm:$0xff]   ;;  %v5003_v31 = vld [vmem:[#allocation5 + $0x200] ss:$36 sps:$4 sm:$0xff]   ;;  %v5009_v35 = vld [vmem:[#allocation5 + $0x248] ss:$36 sps:$4 sm:$0xff]  }
  0x44   :  { %v5008_v34 = vld [vmem:[#allocation5 + $0x240] ss:$36 sps:$4 sm:$0xff]   ;;  %v5010_v36 = vld [vmem:[#allocation5 + $0x28c] ss:$36 sps:$4 sm:$0xff]   ;;  %v5012_v37 = vld [vmem:[#allocation5 + $0x294] ss:$36 sps:$4 sm:$0xff]  }
  0x45   :  { %v5014_v38 = vld [vmem:[#allocation5 + $0x288] ss:$36 sps:$4 sm:$0xff]   ;;  %v5015_v39 = vld [vmem:[#allocation5 + $0x290] ss:$36 sps:$4 sm:$0xff]   ;;  %v5018_v41 = vld [vmem:[#allocation5 + $0x2dc] ss:$36 sps:$4 sm:$0xff]  }
  0x46   :  { %1429 = vmatpush1.bf16.msra.mxu0 %v4978_v14  ;;  %1535 = vmatpush1.bf16.msra.mxu1 %v4979_v15  ;;  %v5016_v40 = vld [vmem:[#allocation5 + $0x2d4] ss:$36 sps:$4 sm:$0xff]   ;;  %v5022_v44 = vld [vmem:[#allocation5 + $0x31c] ss:$36 sps:$4 sm:$0xff]   ;;  %v5024_v45 = vld [vmem:[#allocation5 + $0x324] ss:$36 sps:$4 sm:$0xff]  }
  0x47   :  { %1430 = vmatprep.subr.bf16.mxu0 %v4980_v16  ;;  %1536 = vmatprep.subr.bf16.mxu1 %v4982_v17  ;;  %v5020_v42 = vld [vmem:[#allocation5 + $0x2d0] ss:$36 sps:$4 sm:$0xff]   ;;  %v5021_v43 = vld [vmem:[#allocation5 + $0x2d8] ss:$36 sps:$4 sm:$0xff]   ;;  %v61_v46 = vld [vmem:[#allocation2 + $0x8] sm:$0xff]  ;;  %vm5565_vm0 = vmmov 0  }
  0x48   :  { %v64_v47 = vld [vmem:[#allocation2 + $0x20] sm:$0xff]  ;;  %v5026_v48 = vld [vmem:[#allocation5 + $0x318] ss:$36 sps:$4 sm:$0xff]   ;;  %v5030_v52 = vld [vmem:[#allocation5 + $0x36c] ss:$36 sps:$4 sm:$0xff]   ;;  %vm1954_vm1 = vcmask 523264  }
  0x49   :  { %v5027_v49 = vld [vmem:[#allocation5 + $0x320] ss:$36 sps:$4 sm:$0xff]   ;;  %v5632_v50 = vpack.c.bf16 %v64_v47, %v61_v46  ;;  %v5033_v54 = vld [vmem:[#allocation5 + $0x368] ss:$36 sps:$4 sm:$0xff]   ;;  %v5036_v56 = vld [vmem:[#allocation5 + $0x3b4] ss:$36 sps:$4 sm:$0xff]  }
  0x4a   :  { %1431 = vmatpush1.bf16.msra.mxu0 %v4984_v18  ;;  %1537 = vmatpush1.bf16.msra.mxu1 %v4985_v19  ;;  %v5028_v51 = vld [vmem:[#allocation5 + $0x364] ss:$36 sps:$4 sm:$0xff]   ;;  %v5034_v55 = vld [vmem:[#allocation5 + $0x3ac] ss:$36 sps:$4 sm:$0xff]   ;;  %v5040_v59 = vld [vmem:[#allocation5 + $0x3f4] ss:$36 sps:$4 sm:$0xff]  }
  0x4b   :  { %1432 = vmatprep.subr.bf16.mxu0 %v4986_v20  ;;  %1538 = vmatprep.subr.bf16.mxu1 %v4988_v21  ;;  %v5032_v53 = vld [vmem:[#allocation5 + $0x360] ss:$36 sps:$4 sm:$0xff]   ;;  %v5038_v57 = vld [vmem:[#allocation5 + $0x3a8] ss:$36 sps:$4 sm:$0xff]   ;;  %v5039_v58 = vld [vmem:[#allocation5 + $0x3b0] ss:$36 sps:$4 sm:$0xff]  }
  0x4c   :  { %1454 = vmatprep.mubr.bf16.mxu0 %v5632_v50  ;;  %1560 = vmatprep.mubr.bf16.mxu1 %v5632_v50  ;;  %v5042_v60 = vld [vmem:[#allocation5 + $0x3fc] ss:$36 sps:$4 sm:$0xff]   ;;  %v5044_v61 = vld [vmem:[#allocation5 + $0x3f0] ss:$36 sps:$4 sm:$0xff]   ;;  %v5048_v0 = vld [vmem:[#allocation5 + $0x444] ss:$36 sps:$4 sm:$0xff]  }
  0x4d   :  { %v5045_v62 = vld [vmem:[#allocation5 + $0x3f8] ss:$36 sps:$4 sm:$0xff]   ;;  %v5051_v2 = vld [vmem:[#allocation5 + $0x440] ss:$36 sps:$4 sm:$0xff]   ;;  %v5057_v6 = vld [vmem:[#allocation5 + $0x48c] ss:$36 sps:$4 sm:$0xff]  }
  0x4e   :  { %1433 = vmatpush1.bf16.msra.mxu0 %v4990_v22  ;;  %1539 = vmatpush1.bf16.msra.mxu1 %v4991_v23  ;;  %v5046_v63 = vld [vmem:[#allocation5 + $0x43c] ss:$36 sps:$4 sm:$0xff]   ;;  %v5054_v3 = vld [vmem:[#allocation5 + $0x484] ss:$36 sps:$4 sm:$0xff]   ;;  %v70_v11 = vld [vmem:[#allocation2 + $0x50] sm:$0xff]  ;;  %vm2006_vm3 = vcmask 130048  }
  0x4f   :  { %1434 = vmatprep.subr.bf16.mxu0 %v4992_v24  ;;  %1540 = vmatprep.subr.bf16.mxu1 %v4994_v25  ;;  %v5050_v1 = vld [vmem:[#allocation5 + $0x438] ss:$36 sps:$4 sm:$0xff]   ;;  %v60_v4 = vld [vmem:[#allocation2] sm:$0xff]  ;;  %v5055_v8 = vld [vmem:[#allocation5 + $0x488] ss:$36 sps:$4 sm:$0xff]   ;;  %s5566_s2 = smov 64  }
  0x50   :  { %v63_v5 = vld [vmem:[#allocation2 + $0x18] sm:$0xff]  ;;  %v5052_v7 = vld [vmem:[#allocation5 + $0x480] ss:$36 sps:$4 sm:$0xff]   ;;  %v5060_v12 = vld [vmem:[#allocation5 + $0x4cc] ss:$36 sps:$4 sm:$0xff]  }
  0x51   :  { %v5636_v9 = vpack.c.bf16 %v63_v5, %v60_v4  ;;  %v67_v10 = vld [vmem:[#allocation2 + $0x38] sm:$0xff]  ;;  %v5058_v14 = vld [vmem:[#allocation5 + $0x4c8] ss:$36 sps:$4 sm:$0xff]   ;;  %v5061_v16 = vld [vmem:[#allocation5 + $0x4d0] ss:$36 sps:$4 sm:$0xff]  }
  0x52   :  { %1435 = vmatpush1.bf16.msra.mxu0 %v4996_v26  ;;  %1541 = vmatpush1.bf16.msra.mxu1 %v4997_v27  ;;  %v5063_v13 = vld [vmem:[#allocation5 + $0x4d4] ss:$36 sps:$4 sm:$0xff]   ;;  %v5638_v15 = vpack.c.bf16 %v70_v11, %v67_v10  ;;  %v69_v19 = vld [vmem:[#allocation2 + $0x48] sm:$0xff]  ;;  %v5069_v20 = vld [vmem:[#allocation5 + $0x51c] ss:$36 sps:$4 sm:$0xff]  }
  0x53   :  { %1436 = vmatprep.subr.bf16.mxu0 %v4998_v28  ;;  %1542 = vmatprep.subr.bf16.mxu1 %v5000_v29  ;;  %v5066_v17 = vld [vmem:[#allocation5 + $0x514] ss:$36 sps:$4 sm:$0xff]   ;;  %v5072_v24 = vld [vmem:[#allocation5 + $0x55c] ss:$36 sps:$4 sm:$0xff]   ;;  %v5075_v25 = vld [vmem:[#allocation5 + $0x564] ss:$36 sps:$4 sm:$0xff]  }
  0x54   :  { %v66_v18 = vld [vmem:[#allocation2 + $0x30] sm:$0xff]  ;;  %v5067_v22 = vld [vmem:[#allocation5 + $0x518] ss:$36 sps:$4 sm:$0xff]   ;;  %v5073_v27 = vld [vmem:[#allocation5 + $0x560] ss:$36 sps:$4 sm:$0xff]  }
  0x55   :  { %v5064_v21 = vld [vmem:[#allocation5 + $0x510] ss:$36 sps:$4 sm:$0xff]   ;;  %v5644_v23 = vpack.c.bf16 %v69_v19, %v66_v18  ;;  %v5070_v26 = vld [vmem:[#allocation5 + $0x558] ss:$36 sps:$4 sm:$0xff]   ;;  %v5078_v28 = vld [vmem:[#allocation5 + $0x5a4] ss:$36 sps:$4 sm:$0xff]  }
  0x56   :  { %1437 = vmatpush1.bf16.msra.mxu0 %v5002_v30  ;;  %1543 = vmatpush1.bf16.msra.mxu1 %v5003_v31  ;;  %v5081_v29 = vld [vmem:[#allocation5 + $0x5ac] ss:$36 sps:$4 sm:$0xff]   ;;  %v5563_v30 = vmov 0   ;;  %v5076_v31 = vld [vmem:[#allocation5 + $0x5a0] ss:$36 sps:$4 sm:$0xff]  }
  0x57   :  { %1438 = vmatprep.subr.bf16.mxu0 %v5004_v32  ;;  %1544 = vmatprep.subr.bf16.mxu1 %v5006_v33  ;;  %v5079_v32 = vld [vmem:[#allocation5 + $0x5a8] ss:$36 sps:$4 sm:$0xff]   ;;  %v5102_v47 = vld [vmem:[#allocation5 + $0x1c] ss:$36 sps:$4 sm:$0xff]   ;;  %v5183_v5 = vld [vmem:[#allocation5 + $0x134] ss:$36 sps:$4 sm:$0xff]  }
  0x58   :  { %v5084_v33 = vld [vmem:[#allocation5 + $0x5ec] ss:$36 sps:$4 sm:$0xff]   ;;  %v5114_v4 = vld [vmem:[#allocation5 + $0x13c] ss:$36 sps:$4 sm:$0xff]   ;;  %v5123_v18 = vld [vmem:[#allocation5 + $0x214] ss:$36 sps:$4 sm:$0xff]  }
  0x59   :  { %v65_v46 = vld [vmem:[#allocation2 + $0x28] sm:$0xff]  ;;  %v5189_v10 = vld [vmem:[#allocation5 + $0x17c] ss:$36 sps:$4 sm:$0xff]  }
  0x5a   :  { %1439 = vmatpush1.bf16.msra.mxu0 %v5008_v34  ;;  %1545 = vmatpush1.bf16.msra.mxu1 %v5009_v35  ;;  %v5087_v34 = vld [vmem:[#allocation5 + $0x5f4] ss:$36 sps:$4 sm:$0xff]   ;;  %v5082_v35 = vld [vmem:[#allocation5 + $0x5e8] ss:$36 sps:$4 sm:$0xff]   ;;  %v5115_v11 = vld [vmem:[#allocation5 + $0x180] ss:$36 sps:$4 sm:$0xff]  }
  0x5b   :  { %1440 = vmatprep.subr.bf16.mxu0 %v5010_v36  ;;  %1546 = vmatprep.subr.bf16.mxu1 %v5012_v37  ;;  %v5085_v36 = vld [vmem:[#allocation5 + $0x5f0] ss:$36 sps:$4 sm:$0xff]  }
  0x5c   :  { %v5090_v37 = vld [vmem:[#allocation5 + $0x634] ss:$36 sps:$4 sm:$0xff]   ;;  %v5195_v19 = vld [vmem:[#allocation5 + $0x20c] ss:$36 sps:$4 sm:$0xff]  }
  0x5e   :  { %1441 = vmatpush1.bf16.msra.mxu0 %v5014_v38  ;;  %1547 = vmatpush1.bf16.msra.mxu1 %v5015_v39  ;;  %v5093_v38 = vld [vmem:[#allocation5 + $0x63c] ss:$36 sps:$4 sm:$0xff]   ;;  %v5088_v39 = vld [vmem:[#allocation5 + $0x630] ss:$36 sps:$4 sm:$0xff]  }
  0x5f   :  { %1442 = vmatprep.subr.bf16.mxu0 %v5016_v40  ;;  %1548 = vmatprep.subr.bf16.mxu1 %v5018_v41  ;;  %v5091_v40 = vld [vmem:[#allocation5 + $0x638] ss:$36 sps:$4 sm:$0xff]  }
  0x60   :  { %v5096_v41 = vld [vmem:[#allocation5 + $0x67c] ss:$36 sps:$4 sm:$0xff]  }
  0x62   :  { %1443 = vmatpush1.bf16.msra.mxu0 %v5020_v42  ;;  %1549 = vmatpush1.bf16.msra.mxu1 %v5021_v43  ;;  %v5099_v42 = vld [vmem:[#allocation5 + $0x684] ss:$36 sps:$4 sm:$0xff]   ;;  %v5094_v43 = vld [vmem:[#allocation5 + $0x678] ss:$36 sps:$4 sm:$0xff]  }
  0x63   :  { %1444 = vmatprep.subr.bf16.mxu0 %v5022_v44  ;;  %1550 = vmatprep.subr.bf16.mxu1 %v5024_v45  ;;  %v5097_v44 = vld [vmem:[#allocation5 + $0x680] ss:$36 sps:$4 sm:$0xff]   ;;  %v62_v45 = vld [vmem:[#allocation2 + $0x10] sm:$0xff] }
  0x66   :  { %1445 = vmatpush1.bf16.msra.mxu0 %v5026_v48  ;;  %1551 = vmatpush1.bf16.msra.mxu1 %v5027_v49  ;;  %v5159_v48 = vld [vmem:[#allocation5 + $0x14] ss:$36 sps:$4 sm:$0xff]   ;;  %v5650_v49 = vpack.c.bf16 %v65_v46, %v62_v45  ;;  %v5213_v45 = vld [vmem:[#allocation5 + $0x3bc] ss:$36 sps:$4 sm:$0xff]  }
  0x67   :  { %1446 = vmatprep.subr.bf16.mxu0 %v5028_v51  ;;  %1552 = vmatprep.subr.bf16.mxu1 %v5030_v52  ;;  %v5100_v51 = vld [vmem:[#allocation5 + $0x18] ss:$36 sps:$4 sm:$0xff]   ;;  %v5157_v52 = vld [vmem:[#allocation5 + $0x10] ss:$36 sps:$4 sm:$0xff]   ;;  %v5139_v46 = vld [vmem:[#allocation5 + $0x3c0] ss:$36 sps:$4 sm:$0xff]  }
  0x6a   :  { %1447 = vmatpush1.bf16.msra.mxu0 %v5032_v53  ;;  %1553 = vmatpush1.bf16.msra.mxu1 %v5033_v54  ;;  %v5105_v53 = vld [vmem:[#allocation5 + $0x64] ss:$36 sps:$4 sm:$0xff]   ;;  %v5165_v54 = vld [vmem:[#allocation5 + $0x5c] ss:$36 sps:$4 sm:$0xff]  }
  0x6b   :  { %1448 = vmatprep.subr.bf16.mxu0 %v5034_v55  ;;  %1554 = vmatprep.subr.bf16.mxu1 %v5036_v56  ;;  %v68_v55 = vld [vmem:[#allocation2 + $0x40] sm:$0xff]  ;;  %v71_v56 = vld [vmem:[#allocation2 + $0x58] sm:$0xff] }
  0x6e   :  { %1449 = vmatpush1.bf16.msra.mxu0 %v5038_v57  ;;  %1555 = vmatpush1.bf16.msra.mxu1 %v5039_v58  ;;  %v5103_v57 = vld [vmem:[#allocation5 + $0x60] ss:$36 sps:$4 sm:$0xff]   ;;  %v5163_v58 = vld [vmem:[#allocation5 + $0x58] ss:$36 sps:$4 sm:$0xff]  }
  0x6f   :  { %1450 = vmatprep.subr.bf16.mxu0 %v5040_v59  ;;  %1556 = vmatprep.subr.bf16.mxu1 %v5042_v60  ;;  %v5108_v59 = vld [vmem:[#allocation5 + $0xac] ss:$36 sps:$4 sm:$0xff]   ;;  %v5171_v60 = vld [vmem:[#allocation5 + $0xa4] ss:$36 sps:$4 sm:$0xff]  }
  0x72   :  { %1451 = vmatpush1.bf16.msra.mxu0 %v5044_v61  ;;  %1557 = vmatpush1.bf16.msra.mxu1 %v5045_v62  ;;  %v5656_v61 = vpack.c.bf16 %v71_v56, %v68_v55  ;;  %v5106_v62 = vld [vmem:[#allocation5 + $0xa8] ss:$36 sps:$4 sm:$0xff]   ;;  %v5148_v55 = vld [vmem:[#allocation5 + $0x498] ss:$36 sps:$4 sm:$0xff]  }
  0x73   :  { %1452 = vmatprep.subr.bf16.mxu0 %v5046_v63  ;;  %1558 = vmatprep.subr.bf16.mxu1 %v5048_v0  ;;  %v5169_v63 = vld [vmem:[#allocation5 + $0xa0] ss:$36 sps:$4 sm:$0xff]   ;;  %v5111_v0 = vld [vmem:[#allocation5 + $0xf4] ss:$36 sps:$4 sm:$0xff]  }
  0x74   :  { %v5153_v56 = vld [vmem:[#allocation5 + $0x4e4] ss:$36 sps:$4 sm:$0xff]  }
  0x76   :  { %1453 = vmatpush1.bf16.msra.mxu0 %v5050_v1  ;;  %1559 = vmatpush1.bf16.msra.mxu1 %v5051_v2  ;;  %v5177_v1 = vld [vmem:[#allocation5 + $0xec] ss:$36 sps:$4 sm:$0xff]  }
  0x77   :  { %1475 = vmatprep.subr.bf16.mxu0 %v5054_v3  ;;  %1581 = vmatprep.subr.bf16.mxu1 %v5057_v6  ;;  %v5109_v2 = vld [vmem:[#allocation5 + $0xf0] ss:$36 sps:$4 sm:$0xff]   ;;  %v5175_v3 = vld [vmem:[#allocation5 + $0xe8] ss:$36 sps:$4 sm:$0xff]   ;;  %v5112_v6 = vld [vmem:[#allocation5 + $0x138] ss:$36 sps:$4 sm:$0xff]  }
  0x79   :  { %1455 = vmatmul.mubr.bf16.vlgmr.msra.gmra.mrb[0].mxu0 %v5636_v9  ;;  %1561 = vmatmul.mubr.bf16.vlgmr.msra.gmra.mrb[0].mxu1 %v5636_v9 }
  0x7a   :  { %1476 = vmatpush1.bf16.msra.mxu0 %v5052_v7  ;;  %1582 = vmatpush1.bf16.msra.mxu1 %v5055_v8  ;;  %v5181_v7 = vld [vmem:[#allocation5 + $0x130] ss:$36 sps:$4 sm:$0xff]   ;;  %v5117_v8 = vld [vmem:[#allocation5 + $0x184] ss:$36 sps:$4 sm:$0xff]  }
  0x7b   :  { %1477 = vmatprep.subr.bf16.mxu0 %v5060_v12  ;;  %1583 = vmatprep.subr.bf16.mxu1 %v5063_v13  ;;  %v5187_v12 = vld [vmem:[#allocation5 + $0x178] ss:$36 sps:$4 sm:$0xff]   ;;  %v5120_v13 = vld [vmem:[#allocation5 + $0x1cc] ss:$36 sps:$4 sm:$0xff]  }
  0x7c   :  { %1464 = vmatprep.mubr.bf16.mxu0 %v5638_v15  ;;  %1570 = vmatprep.mubr.bf16.mxu1 %v5638_v15 }
  0x7e   :  { %1478 = vmatpush1.bf16.msra.mxu0 %v5058_v14  ;;  %1584 = vmatpush1.bf16.msra.mxu1 %v5061_v16  ;;  %v5192_v14 = vld [vmem:[#allocation5 + $0x1c4] ss:$36 sps:$4 sm:$0xff]  }
  0x7f   :  { %1479 = vmatprep.subr.bf16.mxu0 %v5066_v17  ;;  %1585 = vmatprep.subr.bf16.mxu1 %v5069_v20  ;;  %v5118_v16 = vld [vmem:[#allocation5 + $0x1c8] ss:$36 sps:$4 sm:$0xff]   ;;  %v5190_v17 = vld [vmem:[#allocation5 + $0x1c0] ss:$36 sps:$4 sm:$0xff]   ;;  %v5121_v20 = vld [vmem:[#allocation5 + $0x210] ss:$36 sps:$4 sm:$0xff]  }
  0x81   :  { %1465 = vmatmul.mubr.bf16.gmra.mrb[4].mxu0 %v5644_v23  ;;  %1571 = vmatmul.mubr.bf16.gmra.mrb[4].mxu1 %v5644_v23 }
  0x82   :  { %1480 = vmatpush1.bf16.msra.mxu0 %v5064_v21  ;;  %1586 = vmatpush1.bf16.msra.mxu1 %v5067_v22  ;;  %v5193_v21 = vld [vmem:[#allocation5 + $0x208] ss:$36 sps:$4 sm:$0xff]   ;;  %v5126_v22 = vld [vmem:[#allocation5 + $0x25c] ss:$36 sps:$4 sm:$0xff]  }
  0x83   :  { %1481 = vmatprep.subr.bf16.mxu0 %v5072_v24  ;;  %1587 = vmatprep.subr.bf16.mxu1 %v5075_v25  ;;  %v5198_v24 = vld [vmem:[#allocation5 + $0x254] ss:$36 sps:$4 sm:$0xff]  }
  0x84   :  { %1507 = vmatprep.mubr.bf16.mxu0 %v5563_v30  ;;  %1613 = vmatprep.mubr.bf16.mxu1 %v5563_v30  ;;  %v5124_v25 = vld [vmem:[#allocation5 + $0x258] ss:$36 sps:$4 sm:$0xff]  }
  0x86   :  { %1482 = vmatpush1.bf16.msra.mxu0 %v5070_v26  ;;  %1588 = vmatpush1.bf16.msra.mxu1 %v5073_v27  ;;  %v5196_v26 = vld [vmem:[#allocation5 + $0x250] ss:$36 sps:$4 sm:$0xff]   ;;  %v5129_v27 = vld [vmem:[#allocation5 + $0x2a4] ss:$36 sps:$4 sm:$0xff]  }
  0x87   :  { %1483 = vmatprep.subr.bf16.mxu0 %v5078_v28  ;;  %1589 = vmatprep.subr.bf16.mxu1 %v5081_v29  ;;  %v5201_v28 = vld [vmem:[#allocation5 + $0x29c] ss:$36 sps:$4 sm:$0xff]  }
  0x88   :  { %v5127_v29 = vld [vmem:[#allocation5 + $0x2a0] ss:$36 sps:$4 sm:$0xff]  }
  0x8a   :  { %1484 = vmatpush1.bf16.msra.mxu0 %v5076_v31  ;;  %1590 = vmatpush1.bf16.msra.mxu1 %v5079_v32  ;;  %v5199_v31 = vld [vmem:[#allocation5 + $0x298] ss:$36 sps:$4 sm:$0xff]   ;;  %v5132_v32 = vld [vmem:[#allocation5 + $0x2ec] ss:$36 sps:$4 sm:$0xff]  }
  0x8b   :  { %1485 = vmatprep.subr.bf16.mxu0 %v5084_v33  ;;  %1591 = vmatprep.subr.bf16.mxu1 %v5087_v34  ;;  %v5204_v33 = vld [vmem:[#allocation5 + $0x2e4] ss:$36 sps:$4 sm:$0xff]  }
  0x8c   :  { %v5130_v34 = vld [vmem:[#allocation5 + $0x2e8] ss:$36 sps:$4 sm:$0xff]  }
  0x8e   :  { %1486 = vmatpush1.bf16.msra.mxu0 %v5082_v35  ;;  %1592 = vmatpush1.bf16.msra.mxu1 %v5085_v36  ;;  %v5202_v35 = vld [vmem:[#allocation5 + $0x2e0] ss:$36 sps:$4 sm:$0xff]   ;;  %v5135_v36 = vld [vmem:[#allocation5 + $0x334] ss:$36 sps:$4 sm:$0xff]  }
  0x8f   :  { %1487 = vmatprep.subr.bf16.mxu0 %v5090_v37  ;;  %1593 = vmatprep.subr.bf16.mxu1 %v5093_v38  ;;  %v5207_v37 = vld [vmem:[#allocation5 + $0x32c] ss:$36 sps:$4 sm:$0xff]  }
  0x90   :  { %v5133_v38 = vld [vmem:[#allocation5 + $0x330] ss:$36 sps:$4 sm:$0xff]  }
  0x92   :  { %1488 = vmatpush1.bf16.msra.mxu0 %v5088_v39  ;;  %1594 = vmatpush1.bf16.msra.mxu1 %v5091_v40  ;;  %v5205_v39 = vld [vmem:[#allocation5 + $0x328] ss:$36 sps:$4 sm:$0xff]   ;;  %v5138_v40 = vld [vmem:[#allocation5 + $0x37c] ss:$36 sps:$4 sm:$0xff]  }
  0x93   :  { %1489 = vmatprep.subr.bf16.mxu0 %v5096_v41  ;;  %1595 = vmatprep.subr.bf16.mxu1 %v5099_v42  ;;  %v5210_v41 = vld [vmem:[#allocation5 + $0x374] ss:$36 sps:$4 sm:$0xff]  }
  0x94   :  { %v5136_v42 = vld [vmem:[#allocation5 + $0x378] ss:$36 sps:$4 sm:$0xff]  }
  0x96   :  { %1490 = vmatpush1.bf16.msra.mxu0 %v5094_v43  ;;  %1596 = vmatpush1.bf16.msra.mxu1 %v5097_v44  ;;  %v5208_v43 = vld [vmem:[#allocation5 + $0x370] ss:$36 sps:$4 sm:$0xff]   ;;  %v5141_v44 = vld [vmem:[#allocation5 + $0x3c4] ss:$36 sps:$4 sm:$0xff]  }
  0x97   :  { %1740 = vmatprep.subr.bf16.mxu1 %v5102_v47  ;;  %1634 = vmatprep.subr.bf16.mxu0 %v5159_v48  ;;  %v5211_v47 = vld [vmem:[#allocation5 + $0x3b8] ss:$36 sps:$4 sm:$0xff]   ;;  %v5144_v48 = vld [vmem:[#allocation5 + $0x40c] ss:$36 sps:$4 sm:$0xff]  }
  0x99   :  { %1508 = vmatmul.mubr.bf16.vlgmr.msra.gmra.mrb[0].mxu0 %v5650_v49  ;;  %1614 = vmatmul.mubr.bf16.vlgmr.msra.gmra.mrb[0].mxu1 %v5650_v49 }
  0x9a   :  { %1517 = vmatprep.mubr.bf16.mxu0 %v5563_v30  ;;  %1623 = vmatprep.mubr.bf16.mxu1 %v5563_v30 }
  0x9b   :  { %1741 = vmatpush1.bf16.msra.mxu1 %v5100_v51  ;;  %1635 = vmatpush1.bf16.msra.mxu0 %v5157_v52  ;;  %v5142_v51 = vld [vmem:[#allocation5 + $0x408] ss:$36 sps:$4 sm:$0xff]   ;;  %v5147_v52 = vld [vmem:[#allocation5 + $0x454] ss:$36 sps:$4 sm:$0xff]  }
  0x9c   :  { %1742 = vmatprep.subr.bf16.mxu1 %v5105_v53  ;;  %1636 = vmatprep.subr.bf16.mxu0 %v5165_v54  ;;  %v5145_v53 = vld [vmem:[#allocation5 + $0x450] ss:$36 sps:$4 sm:$0xff]   ;;  %v5150_v54 = vld [vmem:[#allocation5 + $0x49c] ss:$36 sps:$4 sm:$0xff]  }
  0x9f   :  { %1743 = vmatpush1.bf16.msra.mxu1 %v5103_v57  ;;  %1637 = vmatpush1.bf16.msra.mxu0 %v5163_v58  ;;  %v5151_v57 = vld [vmem:[#allocation5 + $0x4e0] ss:$36 sps:$4 sm:$0xff]   ;;  %v5156_v58 = vld [vmem:[#allocation5 + $0x52c] ss:$36 sps:$4 sm:$0xff]  }
  0xa0   :  { %1744 = vmatprep.subr.bf16.mxu1 %v5108_v59  ;;  %1638 = vmatprep.subr.bf16.mxu0 %v5171_v60  ;;  %v5154_v59 = vld [vmem:[#allocation5 + $0x528] ss:$36 sps:$4 sm:$0xff]   ;;  %v5162_v60 = vld [vmem:[#allocation5 + $0x574] ss:$36 sps:$4 sm:$0xff]  }
  0xa1   :  { %1518 = vmatmul.mubr.bf16.gmra.mrb[4].mxu0 %v5656_v61  ;;  %1624 = vmatmul.mubr.bf16.gmra.mrb[4].mxu1 %v5656_v61 }
  0xa2   :  { %1772 = vmatprep.mubr.bf16.mxu1 %v5632_v50  ;;  %1666 = vmatprep.mubr.bf16.mxu0 %v5632_v50 }
  0xa3   :  { %1745 = vmatpush1.bf16.msra.mxu1 %v5106_v62  ;;  %1639 = vmatpush1.bf16.msra.mxu0 %v5169_v63  ;;  %v5160_v62 = vld [vmem:[#allocation5 + $0x570] ss:$36 sps:$4 sm:$0xff]   ;;  %v5168_v63 = vld [vmem:[#allocation5 + $0x5bc] ss:$36 sps:$4 sm:$0xff]  }
  0xa4   :  { %1746 = vmatprep.subr.bf16.mxu1 %v5111_v0  ;;  %1640 = vmatprep.subr.bf16.mxu0 %v5177_v1  ;;  %v5166_v0 = vld [vmem:[#allocation5 + $0x5b8] ss:$36 sps:$4 sm:$0xff]   ;;  %v5174_v1 = vld [vmem:[#allocation5 + $0x604] ss:$36 sps:$4 sm:$0xff]  }
  0xa7   :  { %1747 = vmatpush1.bf16.msra.mxu1 %v5109_v2  ;;  %1641 = vmatpush1.bf16.msra.mxu0 %v5175_v3  ;;  %v5172_v2 = vld [vmem:[#allocation5 + $0x600] ss:$36 sps:$4 sm:$0xff]   ;;  %v5180_v3 = vld [vmem:[#allocation5 + $0x64c] ss:$36 sps:$4 sm:$0xff]  }
  0xa8   :  { %1748 = vmatprep.subr.bf16.mxu1 %v5114_v4  ;;  %1642 = vmatprep.subr.bf16.mxu0 %v5183_v5  ;;  %v5216_v4 = vld [vmem:[#allocation5 + $0x404] ss:$36 sps:$4 sm:$0xff]  }
  0xa9   :  { %v5214_v5 = vld [vmem:[#allocation5 + $0x400] ss:$36 sps:$4 sm:$0xff]  }
  0xab   :  { %1749 = vmatpush1.bf16.msra.mxu1 %v5112_v6  ;;  %1643 = vmatpush1.bf16.msra.mxu0 %v5181_v7  ;;  %v5178_v6 = vld [vmem:[#allocation5 + $0x648] ss:$36 sps:$4 sm:$0xff]   ;;  %v5186_v7 = vld [vmem:[#allocation5 + $0x694] ss:$36 sps:$4 sm:$0xff]  }
  0xac   :  { %1750 = vmatprep.subr.bf16.mxu1 %v5117_v8  ;;  %1644 = vmatprep.subr.bf16.mxu0 %v5189_v10  ;;  %v5219_v8 = vld [vmem:[#allocation5 + $0x44c] ss:$36 sps:$4 sm:$0xff]  }
  0xad   :  { %v5217_v10 = vld [vmem:[#allocation5 + $0x448] ss:$36 sps:$4 sm:$0xff]  }
  0xaf   :  { %1751 = vmatpush1.bf16.msra.mxu1 %v5115_v11  ;;  %1645 = vmatpush1.bf16.msra.mxu0 %v5187_v12  ;;  %v5184_v11 = vld [vmem:[#allocation5 + $0x690] ss:$36 sps:$4 sm:$0xff]  }
  0xb0   :  { %1752 = vmatprep.subr.bf16.mxu1 %v5120_v13  ;;  %1646 = vmatprep.subr.bf16.mxu0 %v5192_v14  ;;  %v5222_v12 = vld [vmem:[#allocation5 + $0x494] ss:$36 sps:$4 sm:$0xff]   ;;  %v5564_v14 = vmov 0.0  }
  0xb1   :  { %v5220_v13 = vld [vmem:[#allocation5 + $0x490] ss:$36 sps:$4 sm:$0xff]  }
  0xb3   :  { %1753 = vmatpush1.bf16.msra.mxu1 %v5118_v16  ;;  %1647 = vmatpush1.bf16.msra.mxu0 %v5190_v17  ;;  %v5225_v16 = vld [vmem:[#allocation5 + $0x4dc] ss:$36 sps:$4 sm:$0xff]  }
  0xb4   :  { %1754 = vmatprep.subr.bf16.mxu1 %v5123_v18  ;;  %1648 = vmatprep.subr.bf16.mxu0 %v5195_v19  ;;  %v5223_v17 = vld [vmem:[#allocation5 + $0x4d8] ss:$36 sps:$4 sm:$0xff]   ;;  %v5228_v18 = vld [vmem:[#allocation5 + $0x524] ss:$36 sps:$4 sm:$0xff]  }
  0xb5   :  { %v5226_v19 = vld [vmem:[#allocation5 + $0x520] ss:$36 sps:$4 sm:$0xff]  }
  0xb7   :  { %1755 = vmatpush1.bf16.msra.mxu1 %v5121_v20  ;;  %1649 = vmatpush1.bf16.msra.mxu0 %v5193_v21  ;;  %v5231_v20 = vld [vmem:[#allocation5 + $0x56c] ss:$36 sps:$4 sm:$0xff]  }
  0xb8   :  { %1756 = vmatprep.subr.bf16.mxu1 %v5126_v22  ;;  %1650 = vmatprep.subr.bf16.mxu0 %v5198_v24  ;;  %v5229_v21 = vld [vmem:[#allocation5 + $0x568] ss:$36 sps:$4 sm:$0xff]   ;;  %v5234_v22 = vld [vmem:[#allocation5 + $0x5b4] ss:$36 sps:$4 sm:$0xff]  }
  0xb9   :  { %v5232_v24 = vld [vmem:[#allocation5 + $0x5b0] ss:$36 sps:$4 sm:$0xff]  }
  0xbb   :  { %1757 = vmatpush1.bf16.msra.mxu1 %v5124_v25  ;;  %1651 = vmatpush1.bf16.msra.mxu0 %v5196_v26  ;;  %v5237_v25 = vld [vmem:[#allocation5 + $0x5fc] ss:$36 sps:$4 sm:$0xff]  }
  0xbc   :  { %1758 = vmatprep.subr.bf16.mxu1 %v5129_v27  ;;  %1652 = vmatprep.subr.bf16.mxu0 %v5201_v28  ;;  %v5235_v26 = vld [vmem:[#allocation5 + $0x5f8] ss:$36 sps:$4 sm:$0xff]   ;;  %v5240_v27 = vld [vmem:[#allocation5 + $0x644] ss:$36 sps:$4 sm:$0xff]  }
  0xbd   :  { %v5238_v28 = vld [vmem:[#allocation5 + $0x640] ss:$36 sps:$4 sm:$0xff]  }
  0xbf   :  { %1759 = vmatpush1.bf16.msra.mxu1 %v5127_v29  ;;  %1653 = vmatpush1.bf16.msra.mxu0 %v5199_v31  ;;  %v5243_v29 = vld [vmem:[#allocation5 + $0x68c] ss:$36 sps:$4 sm:$0xff]  }
  0xc0   :  { %1760 = vmatprep.subr.bf16.mxu1 %v5132_v32  ;;  %1654 = vmatprep.subr.bf16.mxu0 %v5204_v33  ;;  %v5241_v31 = vld [vmem:[#allocation5 + $0x688] ss:$36 sps:$4 sm:$0xff]  }
  0xc3   :  { %1761 = vmatpush1.bf16.msra.mxu1 %v5130_v34  ;;  %1655 = vmatpush1.bf16.msra.mxu0 %v5202_v35 }
  0xc4   :  { %1762 = vmatprep.subr.bf16.mxu1 %v5135_v36  ;;  %1656 = vmatprep.subr.bf16.mxu0 %v5207_v37 }
  0xc7   :  { %1763 = vmatpush1.bf16.msra.mxu1 %v5133_v38  ;;  %1657 = vmatpush1.bf16.msra.mxu0 %v5205_v39 }
  0xc8   :  { %1764 = vmatprep.subr.bf16.mxu1 %v5138_v40  ;;  %1658 = vmatprep.subr.bf16.mxu0 %v5210_v41 }
  0xcb   :  { %1765 = vmatpush1.bf16.msra.mxu1 %v5136_v42  ;;  %1659 = vmatpush1.bf16.msra.mxu0 %v5208_v43 }
  0xcc   :  { %1766 = vmatprep.subr.bf16.mxu1 %v5141_v44  ;;  %1660 = vmatprep.subr.bf16.mxu0 %v5213_v45 }
  0xcf   :  { %1767 = vmatpush1.bf16.msra.mxu1 %v5139_v46  ;;  %1661 = vmatpush1.bf16.msra.mxu0 %v5211_v47 }
  0xd0   :  { %1768 = vmatprep.subr.bf16.mxu1 %v5144_v48  ;;  %1662 = vmatprep.subr.bf16.mxu0 %v5216_v4 }
  0xd3   :  { %1769 = vmatpush1.bf16.msra.mxu1 %v5142_v51  ;;  %1663 = vmatpush1.bf16.msra.mxu0 %v5214_v5 }
  0xd4   :  { %1770 = vmatprep.subr.bf16.mxu1 %v5147_v52  ;;  %1664 = vmatprep.subr.bf16.mxu0 %v5219_v8 }
  0xd7   :  { %1771 = vmatpush1.bf16.msra.mxu1 %v5145_v53  ;;  %1665 = vmatpush1.bf16.msra.mxu0 %v5217_v10 }
  0xd8   :  { %1793 = vmatprep.subr.bf16.mxu1 %v5150_v54  ;;  %1687 = vmatprep.subr.bf16.mxu0 %v5222_v12 }
  0xda   :  { %1773 = vmatmul.mubr.bf16.vlgmr.msra.gmra.mrb[8].mxu1 %v5636_v9  ;;  %1667 = vmatmul.mubr.bf16.vlgmr.msra.gmra.mrb[8].mxu0 %v5636_v9 }
  0xdb   :  { %1794 = vmatpush1.bf16.msra.mxu1 %v5148_v55  ;;  %1782 = vmatprep.mubr.bf16.mxu1 %v5638_v15 }
  0xdc   :  { %1795 = vmatprep.subr.bf16.mxu1 %v5153_v56  ;;  %1688 = vmatpush1.bf16.msra.mxu0 %v5220_v13 }
  0xdd   :  { %1676 = vmatprep.mubr.bf16.mxu0 %v5638_v15  ;;  %1689 = vmatprep.subr.bf16.mxu0 %v5225_v16  ;;  %v1944_v16 = vlaneseq }
  0xdf   :  { %1796 = vmatpush1.bf16.msra.mxu1 %v5151_v57 }
  0xe0   :  { %1797 = vmatprep.subr.bf16.mxu1 %v5156_v58  ;;  %1690 = vmatpush1.bf16.msra.mxu0 %v5223_v17  ;;  %v5714_v17 = vshrl.u32 %v1944_v16, 7 }
  0xe1   :  { %1691 = vmatprep.subr.bf16.mxu0 %v5228_v18  ;;  %v1948_v18 = vand.u32 127, %v1944_v16  ;;  %v5256_v16 = vld [vmem:[#allocation5 + $0x410] ss:$36 sps:$4 sm:$0xff]  }
  0xe2   :  { %1783 = vmatmul.mubr.bf16.gmra.mrb[12].mxu1 %v5644_v23  ;;  %1677 = vmatmul.mubr.bf16.gmra.mrb[12].mxu0 %v5644_v23 }
  0xe3   :  { %1798 = vmatpush1.bf16.msra.mxu1 %v5154_v59  ;;  %1825 = vmatprep.mubr.bf16.mxu1 %v5563_v30  ;;  %vm5718_vm2 = vcmp.le.s32.totalorder %v1948_v18, %v5714_v17 }
  0xe4   :  { %1799 = vmatprep.subr.bf16.mxu1 %v5162_v60  ;;  %1692 = vmatpush1.bf16.msra.mxu0 %v5226_v19  ;;  %v1946_v19 = vadd.s32 8, %v5714_v17 }
  0xe5   :  { %1719 = vmatprep.mubr.bf16.mxu0 %v5563_v30  ;;  %1693 = vmatprep.subr.bf16.mxu0 %v5231_v20 }
  0xe6   :  { %vm5722_vm4 = vcmp.le.s32.totalorder %v1948_v18, %v1946_v19  ;;  %v5257_v18 = vld [vmem:[#allocation5 + $0x1d0] ss:$36 sps:$4 sm:$0xff]  }
  0xe7   :  { %1800 = vmatpush1.bf16.msra.mxu1 %v5160_v62 }
  0xe8   :  { %1801 = vmatprep.subr.bf16.mxu1 %v5168_v63  ;;  %1694 = vmatpush1.bf16.msra.mxu0 %v5229_v21 }
  0xe9   :  { %1695 = vmatprep.subr.bf16.mxu0 %v5234_v22 }
  0xeb   :  { %1802 = vmatpush1.bf16.msra.mxu1 %v5166_v0 }
  0xec   :  { %1803 = vmatprep.subr.bf16.mxu1 %v5174_v1  ;;  %1696 = vmatpush1.bf16.msra.mxu0 %v5232_v24 }
  0xed   :  { %1697 = vmatprep.subr.bf16.mxu0 %v5237_v25 }
  0xef   :  { %1804 = vmatpush1.bf16.msra.mxu1 %v5172_v2 }
  0xf0   :  { %1805 = vmatprep.subr.bf16.mxu1 %v5180_v3  ;;  %1698 = vmatpush1.bf16.msra.mxu0 %v5235_v26 }
  0xf1   :  { %1699 = vmatprep.subr.bf16.mxu0 %v5240_v27 }
  0xf3   :  { %1806 = vmatpush1.bf16.msra.mxu1 %v5178_v6 }
  0xf4   :  { %1807 = vmatprep.subr.bf16.mxu1 %v5186_v7  ;;  %1700 = vmatpush1.bf16.msra.mxu0 %v5238_v28 }
  0xf5   :  { %1701 = vmatprep.subr.bf16.mxu0 %v5243_v29 }
  0xf7   :  { %1808 = vmatpush1.bf16.msra.mxu1 %v5184_v11 }
  0xf8   :  { %4700 = vmatprep.subr.bf16.mxu1 %v5564_v14  ;;  %1702 = vmatpush1.bf16.msra.mxu0 %v5241_v31 }
  0xfa   :  { %1826 = vmatmul.mubr.bf16.vlgmr.msra.gmra.mrb[8].mxu1 %v5650_v49 }
  0xfb   :  { %1835 = vmatprep.mubr.bf16.mxu1 %v5563_v30  ;;  %1720 = vmatmul.mubr.bf16.vlgmr.msra.gmra.mrb[8].mxu0 %v5650_v49 }
  0xfc   :  { %1729 = vmatprep.mubr.bf16.mxu0 %v5563_v30 }
 0x102   :  { %1836 = vmatmul.mubr.bf16.gmra.mrb[12].mxu1 %v5656_v61 }
 0x103   :  { %4702 = vmatprep.mubr.msk.bf16.mxu1 %vm5565_vm0, %v5564_v14  ;;  %1730 = vmatmul.mubr.bf16.gmra.mrb[12].mxu0 %v5656_v61 }
 0x104   :  { %1878 = vmatprep.mubr.bf16.mxu0 %v5632_v50 }
 0x16c   :  { %v1509_v32 = vpop.f32.mrb[0].mxu0  ;;  %v1615_v33 = vpop.f32.mrb[0].mxu1 }
 0x16d   :  { %v1511_v34 = vpop.f32.mrb[1].mxu0  ;;  %v1617_v35 = vpop.f32.mrb[1].mxu1 }
 0x16e   :  { %v1513_v36 = vpop.f32.mrb[2].mxu0  ;;  %v1619_v37 = vpop.f32.mrb[2].mxu1 }
 0x16f   :  { %v5680_v38 = vpack.c.bf16 %v1513_v36, %v1509_v32  ;;  %v5682_v39 = vpack.c.bf16 %v1619_v37, %v1615_v33  ;;  %v1515_v40 = vpop.f32.mrb[3].mxu0  ;;  %v1621_v41 = vpop.f32.mrb[3].mxu1 }
 0x170   :  { %v5684_v42 = vpack.c.bf16 %v1515_v40, %v1511_v34  ;;  %v1952_v43 = vpack.c.bf16 %v1621_v41, %v1617_v35 }
 0x172   :  { %v1959_v44 = vsel %vm1954_vm1, %v1952_v43, 0 }
 0x173   :  { %4701 = vmatpush3.bf16.xpose.msra.mxu1 %v1959_v44 }
 0x174   :  { %v1519_v50 = vpop.f32.mrb[4].mxu0  ;;  %v1625_v45 = vpop.f32.mrb[4].mxu1  ;;  %4706 = vmatprep.subr.bf16.mxu1 %v5564_v14 }
 0x175   :  { %v1521_v46 = vpop.f32.mrb[5].mxu0  ;;  %v1627_v47 = vpop.f32.mrb[5].mxu1 }
 0x176   :  { %v1523_v48 = vpop.f32.mrb[6].mxu0  ;;  %v1629_v51 = vpop.f32.mrb[6].mxu1 }
 0x177   :  { %v5688_v52 = vpack.c.bf16 %v1523_v48, %v1519_v50  ;;  %v5690_v53 = vpack.c.bf16 %v1629_v51, %v1625_v45  ;;  %v1525_v54 = vpop.f32.mrb[7].mxu0  ;;  %v1631_v55 = vpop.f32.mrb[7].mxu1 }
 0x178   :  { %v5692_v56 = vpack.c.bf16 %v1525_v54, %v1521_v46  ;;  %v5694_v57 = vpack.c.bf16 %v1631_v55, %v1627_v47 }
 0x17a   :  { %4703 = vmatmul.mubr.msk.bf16.vlgmr.msra.gmra.mrb[16].mxu1 %vm1954_vm1, %v5680_v38 }
 0x17b   :  { %4708 = vmatprep.mubr.msk.bf16.mxu1 %vm5565_vm0, %v5564_v14 }
 0x1cd   :  { %v1827_v58 = vpop.f32.mrb[8].mxu1 }
 0x1ce   :  { %v1829_v59 = vpop.f32.mrb[9].mxu1  ;;  %v1721_v7 = vpop.f32.mrb[8].mxu0 }
 0x1cf   :  { %v1831_v60 = vpop.f32.mrb[10].mxu1  ;;  %v1723_v8 = vpop.f32.mrb[9].mxu0 }
 0x1d0   :  { %v5700_v62 = vpack.c.bf16 %v1831_v60, %v1827_v58  ;;  %v1833_v63 = vpop.f32.mrb[11].mxu1  ;;  %v1725_v10 = vpop.f32.mrb[10].mxu0  ;;  %v5244_v58 = vld [vmem:[#allocation5 + $0x260] ss:$36 sps:$4 sm:$0xff]   ;;  %v5247_v60 = vld [vmem:[#allocation5 + $0x68] ss:$36 sps:$4 sm:$0xff]  }
 0x1d1   :  { %v5702_v0 = vpack.c.bf16 %v1833_v63, %v1829_v59  ;;  %v5710_v11 = vpack.c.bf16 %v1725_v10, %v1721_v7  ;;  %v1727_v12 = vpop.f32.mrb[11].mxu0  ;;  %v5246_v59 = vld [vmem:[#allocation5 + $0x2a8] ss:$36 sps:$4 sm:$0xff]   ;;  %4556 = vmatprep.subr.bf16.mxu0 %v5244_v58  ;;  %v5248_v63 = vld [vmem:[#allocation5 + $0x2f0] ss:$36 sps:$4 sm:$0xff]  }
 0x1d2   :  { %4707 = vmatpush3.bf16.msra.mxu1 %v5700_v62  ;;  %v5712_v13 = vpack.c.bf16 %v1727_v12, %v1723_v8  ;;  %v5253_v7 = vld [vmem:[#allocation5 + $0x140] ss:$36 sps:$4 sm:$0xff]   ;;  %v5254_v8 = vld [vmem:[#allocation5 + $0x3c8] ss:$36 sps:$4 sm:$0xff]  }
 0x1d3   :  { %4712 = vmatprep.subr.bf16.mxu1 %v5564_v14  ;;  %v5255_v10 = vld [vmem:[#allocation5 + $0x188] ss:$36 sps:$4 sm:$0xff]  }
 0x1d5   :  { %v1837_v1 = vpop.f32.mrb[12].mxu1 }
 0x1d6   :  { %v1839_v2 = vpop.f32.mrb[13].mxu1  ;;  %v1731_v34 = vpop.f32.mrb[12].mxu0 }
 0x1d7   :  { %v1841_v3 = vpop.f32.mrb[14].mxu1  ;;  %v1733_v35 = vpop.f32.mrb[13].mxu0 }
 0x1d8   :  { %v5706_v4 = vpack.c.bf16 %v1841_v3, %v1837_v1  ;;  %v1843_v5 = vpop.f32.mrb[15].mxu1  ;;  %v1735_v36 = vpop.f32.mrb[14].mxu0  ;;  %v5249_v1 = vld [vmem:[#allocation5 + $0xb0] ss:$36 sps:$4 sm:$0xff]   ;;  %v5251_v3 = vld [vmem:[#allocation5 + $0xf8] ss:$36 sps:$4 sm:$0xff]  }
 0x1d9   :  { %v5708_v6 = vpack.c.bf16 %v1843_v5, %v1839_v2  ;;  %v5737_v37 = vpack.c.bf16 %v1735_v36, %v1731_v34  ;;  %v1737_v40 = vpop.f32.mrb[15].mxu0  ;;  %v5250_v2 = vld [vmem:[#allocation5 + $0x338] ss:$36 sps:$4 sm:$0xff]   ;;  %v5252_v5 = vld [vmem:[#allocation5 + $0x380] ss:$36 sps:$4 sm:$0xff]  }
 0x1da   :  { %v5739_v41 = vpack.c.bf16 %v1737_v40, %v1733_v35  ;;  %v5263_v36 = vld [vmem:[#allocation5 + $0x578] ss:$36 sps:$4 sm:$0xff]   ;;  %v2209_v40 = vsel %vm1954_vm1, %v5710_v11, 0 }
 0x24d   :  { %v1995_v20 = vpop.f32.mrb[16].mxu1 }
 0x24e   :  { %v2002_v22 = vmul.f32 0.05103104, %v1995_v20  ;;  %v4704_v24 = vpop.f32.mrb[17].mxu1  ;;  %v5258_v20 = vld [vmem:[#allocation5 + $0x458] ss:$36 sps:$4 sm:$0xff]  }
 0x24f   :  { %v1998_v25 = vpop.f32.mrb[18].mxu1  ;;  %v5260_v24 = vld [vmem:[#allocation5 + $0x4a0] ss:$36 sps:$4 sm:$0xff]  }
 0x250   :  { %v2003_v27 = vmul.f32 0.05103104, %v1998_v25  ;;  %v4705_v28 = vpop.f32.mrb[19].mxu1  ;;  %v2004_v29 = vsel %vm5718_vm2, %v2002_v22, -1e+30 }
 0x251   :  { %v2007_v31 = vsel %vm2006_vm3, %v2004_v29, -inf  ;;  %v5259_v22 = vld [vmem:[#allocation5 + $0x218] ss:$36 sps:$4 sm:$0xff]   ;;  %v5261_v25 = vld [vmem:[#allocation5 + $0x4e8] ss:$36 sps:$4 sm:$0xff]  }
 0x252   :  { %2008 = vmax.xlane.f32.xlu0 %v2007_v31  ;;  %v2005_v32 = vsel %vm5722_vm4, %v2003_v27, -1e+30 }
 0x253   :  { %v2010_v33 = vsel %vm2006_vm3, %v2005_v32, -inf }
 0x256   :  { %2011 = vmax.xlane.f32.xlu0 %v2010_v33 }
 0x26c   :  { %2078 = vrot.lane.b32.xlu0 %v1952_v43, %s5566_s2 }
 0x270   :  { %2576 = vrot.lane.b32.xlu0 %v5712_v13, %s5566_s2 }
 0x274   :  { %2855 = vrot.lane.b32.xlu0 %v5694_v57, %s5566_s2 }
 0x278   :  { %3104 = vrot.lane.b32.xlu0 %v5737_v37, %s5566_s2 }
 0x27c   :  { %3353 = vrot.lane.b32.xlu0 %v5739_v41, %s5566_s2 }
 0x2df   :  { %v2009_v43 = vpop.xlane.xlu0 %2008 }
 0x2e0   :  { %v2013_v44 = vsub.f32 %v2004_v29, %v2009_v43  ;;  %v5265_v43 = vld [vmem:[#allocation5 + $0x608] ss:$36 sps:$4 sm:$0xff]  }
 0x2e2   :  { %v2015_v50 = vmul.f32 1.442695, %v2013_v44 }
 0x2e3   :  { %v2012_v45 = vpop.xlane.xlu0 %2011 }
 0x2e4   :  { %5364 = vpow2.f32 %v2015_v50  ;;  %v2014_v46 = vsub.f32 %v2005_v32, %v2012_v45  ;;  %v5262_v32 = vld [vmem:[#allocation5 + $0x530] ss:$36 sps:$4 sm:$0xff]   ;;  %v2458_v45 = vsel %vm1954_vm1, %v5712_v13, 0 }
 0x2e6   :  { %v2017_v47 = vmul.f32 1.442695, %v2014_v46 }
 0x2e7   :  { %v2079_v33 = vpop.permute.xlu0 %2078 }
 0x2e8   :  { %5366 = vpow2.f32 %v2017_v47  ;;  %v2084_v35 = vsel %vm1954_vm1, %v2079_v33, 0  ;;  %v2737_v47 = vsel %vm1954_vm1, %v5694_v57, 0 }
 0x2ee   :  { %v5365_v48 = vpop.eup %5364 }
 0x2ef   :  { %v2019_v51 = vsel %vm2006_vm3, %v5365_v48, 0.0 }
 0x2f0   :  { %2020 = vadd.xlane.f32.xlu1 %v2019_v51 }
 0x2f2   :  { %v5367_v54 = vpop.eup %5366 }
 0x2f3   :  { %v2022_v55 = vsel %vm2006_vm3, %v5367_v54, 0.0 }
 0x2f4   :  { %2023 = vadd.xlane.f32.xlu1 %v2022_v55 }
 0x305   :  { %2075 = vrot.lane.b32.xlu1 %v5680_v38, %s5566_s2  ;;  %v5245_v38 = vld [vmem:[#allocation5 + $0x20] ss:$36 sps:$4 sm:$0xff]  }
 0x306   :  { %4557 = vmatpush3.bf16.msra.mxu0 %v5245_v38 }
 0x307   :  { %4558 = vmatprep.subr.bf16.mxu0 %v5246_v59 }
 0x309   :  { %2327 = vrot.lane.b32.xlu1 %v5710_v11, %s5566_s2  ;;  %v5267_v11 = vld [vmem:[#allocation5 + $0x698] ss:$36 sps:$4 sm:$0xff]  }
 0x30a   :  { %4559 = vmatpush3.bf16.msra.mxu0 %v5247_v60 }
 0x30b   :  { %4560 = vmatprep.subr.bf16.mxu0 %v5248_v63 }
 0x30d   :  { %2324 = vrot.lane.b32.xlu1 %v5684_v42, %s5566_s2 }
 0x30e   :  { %4561 = vmatpush3.bf16.msra.mxu0 %v5249_v1 }
 0x30f   :  { %4562 = vmatprep.subr.bf16.mxu0 %v5250_v2 }
 0x311   :  { %2573 = vrot.lane.b32.xlu1 %v5682_v39, %s5566_s2 }
 0x312   :  { %4563 = vmatpush3.bf16.msra.mxu0 %v5251_v3 }
 0x313   :  { %4564 = vmatprep.subr.bf16.mxu0 %v5252_v5 }
 0x315   :  { %2852 = vrot.lane.b32.xlu1 %v5688_v52, %s5566_s2 }
 0x316   :  { %4565 = vmatpush3.bf16.msra.mxu0 %v5253_v7 }
 0x317   :  { %4566 = vmatprep.subr.bf16.mxu0 %v5254_v8 }
 0x319   :  { %3101 = vrot.lane.b32.xlu1 %v5692_v56, %s5566_s2 }
 0x31a   :  { %4567 = vmatpush3.bf16.msra.mxu0 %v5255_v10 }
 0x31b   :  { %4568 = vmatprep.subr.bf16.mxu0 %v5256_v16 }
 0x31d   :  { %3350 = vrot.lane.b32.xlu1 %v5690_v53, %s5566_s2 }
 0x31e   :  { %4569 = vmatpush3.bf16.msra.mxu0 %v5257_v18 }
 0x31f   :  { %4570 = vmatprep.subr.bf16.mxu0 %v5258_v20 }
 0x322   :  { %4571 = vmatpush3.bf16.msra.mxu0 %v5259_v22 }
 0x323   :  { %4680 = vmatprep.subr.bf16.mxu0 %v5260_v24 }
 0x325   :  { %1879 = vmatmul.mubr.bf16.vlgmr.msra.gmra.mrb[16].mxu0 %v5636_v9  ;;  %v5264_v9 = vld [vmem:[#allocation5 + $0x5c0] ss:$36 sps:$4 sm:$0xff]  }
 0x326   :  { %4681 = vmatpush3.bf16.msra.mxu0 %v5260_v24  ;;  %1886 = vmatprep.mubr.bf16.mxu0 %v5638_v15 }
 0x327   :  { %4682 = vmatprep.subr.bf16.mxu0 %v5261_v25 }
 0x32a   :  { %4683 = vmatpush3.bf16.msra.mxu0 %v5261_v25 }
 0x32b   :  { %4684 = vmatprep.subr.bf16.mxu0 %v5262_v32 }
 0x32d   :  { %1887 = vmatmul.mubr.bf16.gmra.mrb[20].mxu0 %v5644_v23  ;;  %v5266_v23 = vld [vmem:[#allocation5 + $0x650] ss:$36 sps:$4 sm:$0xff]  }
 0x32e   :  { %4685 = vmatpush3.bf16.msra.mxu0 %v5262_v32  ;;  %4696 = vmatprep.mubr.bf16.mxu0 %v5650_v49 }
 0x32f   :  { %4686 = vmatprep.subr.bf16.mxu0 %v5263_v36 }
 0x332   :  { %4687 = vmatpush3.bf16.msra.mxu0 %v5263_v36 }
 0x333   :  { %4688 = vmatprep.subr.bf16.mxu0 %v5264_v9 }
 0x336   :  { %4689 = vmatpush3.bf16.msra.mxu0 %v5264_v9 }
 0x337   :  { %4690 = vmatprep.subr.bf16.mxu0 %v5265_v43 }
 0x33a   :  { %4691 = vmatpush3.bf16.msra.mxu0 %v5265_v43 }
 0x33b   :  { %4692 = vmatprep.subr.bf16.mxu0 %v5266_v23 }
 0x33e   :  { %4693 = vmatpush3.bf16.msra.mxu0 %v5266_v23 }
 0x33f   :  { %4694 = vmatprep.subr.bf16.mxu0 %v5267_v11 }
 0x342   :  { %4695 = vmatpush3.bf16.msra.mxu0 %v5267_v11 }
 0x343   :  { %4718 = vmatprep.subr.bf16.mxu0 %v5564_v14 }
 0x345   :  { %4697 = vmatmul.mubr.bf16.vlgmr.msra.gmra.mrb[24].mxu0 %v5656_v61 }
 0x346   :  { %4720 = vmatprep.mubr.msk.bf16.mxu0 %vm5565_vm0, %v5564_v14 }
 0x37d   :  { %v2021_v12 = vpop.xlane.xlu1 %2020 }
 0x37e   :  { %5368 = vrcp.f32 %v2021_v12 }
 0x381   :  { %v2024_v19 = vpop.xlane.xlu1 %2023 }
 0x382   :  { %5370 = vrcp.f32 %v2024_v19 }
 0x385   :  { %v2076_v15 = vpop.permute.xlu1 %2075 }
 0x388   :  { %v5369_v27 = vpop.eup %5368 }
 0x389   :  { %v2027_v29 = vmul.f32 %v5369_v27, %v5365_v48  ;;  %v2328_v49 = vpop.permute.xlu1 %2327  ;;  %v2986_v48 = vsel %vm1954_vm1, %v5737_v37, 0 }
 0x38a   :  { %v2333_v44 = vsel %vm1954_vm1, %v2328_v49, 0 }
 0x38c   :  { %v5371_v28 = vpop.eup %5370 }
 0x38d   :  { %v2028_v31 = vmul.f32 %v5371_v28, %v5367_v54  ;;  %v2325_v50 = vpop.permute.xlu1 %2324  ;;  %v3235_v54 = vsel %vm1954_vm1, %v5739_v41, 0 }
 0x38f   :  { %v2029_v34 = vpack.c.bf16 %v2028_v31, %v2027_v29 }
 0x391   :  { %4709 = vmatmul.mubr.msk.bf16.vlgmr.msra.gmra.mrb[20].mxu1 %vm2006_vm3, %v2029_v34  ;;  %v2574_v13 = vpop.permute.xlu1 %2573 }
 0x392   :  { %4713 = vmatpush3.bf16.xpose.msra.mxu1 %v2084_v35  ;;  %4714 = vmatprep.mubr.msk.bf16.mxu1 %vm5565_vm0, %v5564_v14 }
 0x393   :  { %4724 = vmatprep.subr.bf16.mxu1 %v5564_v14 }
 0x395   :  { %v2853_v57 = vpop.permute.xlu1 %2852 }
 0x399   :  { %4715 = vmatmul.mubr.msk.bf16.vlgmr.msra.gmra.mrb[24].mxu1 %vm1954_vm1, %v2076_v15  ;;  %v3102_v37 = vpop.permute.xlu1 %3101 }
 0x39a   :  { %4725 = vmatpush3.bf16.xpose.msra.mxu1 %v2209_v40  ;;  %4726 = vmatprep.mubr.msk.bf16.mxu1 %vm5565_vm0, %v5564_v14 }
 0x39b   :  { %4736 = vmatprep.subr.bf16.mxu1 %v5564_v14 }
 0x39d   :  { %v3351_v58 = vpop.permute.xlu1 %3350 }
 0x3a1   :  { %4727 = vmatmul.mubr.msk.bf16.vlgmr.msra.gmra.mrb[28].mxu1 %vm1954_vm1, %v5684_v42  ;;  %v2577_v42 = vpop.permute.xlu0 %2576 }
 0x3a2   :  { %4737 = vmatpush3.bf16.xpose.msra.mxu1 %v2333_v44  ;;  %4738 = vmatprep.mubr.msk.bf16.mxu1 %vm5565_vm0, %v5564_v14  ;;  %v2582_v46 = vsel %vm1954_vm1, %v2577_v42, 0 }
 0x3a3   :  { %4748 = vmatprep.subr.bf16.mxu1 %v5564_v14 }
 0x3a5   :  { %v2856_v61 = vpop.permute.xlu0 %2855 }
 0x3a9   :  { %4739 = vmatmul.mubr.msk.bf16.vlgmr.msra.gmra.mrb[32].mxu1 %vm1954_vm1, %v2325_v50  ;;  %v3105_v51 = vpop.permute.xlu0 %3104 }
 0x3aa   :  { %4749 = vmatpush3.bf16.xpose.msra.mxu1 %v2458_v45  ;;  %4750 = vmatprep.mubr.msk.bf16.mxu1 %vm5565_vm0, %v5564_v14 }
 0x3ab   :  { %4760 = vmatprep.subr.bf16.mxu1 %v5564_v14 }
 0x3ad   :  { %v3354_v55 = vpop.permute.xlu0 %3353 }
 0x3b1   :  { %4751 = vmatmul.mubr.msk.bf16.vlgmr.msra.gmra.mrb[36].mxu1 %vm1954_vm1, %v5682_v39  ;;  %v2861_v39 = vsel %vm1954_vm1, %v2856_v61, 0 }
 0x3b2   :  { %4761 = vmatpush3.bf16.xpose.msra.mxu1 %v2582_v46  ;;  %4762 = vmatprep.mubr.msk.bf16.mxu1 %vm5565_vm0, %v5564_v14 }
 0x3b3   :  { %4772 = vmatprep.subr.bf16.mxu1 %v5564_v14 }
 0x3b9   :  { %4763 = vmatmul.mubr.msk.bf16.vlgmr.msra.gmra.mrb[40].mxu1 %vm1954_vm1, %v2574_v13 }
 0x3ba   :  { %4773 = vmatpush3.bf16.xpose.msra.mxu1 %v2737_v47  ;;  %4774 = vmatprep.mubr.msk.bf16.mxu1 %vm5565_vm0, %v5564_v14 }
 0x3bb   :  { %4784 = vmatprep.subr.bf16.mxu1 %v5564_v14 }
 0x3c1   :  { %4775 = vmatmul.mubr.msk.bf16.vlgmr.msra.gmra.mrb[44].mxu1 %vm1954_vm1, %v5688_v52  ;;  %v3110_v52 = vsel %vm1954_vm1, %v3105_v51, 0 }
 0x3c2   :  { %4785 = vmatpush3.bf16.xpose.msra.mxu1 %v2861_v39  ;;  %4786 = vmatprep.mubr.msk.bf16.mxu1 %vm5565_vm0, %v5564_v14 }
 0x3c3   :  { %4796 = vmatprep.subr.bf16.mxu1 %v5564_v14 }
 0x3c9   :  { %4787 = vmatmul.mubr.msk.bf16.vlgmr.msra.gmra.mrb[48].mxu1 %vm1954_vm1, %v2853_v57 }
 0x3ca   :  { %4797 = vmatpush3.bf16.xpose.msra.mxu1 %v2986_v48  ;;  %4798 = vmatprep.mubr.msk.bf16.mxu1 %vm5565_vm0, %v5564_v14 }
 0x3cb   :  { %4808 = vmatprep.subr.bf16.mxu1 %v5564_v14 }
 0x3d1   :  { %4799 = vmatmul.mubr.msk.bf16.vlgmr.msra.gmra.mrb[52].mxu1 %vm1954_vm1, %v5692_v56  ;;  %v3359_v56 = vsel %vm1954_vm1, %v3354_v55, 0 }
 0x3d2   :  { %4809 = vmatpush3.bf16.xpose.msra.mxu1 %v3110_v52  ;;  %4810 = vmatprep.mubr.msk.bf16.mxu1 %vm5565_vm0, %v5564_v14 }
 0x3d3   :  { %4820 = vmatprep.subr.bf16.mxu1 %v5564_v14 }
 0x3d9   :  { %4811 = vmatmul.mubr.msk.bf16.vlgmr.msra.gmra.mrb[56].mxu1 %vm1954_vm1, %v3102_v37 }
 0x3da   :  { %4821 = vmatpush3.bf16.xpose.msra.mxu1 %v3235_v54  ;;  %4822 = vmatprep.mubr.msk.bf16.mxu1 %vm5565_vm0, %v5564_v14 }
 0x3db   :  { %4832 = vmatprep.subr.bf16.mxu1 %v5564_v14 }
 0x3e1   :  { %4823 = vmatmul.mubr.msk.bf16.vlgmr.msra.gmra.mrb[60].mxu1 %vm1954_vm1, %v5690_v53 }
 0x3e2   :  { %4833 = vmatpush3.bf16.xpose.msra.mxu1 %v3359_v56  ;;  %4834 = vmatprep.mubr.msk.bf16.mxu1 %vm5565_vm0, %v5564_v14 }
 0x3e9   :  { %4835 = vmatmul.mubr.msk.bf16.vlgmr.msra.gmra.mrb[64].mxu1 %vm1954_vm1, %v3351_v58 }
 0x3f8   :  { %v4572_v32 = vpop.f32.mrb[16].mxu0 }
 0x3f9   :  { %v4573_v33 = vpop.f32.mrb[17].mxu0 }
 0x3fa   :  { %v4575_v35 = vpop.f32.mrb[18].mxu0  ;;  %v4574_v9 = vadd.f32 %v4573_v33, %v4572_v32 }
 0x3fb   :  { %v4576_v15 = vpop.f32.mrb[19].mxu0 }
 0x3fc   :  { %v4577_v43 = vadd.f32 %v4576_v15, %v4575_v35 }
 0x400   :  { %v4578_v23 = vpop.f32.mrb[20].mxu0 }
 0x401   :  { %v4579_v11 = vpop.f32.mrb[21].mxu0 }
 0x402   :  { %v4581_v50 = vpop.f32.mrb[22].mxu0  ;;  %v4580_v55 = vadd.f32 %v4579_v11, %v4578_v23 }
 0x403   :  { %v4582_v42 = vpop.f32.mrb[23].mxu0 }
 0x418   :  { %v4698_v13 = vpop.f32.mrb[24].mxu0 }
 0x419   :  { %v1929_v47 = vpop.f32.mrb[25].mxu0 }
 0x41a   :  { %v4699_v39 = vpop.f32.mrb[26].mxu0  ;;  %v1930_v52 = vadd.f32 %v4574_v9, %v1929_v47 }
 0x41b   :  { %v1932_v48 = vpop.f32.mrb[27].mxu0 }
 0x464   :  { %v5834_v41 = vpop.f32.mrb[20].mxu1 }
 0x465   :  { %v4710_v38 = vpop.f32.mrb[21].mxu1 }
 0x466   :  { %v5836_v59 = vpop.f32.mrb[22].mxu1 }
 0x467   :  { %v4711_v60 = vpop.f32.mrb[23].mxu1 }
 0x46c   :  { %v2120_v63 = vpop.f32.mrb[24].mxu1 }
 0x46d   :  { %v2127_v1 = vmul.f32 0.05103104, %v2120_v63  ;;  %v4716_v2 = vpop.f32.mrb[25].mxu1 }
 0x46e   :  { %v2123_v3 = vpop.f32.mrb[26].mxu1  ;;  %v1938_v2 = vadd.f32 %v4698_v13, %v4580_v55 }
 0x46f   :  { %v2128_v5 = vmul.f32 0.05103104, %v2123_v3  ;;  %v4717_v7 = vpop.f32.mrb[27].mxu1  ;;  %v5840_v53 = vsel %vm5718_vm2, %v2127_v1, -1e+30  ;;  %v4583_v1 = vadd.f32 %v4582_v42, %v4581_v50 }
 0x470   :  { %v2131_v8 = vsel %vm2006_vm3, %v5840_v53, -inf }
 0x471   :  { %2132 = vmax.xlane.f32.xlu0 %v2131_v8  ;;  %v5846_v10 = vsel %vm5722_vm4, %v2128_v5, -1e+30  ;;  %v1941_v8 = vadd.f32 %v4699_v39, %v4583_v1 }
 0x472   :  { %v2134_v12 = vsel %vm2006_vm3, %v5846_v10, -inf }
 0x473   :  { %2135 = vmax.xlane.f32.xlu1 %v2134_v12 }
 0x474   :  { %v2245_v16 = vpop.f32.mrb[28].mxu1 }
 0x475   :  { %v4728_v18 = vpop.f32.mrb[29].mxu1 }
 0x476   :  { %v5850_v19 = vpop.f32.mrb[30].mxu1  ;;  %v5882_v18 = vpack.c.bf16 %v1941_v8, %v1938_v2 }
 0x477   :  { %v4729_v20 = vpop.f32.mrb[31].mxu1  ;;  %v2253_v35 = vmul.f32 0.05103104, %v5850_v19 }
 0x479   :  { %v5902_v19 = vsel %vm5722_vm4, %v2253_v35, -1e+30 }
 0x47a   :  { %v2259_v11 = vsel %vm2006_vm3, %v5902_v19, -inf }
 0x47c   :  { %v5852_v22 = vpop.f32.mrb[32].mxu1 }
 0x47d   :  { %v4740_v24 = vpop.f32.mrb[33].mxu1 }
 0x47e   :  { %v2372_v25 = vpop.f32.mrb[34].mxu1 }
 0x47f   :  { %v2377_v27 = vmul.f32 0.05103104, %v2372_v25  ;;  %v4741_v28 = vpop.f32.mrb[35].mxu1 }
 0x481   :  { %v5856_v29 = vsel %vm5722_vm4, %v2377_v27, -1e+30  ;;  %v2252_v27 = vmul.f32 0.05103104, %v2245_v16 }
 0x482   :  { %v2383_v31 = vsel %vm2006_vm3, %v5856_v29, -inf }
 0x483   :  { %2384 = vmax.xlane.f32.xlu1 %v2383_v31  ;;  %v5895_v9 = vsel %vm5718_vm2, %v2252_v27, -1e+30 }
 0x484   :  { %v5860_v34 = vpop.f32.mrb[36].mxu1  ;;  %v2256_v16 = vsel %vm2006_vm3, %v5895_v9, -inf }
 0x485   :  { %v4752_v36 = vpop.f32.mrb[37].mxu1  ;;  %v2501_v42 = vmul.f32 0.05103104, %v5860_v34 }
 0x486   :  { %v2497_v40 = vpop.f32.mrb[38].mxu1 }
 0x487   :  { %v2502_v49 = vmul.f32 0.05103104, %v2497_v40  ;;  %v4753_v44 = vpop.f32.mrb[39].mxu1  ;;  %2155 = vrot.lane.b32.xlu0 %v5700_v62, %s5566_s2  ;;  %v1933_v62 = vadd.f32 %v4577_v43, %v1932_v48  ;;  %v2376_v43 = vmul.f32 0.05103104, %v5852_v22 }
 0x488   :  { %v5921_v34 = vsel %vm5718_vm2, %v2501_v42, -1e+30 }
 0x489   :  { %v5866_v45 = vsel %vm5722_vm4, %v2502_v49, -1e+30  ;;  %v5870_v56 = vpack.c.bf16 %v1933_v62, %v1930_v52  ;;  %v2505_v62 = vsel %vm2006_vm3, %v5921_v34, -inf }
 0x48a   :  { %v2508_v46 = vsel %vm2006_vm3, %v5866_v45, -inf }
 0x48b   :  { %2509 = vmax.xlane.f32.xlu1 %v2508_v46  ;;  %v5915_v46 = vsel %vm5718_vm2, %v2376_v43, -1e+30 }
 0x48c   :  { %v2618_v61 = vpop.f32.mrb[40].mxu1  ;;  %v2380_v39 = vsel %vm2006_vm3, %v5915_v46, -inf }
 0x48d   :  { %v4764_v57 = vpop.f32.mrb[41].mxu1 }
 0x48e   :  { %v2621_v51 = vpop.f32.mrb[42].mxu1  ;;  %v2625_v57 = vmul.f32 0.05103104, %v2618_v61 }
 0x48f   :  { %v2626_v37 = vmul.f32 0.05103104, %v2621_v51  ;;  %v4765_v54 = vpop.f32.mrb[43].mxu1 }
 0x490   :  { %v5933_v55 = vsel %vm5718_vm2, %v2625_v57, -1e+30 }
 0x491   :  { %v5874_v58 = vsel %vm5722_vm4, %v2626_v37, -1e+30  ;;  %v2629_v1 = vsel %vm2006_vm3, %v5933_v55, -inf }
 0x492   :  { %v2632_v38 = vsel %vm2006_vm3, %v5874_v58, -inf }
 0x493   :  { %2633 = vmax.xlane.f32.xlu1 %v2632_v38 }
 0x494   :  { %v2773_v60 = vpop.f32.mrb[44].mxu1 }
 0x495   :  { %v4776_v63 = vpop.f32.mrb[45].mxu1  ;;  %v2780_v54 = vmul.f32 0.05103104, %v2773_v60 }
 0x496   :  { %v2776_v3 = vpop.f32.mrb[46].mxu1 }
 0x497   :  { %v2781_v5 = vmul.f32 0.05103104, %v2776_v3  ;;  %v4777_v7 = vpop.f32.mrb[47].mxu1  ;;  %v5939_v60 = vsel %vm5718_vm2, %v2780_v54, -1e+30 }
 0x498   :  { %v2784_v8 = vsel %vm2006_vm3, %v5939_v60, -inf }
 0x499   :  { %v5880_v12 = vsel %vm5722_vm4, %v2781_v5, -1e+30 }
 0x49a   :  { %v2787_v20 = vsel %vm2006_vm3, %v5880_v12, -inf }
 0x49b   :  { %2788 = vmax.xlane.f32.xlu1 %v2787_v20 }
 0x49c   :  { %v2897_v24 = vpop.f32.mrb[48].mxu1 }
 0x49d   :  { %v4788_v25 = vpop.f32.mrb[49].mxu1  ;;  %v2904_v2 = vmul.f32 0.05103104, %v2897_v24 }
 0x49e   :  { %v2900_v28 = vpop.f32.mrb[50].mxu1 }
 0x49f   :  { %v2905_v31 = vmul.f32 0.05103104, %v2900_v28  ;;  %v4789_v32 = vpop.f32.mrb[51].mxu1  ;;  %v5951_v27 = vsel %vm5718_vm2, %v2904_v2, -1e+30 }
 0x4a0   :  { %v2908_v32 = vsel %vm2006_vm3, %v5951_v27, -inf }
 0x4a1   :  { %v5888_v33 = vsel %vm5722_vm4, %v2905_v31, -1e+30 }
 0x4a2   :  { %v2911_v36 = vsel %vm2006_vm3, %v5888_v33, -inf }
 0x4a3   :  { %2912 = vmax.xlane.f32.xlu1 %v2911_v36 }
 0x4a4   :  { %v3022_v15 = vpop.f32.mrb[52].mxu1 }
 0x4a5   :  { %v4800_v40 = vpop.f32.mrb[53].mxu1  ;;  %v3029_v25 = vmul.f32 0.05103104, %v3022_v15 }
 0x4a6   :  { %v3025_v23 = vpop.f32.mrb[54].mxu1  ;;  %2257 = vmax.xlane.f32.xlu0 %v2256_v16 }
 0x4a7   :  { %v3030_v49 = vmul.f32 0.05103104, %v3025_v23  ;;  %v4801_v44 = vpop.f32.mrb[55].mxu1  ;;  %v5957_v15 = vsel %vm5718_vm2, %v3029_v25, -1e+30 }
 0x4a8   :  { %v3033_v43 = vsel %vm2006_vm3, %v5957_v15, -inf }
 0x4a9   :  { %v5908_v50 = vsel %vm5722_vm4, %v3030_v49, -1e+30 }
 0x4aa   :  { %2260 = vmax.xlane.f32.xlu0 %v2259_v11  ;;  %v3036_v22 = vsel %vm2006_vm3, %v5908_v50, -inf }
 0x4ab   :  { %3037 = vmax.xlane.f32.xlu1 %v3036_v22 }
 0x4ac   :  { %v3146_v13 = vpop.f32.mrb[56].mxu1 }
 0x4ad   :  { %v4812_v47 = vpop.f32.mrb[57].mxu1  ;;  %v3153_v35 = vmul.f32 0.05103104, %v3146_v13 }
 0x4ae   :  { %v3149_v48 = vpop.f32.mrb[58].mxu1  ;;  %2381 = vmax.xlane.f32.xlu0 %v2380_v39 }
 0x4af   :  { %v3154_v51 = vmul.f32 0.05103104, %v3149_v48  ;;  %v4813_v52 = vpop.f32.mrb[59].mxu1  ;;  %v5969_v11 = vsel %vm5718_vm2, %v3153_v35, -1e+30 }
 0x4b0   :  { %v3157_v42 = vsel %vm2006_vm3, %v5969_v11, -inf }
 0x4b1   :  { %v5927_v37 = vsel %vm5722_vm4, %v3154_v51, -1e+30 }
 0x4b2   :  { %2506 = vmax.xlane.f32.xlu0 %v2505_v62  ;;  %v3160_v61 = vsel %vm2006_vm3, %v5927_v37, -inf }
 0x4b3   :  { %3161 = vmax.xlane.f32.xlu1 %v3160_v61 }
 0x4b4   :  { %v3271_v38 = vpop.f32.mrb[60].mxu1 }
 0x4b5   :  { %v4824_v63 = vpop.f32.mrb[61].mxu1  ;;  %v3278_v49 = vmul.f32 0.05103104, %v3271_v38 }
 0x4b6   :  { %2630 = vmax.xlane.f32.xlu0 %v2629_v1  ;;  %v3274_v3 = vpop.f32.mrb[62].mxu1 }
 0x4b7   :  { %v3279_v5 = vmul.f32 0.05103104, %v3274_v3  ;;  %v4825_v7 = vpop.f32.mrb[63].mxu1  ;;  %v5975_v26 = vsel %vm5718_vm2, %v3278_v49, -1e+30 }
 0x4b8   :  { %v3282_v13 = vsel %vm2006_vm3, %v5975_v26, -inf }
 0x4b9   :  { %v5945_v20 = vsel %vm5722_vm4, %v3279_v5, -1e+30 }
 0x4ba   :  { %2785 = vmax.xlane.f32.xlu0 %v2784_v8  ;;  %v3285_v24 = vsel %vm2006_vm3, %v5945_v20, -inf }
 0x4bb   :  { %3286 = vmax.xlane.f32.xlu1 %v3285_v24 }
 0x4bc   :  { %v3395_v28 = vpop.f32.mrb[64].mxu1 }
 0x4bd   :  { %v4836_v31 = vpop.f32.mrb[65].mxu1  ;;  %v3402_v22 = vmul.f32 0.05103104, %v3395_v28 }
 0x4be   :  { %2909 = vmax.xlane.f32.xlu0 %v2908_v32  ;;  %v3398_v36 = vpop.f32.mrb[66].mxu1 }
 0x4bf   :  { %v3403_v40 = vmul.f32 0.05103104, %v3398_v36  ;;  %v4837_v16 = vpop.f32.mrb[67].mxu1  ;;  %v5981_v47 = vsel %vm5718_vm2, %v3402_v22, -1e+30 }
 0x4c0   :  { %v3406_v39 = vsel %vm2006_vm3, %v5981_v47, -inf }
 0x4c1   :  { %v5963_v23 = vsel %vm5722_vm4, %v3403_v40, -1e+30 }
 0x4c2   :  { %3034 = vmax.xlane.f32.xlu0 %v3033_v43  ;;  %v3409_v44 = vsel %vm2006_vm3, %v5963_v23, -inf }
 0x4c3   :  { %3410 = vmax.xlane.f32.xlu1 %v3409_v44 }
 0x4c6   :  { %3158 = vmax.xlane.f32.xlu0 %v3157_v42 }
 0x4ca   :  { %3283 = vmax.xlane.f32.xlu0 %v3282_v13 }
 0x4ce   :  { %3407 = vmax.xlane.f32.xlu0 %v3406_v39 }
 0x4fe   :  { %v2133_v57 = vpop.xlane.xlu0 %2132 }
 0x4ff   :  { %v2137_v48 = vsub.f32 %v5840_v53, %v2133_v57 }
 0x500   :  { %v2136_v51 = vpop.xlane.xlu1 %2135 }
 0x501   :  { %v2139_v52 = vmul.f32 1.442695, %v2137_v48  ;;  %v2138_v62 = vsub.f32 %v5846_v10, %v2136_v51 }
 0x502   :  { %v2156_v54 = vpop.permute.xlu0 %2155 }
 0x503   :  { %5372 = vpow2.f32 %v2139_v52  ;;  %v2141_v61 = vmul.f32 1.442695, %v2138_v62  ;;  %4719 = vmatpush3.bf16.msra.mxu0 %v2156_v54 }
 0x504   :  { %4730 = vmatprep.subr.bf16.mxu0 %v5564_v14 }
 0x505   :  { %5374 = vpow2.f32 %v2141_v61 }
 0x50d   :  { %v5988_v21 = vpop.eup %5372 }
 0x50e   :  { %v2143_v38 = vsel %vm2006_vm3, %v5988_v21, 0.0 }
 0x50f   :  { %v5992_v63 = vpop.eup %5374  ;;  %2144 = vadd.xlane.f32.xlu0 %v2143_v38 }
 0x510   :  { %v2146_v53 = vsel %vm2006_vm3, %v5992_v63, 0.0  ;;  %v2385_v10 = vpop.xlane.xlu1 %2384 }
 0x511   :  { %2147 = vadd.xlane.f32.xlu1 %v2146_v53  ;;  %v2387_v3 = vsub.f32 %v5856_v29, %v2385_v10 }
 0x513   :  { %v2390_v24 = vmul.f32 1.442695, %v2387_v3 }
 0x518   :  { %v2510_v7 = vpop.xlane.xlu1 %2509 }
 0x519   :  { %v2512_v28 = vsub.f32 %v5866_v45, %v2510_v7 }
 0x51b   :  { %v2515_v36 = vmul.f32 1.442695, %v2512_v28 }
 0x522   :  { %2404 = vrot.lane.b32.xlu1 %v5702_v0, %s5566_s2 }
 0x525   :  { %2653 = vrot.lane.b32.xlu0 %v5870_v56, %s5566_s2 }
 0x533   :  { %v2258_v1 = vpop.xlane.xlu0 %2257 }
 0x534   :  { %v2262_v2 = vsub.f32 %v5895_v9, %v2258_v1  ;;  %v2634_v9 = vpop.xlane.xlu1 %2633 }
 0x536   :  { %v2264_v5 = vmul.f32 1.442695, %v2262_v2 }
 0x537   :  { %v2261_v8 = vpop.xlane.xlu0 %2260 }
 0x538   :  { %5376 = vpow2.f32 %v2264_v5  ;;  %v2263_v25 = vsub.f32 %v5902_v19, %v2261_v8  ;;  %v2636_v19 = vsub.f32 %v5874_v58, %v2634_v9  ;;  %v2789_v45 = vpop.xlane.xlu1 %2788 }
 0x53a   :  { %v2266_v31 = vmul.f32 1.442695, %v2263_v25  ;;  %v2639_v13 = vmul.f32 1.442695, %v2636_v19 }
 0x53b   :  { %v2382_v32 = vpop.xlane.xlu0 %2381 }
 0x53c   :  { %5378 = vpow2.f32 %v2266_v31  ;;  %v2386_v35 = vsub.f32 %v5915_v46, %v2382_v32 }
 0x53d   :  { %5380 = vpow2.f32 %v2390_v24 }
 0x53e   :  { %v2388_v40 = vmul.f32 1.442695, %v2386_v35 }
 0x53f   :  { %v2507_v16 = vpop.xlane.xlu0 %2506 }
 0x540   :  { %5382 = vpow2.f32 %v2388_v40  ;;  %v2511_v29 = vsub.f32 %v5921_v34, %v2507_v16  ;;  %v2913_v34 = vpop.xlane.xlu1 %2912 }
 0x541   :  { %5384 = vpow2.f32 %v2515_v36 }
 0x542   :  { %v6006_v43 = vpop.eup %5376  ;;  %v2513_v49 = vmul.f32 1.442695, %v2511_v29 }
 0x543   :  { %v2631_v44 = vpop.xlane.xlu0 %2630  ;;  %v2268_v42 = vsel %vm2006_vm3, %v6006_v43, 0.0 }
 0x544   :  { %5386 = vpow2.f32 %v2513_v49  ;;  %v2635_v46 = vsub.f32 %v5933_v55, %v2631_v44  ;;  %2269 = vadd.xlane.f32.xlu0 %v2268_v42  ;;  %v2791_v55 = vsub.f32 %v5880_v12, %v2789_v45  ;;  %v3038_v54 = vpop.xlane.xlu1 %3037 }
 0x545   :  { %v3040_v3 = vsub.f32 %v5908_v50, %v3038_v54 }
 0x546   :  { %v6012_v22 = vpop.eup %5378  ;;  %v2637_v39 = vmul.f32 1.442695, %v2635_v46  ;;  %v2794_v12 = vmul.f32 1.442695, %v2791_v55 }
 0x547   :  { %v2786_v57 = vpop.xlane.xlu0 %2785  ;;  %v2271_v48 = vsel %vm2006_vm3, %v6012_v22, 0.0  ;;  %v6016_v58 = vpop.eup %5380  ;;  %v3043_v28 = vmul.f32 1.442695, %v3040_v3 }
 0x548   :  { %5388 = vpow2.f32 %v2637_v39  ;;  %v2790_v51 = vsub.f32 %v5939_v60, %v2786_v57  ;;  %2272 = vadd.xlane.f32.xlu1 %v2271_v48  ;;  %v2395_v38 = vsel %vm2006_vm3, %v6016_v58, 0.0  ;;  %v2915_v60 = vsub.f32 %v5888_v33, %v2913_v34  ;;  %v3162_v31 = vpop.xlane.xlu1 %3161 }
 0x549   :  { %5390 = vpow2.f32 %v2639_v13 }
 0x54a   :  { %v6019_v52 = vpop.eup %5382  ;;  %v2792_v62 = vmul.f32 1.442695, %v2790_v51  ;;  %v2918_v33 = vmul.f32 1.442695, %v2915_v60 }
 0x54b   :  { %v2910_v61 = vpop.xlane.xlu0 %2909  ;;  %v2392_v53 = vsel %vm2006_vm3, %v6019_v52, 0.0  ;;  %v6026_v10 = vpop.eup %5384 }
 0x54c   :  { %v2914_v1 = vsub.f32 %v5951_v27, %v2910_v61  ;;  %2396 = vadd.xlane.f32.xlu1 %v2395_v38  ;;  %2393 = vadd.xlane.f32.xlu0 %v2392_v53  ;;  %5392 = vpow2.f32 %v2792_v62  ;;  %v2520_v8 = vsel %vm2006_vm3, %v6026_v10, 0.0 }
 0x54e   :  { %v6030_v2 = vpop.eup %5386  ;;  %v2916_v5 = vmul.f32 1.442695, %v2914_v1 }
 0x54f   :  { %v3035_v7 = vpop.xlane.xlu0 %3034  ;;  %v2517_v25 = vsel %vm2006_vm3, %v6030_v2, 0.0 }
 0x550   :  { %5394 = vpow2.f32 %v2916_v5  ;;  %v3039_v27 = vsub.f32 %v5957_v15, %v3035_v7  ;;  %2521 = vadd.xlane.f32.xlu1 %v2520_v8  ;;  %2518 = vadd.xlane.f32.xlu0 %v2517_v25  ;;  %v3164_v15 = vsub.f32 %v5927_v37, %v3162_v31 }
 0x551   :  { %5396 = vpow2.f32 %v2794_v12 }
 0x552   :  { %v6038_v24 = vpop.eup %5388  ;;  %v3041_v50 = vmul.f32 1.442695, %v3039_v27  ;;  %v3167_v45 = vmul.f32 1.442695, %v3164_v15 }
 0x553   :  { %v3159_v32 = vpop.xlane.xlu0 %3158  ;;  %v2641_v35 = vsel %vm2006_vm3, %v6038_v24, 0.0  ;;  %v6042_v36 = vpop.eup %5390 }
 0x554   :  { %5398 = vpow2.f32 %v3041_v50  ;;  %v3163_v40 = vsub.f32 %v5969_v11, %v3159_v32  ;;  %2642 = vadd.xlane.f32.xlu1 %v2641_v35  ;;  %v2644_v29 = vsel %vm2006_vm3, %v6042_v36, 0.0  ;;  %v3287_v11 = vpop.xlane.xlu1 %3286 }
 0x555   :  { %5400 = vpow2.f32 %v2918_v33  ;;  %v3289_v39 = vsub.f32 %v5945_v20, %v3287_v11 }
 0x556   :  { %5402 = vpow2.f32 %v3043_v28  ;;  %v3165_v9 = vmul.f32 1.442695, %v3163_v40  ;;  %v6048_v19 = vpop.eup %5392 }
 0x557   :  { %v3284_v16 = vpop.xlane.xlu0 %3283  ;;  %v2796_v42 = vsel %vm2006_vm3, %v6048_v19, 0.0  ;;  %v3292_v62 = vmul.f32 1.442695, %v3289_v39 }
 0x558   :  { %2645 = vadd.xlane.f32.xlu1 %v2644_v29  ;;  %5404 = vpow2.f32 %v3165_v9  ;;  %v3288_v44 = vsub.f32 %v5975_v26, %v3284_v16  ;;  %v3411_v27 = vpop.xlane.xlu1 %3410 }
 0x559   :  { %5406 = vpow2.f32 %v3167_v45  ;;  %v3413_v33 = vsub.f32 %v5963_v23, %v3411_v27 }
 0x55a   :  { %v6050_v49 = vpop.eup %5394  ;;  %v3290_v34 = vmul.f32 1.442695, %v3288_v44 }
 0x55b   :  { %v2920_v37 = vsel %vm2006_vm3, %v6050_v49, 0.0  ;;  %v6057_v46 = vpop.eup %5396  ;;  %v3408_v26 = vpop.xlane.xlu0 %3407  ;;  %v3416_v28 = vmul.f32 1.442695, %v3413_v33 }
 0x55c   :  { %2797 = vadd.xlane.f32.xlu1 %v2796_v42  ;;  %2921 = vadd.xlane.f32.xlu0 %v2920_v37  ;;  %v2799_v48 = vsel %vm2006_vm3, %v6057_v46, 0.0  ;;  %5408 = vpow2.f32 %v3290_v34  ;;  %v3412_v54 = vsub.f32 %v5981_v47, %v3408_v26 }
 0x55d   :  { %5410 = vpow2.f32 %v3292_v62 }
 0x55e   :  { %v6059_v13 = vpop.eup %5398  ;;  %v3414_v53 = vmul.f32 1.442695, %v3412_v54 }
 0x55f   :  { %v6062_v57 = vpop.eup %5400  ;;  %v3045_v51 = vsel %vm2006_vm3, %v6059_v13, 0.0 }
 0x560   :  { %v6068_v55 = vpop.eup %5402  ;;  %2800 = vadd.xlane.f32.xlu1 %v2799_v48  ;;  %3046 = vadd.xlane.f32.xlu0 %v3045_v51  ;;  %v2923_v20 = vsel %vm2006_vm3, %v6062_v57, 0.0  ;;  %5412 = vpow2.f32 %v3414_v53 }
 0x561   :  { %v3048_v61 = vsel %vm2006_vm3, %v6068_v55, 0.0  ;;  %5414 = vpow2.f32 %v3416_v28 }
 0x562   :  { %v6075_v38 = vpop.eup %5404 }
 0x563   :  { %v3169_v1 = vsel %vm2006_vm3, %v6075_v38, 0.0  ;;  %v6079_v60 = vpop.eup %5406 }
 0x564   :  { %2924 = vadd.xlane.f32.xlu1 %v2923_v20  ;;  %3049 = vadd.xlane.f32.xlu0 %v3048_v61  ;;  %v3172_v47 = vsel %vm2006_vm3, %v6079_v60, 0.0 }
 0x566   :  { %v6083_v12 = vpop.eup %5408 }
 0x567   :  { %v3294_v3 = vsel %vm2006_vm3, %v6083_v12, 0.0  ;;  %v6087_v5 = vpop.eup %5410 }
 0x568   :  { %3170 = vadd.xlane.f32.xlu1 %v3169_v1  ;;  %v3297_v7 = vsel %vm2006_vm3, %v6087_v5, 0.0 }
 0x56a   :  { %v6091_v8 = vpop.eup %5412 }
 0x56b   :  { %v3418_v25 = vsel %vm2006_vm3, %v6091_v8, 0.0  ;;  %v6102_v50 = vpop.eup %5414 }
 0x56c   :  { %3173 = vadd.xlane.f32.xlu1 %v3172_v47  ;;  %v3421_v31 = vsel %vm2006_vm3, %v6102_v50, 0.0 }
 0x570   :  { %3295 = vadd.xlane.f32.xlu1 %v3294_v3 }
 0x574   :  { %3298 = vadd.xlane.f32.xlu1 %v3297_v7 }
 0x578   :  { %3419 = vadd.xlane.f32.xlu1 %v3418_v25 }
 0x57a   :  { %2932 = vrot.lane.b32.xlu0 %v5706_v4, %s5566_s2 }
 0x589   :  { %3181 = vrot.lane.b32.xlu1 %v5708_v6, %s5566_s2 }
 0x58d   :  { %3430 = vrot.lane.b32.xlu1 %v5882_v18, %s5566_s2 }
 0x599   :  { %3422 = vadd.xlane.f32.xlu0 %v3421_v31 }
 0x59c   :  { %v2145_v32 = vpop.xlane.xlu0 %2144 }
 0x59d   :  { %5416 = vrcp.f32 %v2145_v32 }
 0x59e   :  { %v2148_v35 = vpop.xlane.xlu1 %2147 }
 0x59f   :  { %5418 = vrcp.f32 %v2148_v35 }
 0x5a0   :  { %v2654_v29 = vpop.permute.xlu0 %2653 }
 0x5a2   :  { %v2405_v45 = vpop.permute.xlu1 %2404 }
 0x5a7   :  { %v5417_v40 = vpop.eup %5416 }
 0x5a8   :  { %v2151_v15 = vmul.f32 %v5417_v40, %v5988_v21 }
 0x5a9   :  { %v5419_v23 = vpop.eup %5418 }
 0x5aa   :  { %v2152_v9 = vmul.f32 %v5419_v23, %v5992_v63 }
 0x5ac   :  { %v2153_v16 = vpack.c.bf16 %v2152_v9, %v2151_v15 }
 0x5ae   :  { %4721 = vmatmul.mubr.msk.bf16.vlgmr.msra.gmra.mrb[28].mxu0 %vm2006_vm3, %v2153_v16 }
 0x5af   :  { %4731 = vmatpush3.bf16.msra.mxu0 %v5702_v0  ;;  %4732 = vmatprep.mubr.msk.bf16.mxu0 %vm5565_vm0, %v5564_v14 }
 0x5b0   :  { %4742 = vmatprep.subr.bf16.mxu0 %v5564_v14 }
 0x5d1   :  { %v2270_v44 = vpop.xlane.xlu0 %2269 }
 0x5d2   :  { %5420 = vrcp.f32 %v2270_v44 }
 0x5d5   :  { %v2273_v11 = vpop.xlane.xlu1 %2272 }
 0x5d6   :  { %5422 = vrcp.f32 %v2273_v11 }
 0x5d9   :  { %v2397_v42 = vpop.xlane.xlu1 %2396  ;;  %v2394_v21 = vpop.xlane.xlu0 %2393 }
 0x5da   :  { %5424 = vrcp.f32 %v2397_v42 }
 0x5db   :  { %5426 = vrcp.f32 %v2394_v21 }
 0x5dc   :  { %v5421_v37 = vpop.eup %5420 }
 0x5dd   :  { %v2522_v63 = vpop.xlane.xlu1 %2521  ;;  %v2519_v39 = vpop.xlane.xlu0 %2518  ;;  %v2276_v0 = vmul.f32 %v5421_v37, %v6006_v43 }
 0x5de   :  { %5428 = vrcp.f32 %v2522_v63 }
 0x5df   :  { %5430 = vrcp.f32 %v2519_v39 }
 0x5e0   :  { %v5423_v34 = vpop.eup %5422 }
 0x5e1   :  { %v2277_v26 = vmul.f32 %v5423_v34, %v6012_v22  ;;  %v2643_v48 = vpop.xlane.xlu1 %2642 }
 0x5e3   :  { %v2278_v51 = vpack.c.bf16 %v2277_v26, %v2276_v0 }
 0x5e4   :  { %v5425_v62 = vpop.eup %5424 }
 0x5e5   :  { %v5427_v54 = vpop.eup %5426  ;;  %v2646_v20 = vpop.xlane.xlu1 %2645  ;;  %4733 = vmatmul.mubr.msk.bf16.vlgmr.msra.gmra.mrb[32].mxu0 %vm2006_vm3, %v2278_v51  ;;  %v2401_v61 = vmul.f32 %v5425_v62, %v6016_v58 }
 0x5e6   :  { %4743 = vmatpush3.bf16.msra.mxu0 %v2405_v45  ;;  %4744 = vmatprep.mubr.msk.bf16.mxu0 %vm5565_vm0, %v5564_v14  ;;  %v2400_v53 = vmul.f32 %v5427_v54, %v6019_v52  ;;  %5432 = vrcp.f32 %v2646_v20 }
 0x5e7   :  { %4754 = vmatprep.subr.bf16.mxu0 %v5564_v14  ;;  %5434 = vrcp.f32 %v2643_v48 }
 0x5e8   :  { %v5429_v22 = vpop.eup %5428  ;;  %v2402_v1 = vpack.c.bf16 %v2401_v61, %v2400_v53 }
 0x5e9   :  { %v2798_v43 = vpop.xlane.xlu1 %2797  ;;  %v5431_v47 = vpop.eup %5430  ;;  %v2526_v58 = vmul.f32 %v5429_v22, %v6026_v10  ;;  %v5273_v22 = vld [vmem:[#allocation7 + $0x1c] ss:$12 sps:$4 sm:$0xff]  }
 0x5ea   :  { %v2525_v52 = vmul.f32 %v5431_v47, %v6030_v2  ;;  %v2922_v25 = vpop.xlane.xlu0 %2921 }
 0x5ec   :  { %v2527_v27 = vpack.c.bf16 %v2526_v58, %v2525_v52  ;;  %v5276_v58 = vld [vmem:[#allocation7 + $0x34] ss:$12 sps:$4 sm:$0xff]   ;;  %v5274_v52 = vld [vmem:[#allocation7 + $0x30] ss:$12 sps:$4 sm:$0xff]  }
 0x5ed   :  { %v2801_v3 = vpop.xlane.xlu1 %2800  ;;  %4745 = vmatmul.mubr.msk.bf16.vlgmr.msra.gmra.mrb[36].mxu0 %vm2006_vm3, %v2402_v1  ;;  %v5271_v1 = vld [vmem:[#allocation7 + $0x18] ss:$12 sps:$4 sm:$0xff]  }
 0x5ee   :  { %4755 = vmatpush3.bf16.msra.mxu0 %v5870_v56  ;;  %4756 = vmatprep.mubr.msk.bf16.mxu0 %vm5565_vm0, %v5564_v14  ;;  %5436 = vrcp.f32 %v2801_v3  ;;  %v3047_v31 = vpop.xlane.xlu0 %3046 }
 0x5ef   :  { %4766 = vmatprep.subr.bf16.mxu0 %v5564_v14  ;;  %5438 = vrcp.f32 %v2798_v43  ;;  %v5270_v43 = vld [vmem:[#allocation7 + $0x4] ss:$12 sps:$4 sm:$0xff]  }
 0x5f0   :  { %v5433_v33 = vpop.eup %5432  ;;  %4010 = vmatprep.subr.bf16.mxu1 %v5270_v43 }
 0x5f1   :  { %v2925_v7 = vpop.xlane.xlu1 %2924  ;;  %v5435_v28 = vpop.eup %5434  ;;  %v2650_v56 = vmul.f32 %v5433_v33, %v6042_v36  ;;  %v5280_v33 = vld [vmem:[#allocation7 + $0x60] ss:$12 sps:$4 sm:$0xff]  }
 0x5f2   :  { %v2649_v2 = vmul.f32 %v5435_v28, %v6038_v24  ;;  %5440 = vrcp.f32 %v2925_v7  ;;  %v3050_v15 = vpop.xlane.xlu0 %3049  ;;  %v5277_v7 = vld [vmem:[#allocation7 + $0x48] ss:$12 sps:$4 sm:$0xff]  }
 0x5f3   :  { %5442 = vrcp.f32 %v2922_v25  ;;  %v5279_v25 = vld [vmem:[#allocation7 + $0x4c] ss:$12 sps:$4 sm:$0xff]   ;;  %v5285_v28 = vld [vmem:[#allocation7 + $0x7c] ss:$12 sps:$4 sm:$0xff]  }
 0x5f4   :  { %v2651_v32 = vpack.c.bf16 %v2650_v56, %v2649_v2  ;;  %5444 = vrcp.f32 %v3050_v15  ;;  %v5295_v56 = vld [vmem:[#allocation7 + $0xc8] ss:$12 sps:$4 sm:$0xff]   ;;  %v5300_v2 = vld [vmem:[#allocation7 + $0xe0] ss:$12 sps:$4 sm:$0xff]   ;;  %v5306_v15 = vld [vmem:[#allocation7 + $0x38] ss:$12 sps:$4 sm:$0xff]  }
 0x5f5   :  { %4757 = vmatmul.mubr.msk.bf16.vlgmr.msra.gmra.mrb[40].mxu0 %vm2006_vm3, %v2527_v27  ;;  %v3171_v10 = vpop.xlane.xlu1 %3170  ;;  %5446 = vrcp.f32 %v3047_v31  ;;  %v5282_v27 = vld [vmem:[#allocation7 + $0x64] ss:$12 sps:$4 sm:$0xff]  }
 0x5f6   :  { %4767 = vmatpush3.bf16.msra.mxu0 %v2654_v29  ;;  %4768 = vmatprep.mubr.msk.bf16.mxu0 %vm5565_vm0, %v5564_v14  ;;  %v2933_v45 = vpop.permute.xlu0 %2932  ;;  %v5283_v31 = vld [vmem:[#allocation7 + $0x78] ss:$12 sps:$4 sm:$0xff]  }
 0x5f7   :  { %4778 = vmatprep.subr.bf16.mxu0 %v5564_v14 }
 0x5f8   :  { %v5437_v35 = vpop.eup %5436 }
 0x5f9   :  { %v3174_v40 = vpop.xlane.xlu1 %3173  ;;  %v5439_v23 = vpop.eup %5438  ;;  %v2805_v36 = vmul.f32 %v5437_v35, %v6057_v46  ;;  %v5301_v35 = vld [vmem:[#allocation7 + $0x20] ss:$12 sps:$4 sm:$0xff]  }
 0x5fa   :  { %v2804_v24 = vmul.f32 %v5439_v23, %v6048_v19  ;;  %5448 = vrcp.f32 %v3174_v40  ;;  %v5305_v40 = vld [vmem:[#allocation7 + $0xf8] ss:$12 sps:$4 sm:$0xff]   ;;  %v5286_v23 = vld [vmem:[#allocation7 + $0x90] ss:$12 sps:$4 sm:$0xff]  }
 0x5fb   :  { %5450 = vrcp.f32 %v3171_v10  ;;  %v5296_v10 = vld [vmem:[#allocation7 + $0x8] ss:$12 sps:$4 sm:$0xff]  }
 0x5fc   :  { %v2806_v16 = vpack.c.bf16 %v2805_v36, %v2804_v24  ;;  %v5441_v29 = vpop.eup %5440  ;;  %v5291_v36 = vld [vmem:[#allocation7 + $0xac] ss:$12 sps:$4 sm:$0xff]   ;;  %v5310_v24 = vld [vmem:[#allocation7 + $0x110] ss:$12 sps:$4 sm:$0xff]  }
 0x5fd   :  { %4769 = vmatmul.mubr.msk.bf16.vlgmr.msra.gmra.mrb[44].mxu0 %vm2006_vm3, %v2651_v32  ;;  %v3296_v9 = vpop.xlane.xlu1 %3295  ;;  %v5443_v44 = vpop.eup %5442  ;;  %v5288_v32 = vld [vmem:[#allocation7 + $0x94] ss:$12 sps:$4 sm:$0xff]  }
 0x5fe   :  { %4779 = vmatpush3.bf16.msra.mxu0 %v5706_v4  ;;  %4780 = vmatprep.mubr.msk.bf16.mxu0 %vm5565_vm0, %v5564_v14  ;;  %v2929_v4 = vmul.f32 %v5441_v29, %v6062_v57  ;;  %v2928_v46 = vmul.f32 %v5443_v44, %v6050_v49  ;;  %v5445_v42 = vpop.eup %5444  ;;  %v5311_v29 = vld [vmem:[#allocation7 + $0x50] ss:$12 sps:$4 sm:$0xff]   ;;  %v5292_v44 = vld [vmem:[#allocation7 + $0xc0] ss:$12 sps:$4 sm:$0xff]  }
 0x5ff   :  { %4790 = vmatprep.subr.bf16.mxu0 %v5564_v14  ;;  %v5447_v21 = vpop.eup %5446  ;;  %v3054_v63 = vmul.f32 %v5445_v42, %v6068_v55  ;;  %v5304_v42 = vld [vmem:[#allocation7 + $0xf4] ss:$12 sps:$4 sm:$0xff]  }
 0x600   :  { %v2930_v11 = vpack.c.bf16 %v2929_v4, %v2928_v46  ;;  %v3053_v49 = vmul.f32 %v5447_v21, %v6059_v13  ;;  %v5299_v4 = vld [vmem:[#allocation7 + $0xdc] ss:$12 sps:$4 sm:$0xff]   ;;  %v5321_v21 = vld [vmem:[#allocation7 + $0x80] ss:$12 sps:$4 sm:$0xff]  }
 0x601   :  { %v3299_v19 = vpop.xlane.xlu1 %3298  ;;  %v5316_v46 = vld [vmem:[#allocation7 + $0x68] ss:$12 sps:$4 sm:$0xff]  }
 0x602   :  { %5452 = vrcp.f32 %v3299_v19  ;;  %v3055_v37 = vpack.c.bf16 %v3054_v63, %v3053_v49  ;;  %v5320_v19 = vld [vmem:[#allocation7 + $0x140] ss:$12 sps:$4 sm:$0xff]   ;;  %v5302_v63 = vld [vmem:[#allocation7 + $0xf0] ss:$12 sps:$4 sm:$0xff]   ;;  %v5307_v49 = vld [vmem:[#allocation7 + $0x108] ss:$12 sps:$4 sm:$0xff]  }
 0x603   :  { %5454 = vrcp.f32 %v3296_v9  ;;  %v5289_v9 = vld [vmem:[#allocation7 + $0xa8] ss:$12 sps:$4 sm:$0xff]  }
 0x604   :  { %v5449_v39 = vpop.eup %5448 }
 0x605   :  { %4781 = vmatmul.mubr.msk.bf16.vlgmr.msra.gmra.mrb[48].mxu0 %vm2006_vm3, %v2806_v16  ;;  %v3420_v57 = vpop.xlane.xlu1 %3419  ;;  %v5451_v0 = vpop.eup %5450  ;;  %v5294_v16 = vld [vmem:[#allocation7 + $0xc4] ss:$12 sps:$4 sm:$0xff]  }
 0x606   :  { %4791 = vmatpush3.bf16.msra.mxu0 %v2933_v45  ;;  %4792 = vmatprep.mubr.msk.bf16.mxu0 %vm5565_vm0, %v5564_v14  ;;  %v3177_v55 = vmul.f32 %v5451_v0, %v6075_v38  ;;  %5456 = vrcp.f32 %v3420_v57  ;;  %v5315_v45 = vld [vmem:[#allocation7 + $0x128] ss:$12 sps:$4 sm:$0xff]   ;;  %v5309_v57 = vld [vmem:[#allocation7 + $0x10c] ss:$12 sps:$4 sm:$0xff]  }
 0x607   :  { %4802 = vmatprep.subr.bf16.mxu0 %v5564_v14  ;;  %v5317_v0 = vld [vmem:[#allocation7 + $0x138] ss:$12 sps:$4 sm:$0xff]  }
 0x609   :  { %v3182_v34 = vpop.permute.xlu1 %3181 }
 0x60c   :  { %v5453_v13 = vpop.eup %5452 }
 0x60d   :  { %4793 = vmatmul.mubr.msk.bf16.vlgmr.msra.gmra.mrb[52].mxu0 %vm2006_vm3, %v2930_v11  ;;  %v5455_v48 = vpop.eup %5454  ;;  %v3303_v51 = vmul.f32 %v5453_v13, %v6087_v5  ;;  %v3431_v54 = vpop.permute.xlu1 %3430  ;;  %v5297_v11 = vld [vmem:[#allocation7 + $0xd8] ss:$12 sps:$4 sm:$0xff]  }
 0x60e   :  { %4803 = vmatpush3.bf16.msra.mxu0 %v5708_v6  ;;  %4804 = vmatprep.mubr.msk.bf16.mxu0 %vm5565_vm0, %v5564_v14  ;;  %v3178_v6 = vmul.f32 %v5449_v39, %v6079_v60  ;;  %v3302_v60 = vmul.f32 %v5455_v48, %v6083_v12  ;;  %v5268_v12 = vld [vmem:[#allocation7] ss:$12 sps:$4 sm:$0xff]   ;;  %v5325_v48 = vld [vmem:[#allocation7 + $0x158] ss:$12 sps:$4 sm:$0xff]  }
 0x60f   :  { %4814 = vmatprep.subr.bf16.mxu0 %v5564_v14  ;;  %4011 = vmatpush1.bf16.msra.mxu1 %v5268_v12  ;;  %v5312_v39 = vld [vmem:[#allocation7 + $0x120] ss:$12 sps:$4 sm:$0xff]  }
 0x610   :  { %v3179_v26 = vpack.c.bf16 %v3178_v6, %v3177_v55  ;;  %v3304_v62 = vpack.c.bf16 %v3303_v51, %v3302_v60  ;;  %4012 = vmatprep.subr.bf16.mxu1 %v5273_v22  ;;  %v5322_v55 = vld [vmem:[#allocation7 + $0x150] ss:$12 sps:$4 sm:$0xff]   ;;  %v5326_v51 = vld [vmem:[#allocation7 + $0x98] ss:$12 sps:$4 sm:$0xff]  }
 0x613   :  { %4013 = vmatpush1.bf16.msra.mxu1 %v5271_v1 }
 0x614   :  { %4014 = vmatprep.subr.bf16.mxu1 %v5276_v58 }
 0x615   :  { %4805 = vmatmul.mubr.msk.bf16.vlgmr.msra.gmra.mrb[56].mxu0 %vm2006_vm3, %v3055_v37  ;;  %v5314_v37 = vld [vmem:[#allocation7 + $0x124] ss:$12 sps:$4 sm:$0xff]  }
 0x616   :  { %4815 = vmatpush3.bf16.msra.mxu0 %v3182_v34  ;;  %4816 = vmatprep.mubr.msk.bf16.mxu0 %vm5565_vm0, %v5564_v14  ;;  %v5319_v34 = vld [vmem:[#allocation7 + $0x13c] ss:$12 sps:$4 sm:$0xff]  }
 0x617   :  { %4826 = vmatprep.subr.bf16.mxu0 %v5564_v14  ;;  %4015 = vmatpush1.bf16.msra.mxu1 %v5274_v52 }
 0x618   :  { %4016 = vmatprep.subr.bf16.mxu1 %v5279_v25 }
 0x61b   :  { %4017 = vmatpush1.bf16.msra.mxu1 %v5277_v7 }
 0x61c   :  { %4018 = vmatprep.subr.bf16.mxu1 %v5282_v27 }
 0x61d   :  { %4817 = vmatmul.mubr.msk.bf16.vlgmr.msra.gmra.mrb[60].mxu0 %vm2006_vm3, %v3179_v26  ;;  %v5324_v26 = vld [vmem:[#allocation7 + $0x154] ss:$12 sps:$4 sm:$0xff]  }
 0x61e   :  { %4827 = vmatpush3.bf16.msra.mxu0 %v5882_v18  ;;  %4828 = vmatprep.mubr.msk.bf16.mxu0 %vm5565_vm0, %v5564_v14  ;;  %v5457_v18 = vpop.eup %5456 }
 0x61f   :  { %4838 = vmatprep.subr.bf16.mxu0 %v5564_v14  ;;  %v3426_v61 = vmul.f32 %v5457_v18, %v6091_v8  ;;  %4019 = vmatpush1.bf16.msra.mxu1 %v5280_v33  ;;  %v5327_v18 = vld [vmem:[#allocation7 + $0x168] ss:$12 sps:$4 sm:$0xff]  }
 0x620   :  { %4020 = vmatprep.subr.bf16.mxu1 %v5285_v28 }
 0x623   :  { %4021 = vmatpush1.bf16.msra.mxu1 %v5283_v31  ;;  %v5347_v31 = vld [vmem:[#allocation7 + $0x188] ss:$12 sps:$4 sm:$0xff]  }
 0x624   :  { %4022 = vmatprep.subr.bf16.mxu1 %v5288_v32 }
 0x625   :  { %4829 = vmatmul.mubr.msk.bf16.vlgmr.msra.gmra.mrb[64].mxu0 %vm2006_vm3, %v3304_v62 }
 0x626   :  { %4839 = vmatpush3.bf16.msra.mxu0 %v3431_v54  ;;  %v3423_v38 = vpop.xlane.xlu0 %3422  ;;  %4840 = vmatprep.mubr.msk.bf16.mxu0 %vm5565_vm0, %v5564_v14  ;;  %v5329_v54 = vld [vmem:[#allocation7 + $0x16c] ss:$12 sps:$4 sm:$0xff]  }
 0x627   :  { %5458 = vrcp.f32 %v3423_v38  ;;  %4642 = vmatprep.subr.bf16.mxu0 %v5295_v56  ;;  %4023 = vmatpush1.bf16.msra.mxu1 %v5286_v23  ;;  %v5330_v38 = vld [vmem:[#allocation7 + $0x170] ss:$12 sps:$4 sm:$0xff]  }
 0x628   :  { %4024 = vmatprep.subr.bf16.mxu1 %v5291_v36 }
 0x62b   :  { %4025 = vmatpush1.bf16.msra.mxu1 %v5289_v9 }
 0x62c   :  { %4026 = vmatprep.subr.bf16.mxu1 %v5294_v16 }
 0x62f   :  { %4027 = vmatpush1.bf16.msra.mxu1 %v5292_v44 }
 0x630   :  { %4028 = vmatprep.subr.bf16.mxu1 %v5299_v4 }
 0x631   :  { %v5459_v20 = vpop.eup %5458 }
 0x632   :  { %v3427_v5 = vmul.f32 %v5459_v20, %v6102_v50  ;;  %v5331_v20 = vld [vmem:[#allocation7 + $0xb0] ss:$12 sps:$4 sm:$0xff]  }
 0x633   :  { %4029 = vmatpush1.bf16.msra.mxu1 %v5297_v11 }
 0x634   :  { %v3428_v53 = vpack.c.bf16 %v3427_v5, %v3426_v61  ;;  %4030 = vmatprep.subr.bf16.mxu1 %v5304_v42 }
 0x636   :  { %4841 = vmatmul.mubr.msk.bf16.vlgmr.msra.gmra.mrb[68].mxu0 %vm2006_vm3, %v3428_v53  ;;  %v5334_v53 = vld [vmem:[#allocation7 + $0x184] ss:$12 sps:$4 sm:$0xff]  }
 0x637   :  { %4643 = vmatpush3.bf16.msra.mxu0 %v5296_v10  ;;  %4031 = vmatpush1.bf16.msra.mxu1 %v5302_v63 }
 0x638   :  { %4644 = vmatprep.subr.bf16.mxu0 %v5300_v2  ;;  %4032 = vmatprep.subr.bf16.mxu1 %v5309_v57 }
 0x63b   :  { %4645 = vmatpush3.bf16.msra.mxu0 %v5301_v35  ;;  %4033 = vmatpush1.bf16.msra.mxu1 %v5307_v49 }
 0x63c   :  { %4646 = vmatprep.subr.bf16.mxu0 %v5305_v40  ;;  %4034 = vmatprep.subr.bf16.mxu1 %v5314_v37 }
 0x63f   :  { %4647 = vmatpush3.bf16.msra.mxu0 %v5306_v15  ;;  %4035 = vmatpush1.bf16.msra.mxu1 %v5312_v39 }
 0x640   :  { %4648 = vmatprep.subr.bf16.mxu0 %v5310_v24  ;;  %4036 = vmatprep.subr.bf16.mxu1 %v5319_v34 }
 0x643   :  { %4649 = vmatpush3.bf16.msra.mxu0 %v5311_v29  ;;  %4037 = vmatpush1.bf16.msra.mxu1 %v5317_v0 }
 0x644   :  { %4650 = vmatprep.subr.bf16.mxu0 %v5315_v45  ;;  %4038 = vmatprep.subr.bf16.mxu1 %v5324_v26 }
 0x647   :  { %4651 = vmatpush3.bf16.msra.mxu0 %v5316_v46  ;;  %4039 = vmatpush1.bf16.msra.mxu1 %v5322_v55 }
 0x648   :  { %4652 = vmatprep.subr.bf16.mxu0 %v5320_v19  ;;  %4040 = vmatprep.subr.bf16.mxu1 %v5329_v54  ;;  %v5332_v54 = vld [vmem:[#allocation7 + $0x180] ss:$12 sps:$4 sm:$0xff]  }
 0x64b   :  { %4653 = vmatpush3.bf16.msra.mxu0 %v5321_v21  ;;  %4041 = vmatpush1.bf16.msra.mxu1 %v5327_v18  ;;  %v5337_v18 = vld [vmem:[#allocation7 + $0x19c] ss:$12 sps:$4 sm:$0xff]  }
 0x64c   :  { %4654 = vmatprep.subr.bf16.mxu0 %v5325_v48  ;;  %4063 = vmatprep.subr.bf16.mxu1 %v5334_v53  ;;  %v5341_v53 = vld [vmem:[#allocation7 + $0x1c8] ss:$12 sps:$4 sm:$0xff]  }
 0x64f   :  { %4655 = vmatpush3.bf16.msra.mxu0 %v5326_v51 }
 0x650   :  { %4656 = vmatprep.subr.bf16.mxu0 %v5330_v38 }
 0x653   :  { %4657 = vmatpush3.bf16.msra.mxu0 %v5331_v20  ;;  %v5351_v20 = vld [vmem:[#allocation7 + $0x1a0] ss:$12 sps:$4 sm:$0xff]  }
 0x654   :  { %4844 = vmatprep.subr.bf16.mxu0 %v5347_v31 }
 0x681   :  { %v6173_v47 = vpop.f32.mrb[28].mxu0 }
 0x682   :  { %v4722_v14 = vpop.f32.mrb[29].mxu0 }
 0x683   :  { %v6175_v3 = vpop.f32.mrb[30].mxu0 }
 0x684   :  { %v4931_v8 = vpack.i.bf16 %v6175_v3, %v6173_v47  ;;  %v4723_v50 = vpop.f32.mrb[31].mxu0 }
 0x6b8   :  { %v6179_v6 = vpop.f32.mrb[32].mxu0 }
 0x6b9   :  { %v4734_v13 = vpop.f32.mrb[33].mxu0 }
 0x6ba   :  { %v6181_v60 = vpop.f32.mrb[34].mxu0 }
 0x6bb   :  { %v4735_v62 = vpop.f32.mrb[35].mxu0 }
 0x6c0   :  { %v2444_v61 = vpop.f32.mrb[36].mxu0 }
 0x6c1   :  { %v4746_v5 = vpop.f32.mrb[37].mxu0 }
 0x6c2   :  { %v2447_v12 = vpop.f32.mrb[38].mxu0  ;;  %v5338_v5 = vld [vmem:[#allocation7 + $0x1b0] ss:$12 sps:$4 sm:$0xff]  }
 0x6c3   :  { %v4926_v43 = vpack.i.bf16 %v2447_v12, %v2444_v61  ;;  %v4747_v22 = vpop.f32.mrb[39].mxu0  ;;  %v5355_v61 = vld [vmem:[#allocation7 + $0x1b8] ss:$12 sps:$4 sm:$0xff]  }
 0x6c4   :  { %v5346_v12 = vld [vmem:[#allocation7 + $0x1e4] ss:$12 sps:$4 sm:$0xff]   ;;  %v5344_v22 = vld [vmem:[#allocation7 + $0x1e0] ss:$12 sps:$4 sm:$0xff]  }
 0x6c5   :  { %4927 = vrot.lane.b32.xlu1 %v4926_v43, %s5566_s2  ;;  %v5360_v43 = vld [vmem:[#allocation7 + $0x1e8] ss:$12 sps:$4 sm:$0xff]  }
 0x6c8   :  { %v6184_v1 = vpop.f32.mrb[40].mxu0 }
 0x6c9   :  { %4932 = vrot.lane.b32.xlu1 %v4931_v8, %s5566_s2  ;;  %v4758_v14 = vpop.f32.mrb[41].mxu0 }
 0x6ca   :  { %v6190_v50 = vpop.f32.mrb[42].mxu0  ;;  %v5350_v14 = vld [vmem:[#allocation7 + $0x1fc] ss:$12 sps:$4 sm:$0xff]  }
 0x6cb   :  { %v4759_v58 = vpop.f32.mrb[43].mxu0 }
 0x6cc   :  { %v5361_v58 = vld [vmem:[#allocation7 + $0x200] ss:$12 sps:$4 sm:$0xff]  }
 0x6d0   :  { %v2693_v52 = vpop.f32.mrb[44].mxu0 }
 0x6d1   :  { %v4770_v7 = vpop.f32.mrb[45].mxu0 }
 0x6d2   :  { %v2696_v25 = vpop.f32.mrb[46].mxu0  ;;  %v5354_v7 = vld [vmem:[#allocation7 + $0x214] ss:$12 sps:$4 sm:$0xff]  }
 0x6d3   :  { %v4946_v27 = vpack.i.bf16 %v2696_v25, %v2693_v52  ;;  %v4771_v33 = vpop.f32.mrb[47].mxu0  ;;  %v5348_v52 = vld [vmem:[#allocation7 + $0x1f8] ss:$12 sps:$4 sm:$0xff]  }
 0x6d4   :  { %v5362_v25 = vld [vmem:[#allocation7 + $0x218] ss:$12 sps:$4 sm:$0xff]  }
 0x6d8   :  { %v6192_v28 = vpop.f32.mrb[48].mxu0 }
 0x6d9   :  { %v4782_v56 = vpop.f32.mrb[49].mxu0 }
 0x6da   :  { %v6194_v10 = vpop.f32.mrb[50].mxu0  ;;  %v5358_v56 = vld [vmem:[#allocation7 + $0x22c] ss:$12 sps:$4 sm:$0xff]  }
 0x6db   :  { %v4783_v2 = vpop.f32.mrb[51].mxu0 }
 0x6dc   :  { %v5363_v2 = vld [vmem:[#allocation7 + $0x230] ss:$12 sps:$4 sm:$0xff]  }
 0x6e0   :  { %v2972_v32 = vpop.f32.mrb[52].mxu0 }
 0x6e1   :  { %v4794_v47 = vpop.f32.mrb[53].mxu0 }
 0x6e2   :  { %v2975_v3 = vpop.f32.mrb[54].mxu0 }
 0x6e3   :  { %v4941_v8 = vpack.i.bf16 %v2975_v3, %v2972_v32  ;;  %v4795_v35 = vpop.f32.mrb[55].mxu0 }
 0x6e5   :  { %4942 = vrot.lane.b32.xlu1 %v4941_v8, %s5566_s2  ;;  %v5356_v8 = vld [vmem:[#allocation7 + $0x228] ss:$12 sps:$4 sm:$0xff]  }
 0x6e8   :  { %v6197_v40 = vpop.f32.mrb[56].mxu0 }
 0x6e9   :  { %4947 = vrot.lane.b32.xlu1 %v4946_v27, %s5566_s2  ;;  %v4806_v23 = vpop.f32.mrb[57].mxu0  ;;  %v5352_v27 = vld [vmem:[#allocation7 + $0x210] ss:$12 sps:$4 sm:$0xff]  }
 0x6ea   :  { %v6200_v36 = vpop.f32.mrb[58].mxu0 }
 0x6eb   :  { %v4807_v15 = vpop.f32.mrb[59].mxu0 }
 0x6f0   :  { %v3221_v24 = vpop.f32.mrb[60].mxu0 }
 0x6f1   :  { %v4818_v9 = vpop.f32.mrb[61].mxu0 }
 0x6f2   :  { %v3224_v16 = vpop.f32.mrb[62].mxu0 }
 0x6f3   :  { %v4936_v29 = vpack.i.bf16 %v3224_v16, %v3221_v24  ;;  %v4819_v45 = vpop.f32.mrb[63].mxu0 }
 0x6f5   :  { %4937 = vrot.lane.b32.xlu0 %v4936_v29, %s5566_s2 }
 0x6f8   :  { %v6203_v44 = vpop.f32.mrb[64].mxu0 }
 0x6f9   :  { %v4830_v4 = vpop.f32.mrb[65].mxu0 }
 0x6fa   :  { %v6205_v46 = vpop.f32.mrb[66].mxu0 }
 0x6fb   :  { %v4831_v19 = vpop.f32.mrb[67].mxu0 }
 0x709   :  { %v3470_v11 = vpop.f32.mrb[68].mxu0 }
 0x70a   :  { %v4842_v42 = vpop.f32.mrb[69].mxu0 }
 0x70b   :  { %v3473_v21 = vpop.f32.mrb[70].mxu0 }
 0x70c   :  { %v4951_v63 = vpack.i.bf16 %v3473_v21, %v3470_v11  ;;  %v4843_v57 = vpop.f32.mrb[71].mxu0 }
 0x70e   :  { %4952 = vrot.lane.b32.xlu1 %v4951_v63, %s5566_s2 }
 0x737   :  { %v4928_v49 = vpop.permute.xlu1 %4927 }
 0x738   :  { %v4930_v37 = vunpack.i.h.bf16 %v4928_v49  ;;  %v4929_v39 = vunpack.i.l.bf16 %v4928_v49 }
 0x73a   :  { %v2726_v34 = vsel %vm1954_vm1, %v6179_v6, %v4929_v39  ;;  %v2727_v0 = vsel %vm1954_vm1, %v6181_v60, %v4930_v37  ;;  %v5335_v6 = vld [vmem:[#allocation7 + $0x198] ss:$12 sps:$4 sm:$0xff]   ;;  %v5340_v60 = vld [vmem:[#allocation7 + $0x1b4] ss:$12 sps:$4 sm:$0xff]  }
 0x73b   :  { %v4933_v55 = vpop.permute.xlu1 %4932  ;;  %v3508_v26 = vpack.c.bf16 %v2727_v0, %v2726_v34 }
 0x73c   :  { %v4935_v13 = vunpack.i.h.bf16 %v4933_v55  ;;  %v4934_v48 = vunpack.i.l.bf16 %v4933_v55  ;;  %v3613_v55 = vsub.s32 0, %v5714_v17 }
 0x73d   :  { %4042 = vmatprep.mubr.bf16.mxu1 %v3508_v26  ;;  %4148 = vmatprep.mubr.bf16.mxu0 %v3508_v26 }
 0x73e   :  { %v2725_v51 = vsel %vm1954_vm1, %v5836_v59, %v4935_v13  ;;  %v2724_v62 = vsel %vm1954_vm1, %v5834_v41, %v4934_v48  ;;  %v5343_v59 = vld [vmem:[#allocation7 + $0x1cc] ss:$12 sps:$4 sm:$0xff]   ;;  %v5359_v41 = vld [vmem:[#allocation7 + $0x1d0] ss:$12 sps:$4 sm:$0xff]  }
 0x73f   :  { %v3507_v38 = vpack.c.bf16 %v2725_v51, %v2724_v62 }
 0x741   :  { %4043 = vmatmul.mubr.bf16.vlgmr.msra.gmra.mrb[68].mxu1 %v3507_v38  ;;  %4149 = vmatmul.mubr.bf16.vlgmr.msra.gmra.mrb[72].mxu0 %v3507_v38 }
 0x742   :  { %4064 = vmatpush1.bf16.msra.mxu1 %v5332_v54  ;;  %4845 = vmatpush3.bf16.msra.mxu0 %v5347_v31 }
 0x743   :  { %4065 = vmatprep.subr.bf16.mxu1 %v5337_v18  ;;  %4846 = vmatprep.subr.bf16.mxu0 %v5351_v20 }
 0x746   :  { %4066 = vmatpush1.bf16.msra.mxu1 %v5335_v6  ;;  %4847 = vmatpush3.bf16.msra.mxu0 %v5351_v20 }
 0x747   :  { %4067 = vmatprep.subr.bf16.mxu1 %v5340_v60  ;;  %4848 = vmatprep.subr.bf16.mxu0 %v5355_v61 }
 0x74a   :  { %4068 = vmatpush1.bf16.msra.mxu1 %v5338_v5  ;;  %4849 = vmatpush3.bf16.msra.mxu0 %v5355_v61 }
 0x74b   :  { %4069 = vmatprep.subr.bf16.mxu1 %v5343_v59  ;;  %4850 = vmatprep.subr.bf16.mxu0 %v5359_v41 }
 0x74e   :  { %4070 = vmatpush1.bf16.msra.mxu1 %v5341_v53  ;;  %4851 = vmatpush3.bf16.msra.mxu0 %v5359_v41  ;;  %v3621_v41 = vsub.s32 2, %v5714_v17 }
 0x74f   :  { %4071 = vmatprep.subr.bf16.mxu1 %v5346_v12  ;;  %4852 = vmatprep.subr.bf16.mxu0 %v5360_v43 }
 0x752   :  { %4072 = vmatpush1.bf16.msra.mxu1 %v5344_v22  ;;  %4853 = vmatpush3.bf16.msra.mxu0 %v5360_v43 }
 0x753   :  { %4073 = vmatprep.subr.bf16.mxu1 %v5350_v14  ;;  %4854 = vmatprep.subr.bf16.mxu0 %v5361_v58 }
 0x756   :  { %4074 = vmatpush1.bf16.msra.mxu1 %v5348_v52  ;;  %4855 = vmatpush3.bf16.msra.mxu0 %v5361_v58 }
 0x757   :  { %v4943_v33 = vpop.permute.xlu1 %4942  ;;  %4075 = vmatprep.subr.bf16.mxu1 %v5354_v7  ;;  %4856 = vmatprep.subr.bf16.mxu0 %v5362_v25 }
 0x758   :  { %v4945_v31 = vunpack.i.h.bf16 %v4943_v33  ;;  %v4944_v32 = vunpack.i.l.bf16 %v4943_v33 }
 0x75a   :  { %v3501_v47 = vsel %vm1954_vm1, %v6192_v28, %v4944_v32  ;;  %v3502_v3 = vsel %vm1954_vm1, %v6194_v10, %v4945_v31  ;;  %4076 = vmatpush1.bf16.msra.mxu1 %v5352_v27  ;;  %4857 = vmatpush3.bf16.msra.mxu0 %v5362_v25 }
 0x75b   :  { %v4948_v35 = vpop.permute.xlu1 %4947  ;;  %v3510_v23 = vpack.c.bf16 %v3502_v3, %v3501_v47  ;;  %4077 = vmatprep.subr.bf16.mxu1 %v5358_v56  ;;  %4858 = vmatprep.subr.bf16.mxu0 %v5363_v2 }
 0x75c   :  { %v4950_v15 = vunpack.i.h.bf16 %v4948_v35  ;;  %v4949_v24 = vunpack.i.l.bf16 %v4948_v35 }
 0x75e   :  { %v2728_v9 = vsel %vm1954_vm1, %v6184_v1, %v4949_v24  ;;  %v2729_v16 = vsel %vm1954_vm1, %v6190_v50, %v4950_v15  ;;  %4078 = vmatpush1.bf16.msra.mxu1 %v5356_v8  ;;  %4859 = vmatpush3.bf16.msra.mxu0 %v5363_v2 }
 0x75f   :  { %v3509_v28 = vpack.c.bf16 %v2729_v16, %v2728_v9 }
 0x767   :  { %v4938_v29 = vpop.permute.xlu0 %4937 }
 0x768   :  { %v4940_v10 = vunpack.i.h.bf16 %v4938_v29  ;;  %v4939_v45 = vunpack.i.l.bf16 %v4938_v29 }
 0x76a   :  { %v3503_v4 = vsel %vm1954_vm1, %v6197_v40, %v4939_v45  ;;  %v3504_v19 = vsel %vm1954_vm1, %v6200_v36, %v4940_v10 }
 0x76b   :  { %v3511_v11 = vpack.c.bf16 %v3504_v19, %v3503_v4 }
 0x76d   :  { %4052 = vmatprep.mubr.bf16.mxu1 %v3511_v11  ;;  %4156 = vmatprep.mubr.bf16.mxu0 %v3511_v11 }
 0x76e   :  { %4053 = vmatmul.mubr.bf16.gmra.mrb[72].mxu1 %v3510_v23  ;;  %4157 = vmatmul.mubr.bf16.gmra.mrb[76].mxu0 %v3510_v23 }
 0x76f   :  { %4860 = vmatprep.mubr.bf16.mxu0 %v3509_v28  ;;  %4095 = vmatprep.mubr.bf16.mxu1 %v5563_v30 }
 0x776   :  { %4096 = vmatmul.mubr.bf16.vlgmr.msra.gmra.mrb[68].mxu1 %v3509_v28 }
 0x777   :  { %4105 = vmatprep.mubr.bf16.mxu1 %v5563_v30 }
 0x780   :  { %v4953_v1 = vpop.permute.xlu1 %4952 }
 0x781   :  { %v4955_v50 = vunpack.i.h.bf16 %v4953_v1  ;;  %v4954_v42 = vunpack.i.l.bf16 %v4953_v1 }
 0x783   :  { %v3505_v40 = vsel %vm1954_vm1, %v6203_v44, %v4954_v42  ;;  %v3506_v36 = vsel %vm1954_vm1, %v6205_v46, %v4955_v50  ;;  %v3617_v44 = vsub.s32 1, %v5714_v17  ;;  %v3609_v46 = vld [vmem:[%s6258_s3] sm:$0x7]  ;;  %s5567_s3 = smov [#allocation8]  }
 0x784   :  { %v3512_v21 = vpack.c.bf16 %v3506_v36, %v3505_v40  ;;  %v3614_v62 = vrot.slane %v3609_v46, %v3613_v55  ;;  %v3622_v53 = vrot.slane %v3609_v46, %v3621_v41  ;;  %s4231_s5 = sshll.u32 %s5567_s3, 4  ;;  %s4232_s5 = int_to_ptr.vmem [resolvable:$true] %s4231_s5 }
 0x785   :  { %v3618_v54 = vrot.slane %v3609_v46, %v3617_v44  ;;  %s5526_s6 = scalar_lea.vmem %s4232_s5, 1536  ;;  %p5531_p11 = scmp.lt.s32.totalorder %s4232_s5, %s4232_s5 }
 0x786   :  { %4106 = vmatmul.mubr.bf16.gmra.mrb[72].mxu1 %v3512_v21  ;;  %4861 = vmatmul.mubr.bf16.vlgmr.msra.gmra.mrb[80].mxu0 %v3512_v21  ;;  %p5527_p10 = scmp.ne.s32.totalorder %s4232_s5, %s5526_s6  ;;  %p5532_p12 = scmp.lt.s32.totalorder %s5526_s6, %s5526_s6 }
 0x788   :  { %p5533_p13 = por %p5532_p12, %p5531_p11 }
 0x78a   :  { %p5534_p0 = pnand %p5533_p13, %p5527_p10 }
 0x814   :  { %v4658_v63 = vpop.f32.mrb[72].mxu0 }
 0x815   :  { %v4659_v57 = vpop.f32.mrb[73].mxu0 }
 0x816   :  { %v4660_v49 = vadd.f32 %v4659_v57, %v4658_v63  ;;  %v4661_v37 = vpop.f32.mrb[74].mxu0 }
 0x817   :  { %v4662_v39 = vpop.f32.mrb[75].mxu0 }
 0x818   :  { %v4663_v34 = vadd.f32 %v4662_v39, %v4661_v37  ;;  %v4151_v14 = vadd.f32 %v4660_v49, %v3622_v53 }
 0x81a   :  { %v4154_v32 = vadd.f32 %v4663_v34, %v3622_v53 }
 0x841   :  { %v4664_v0 = vpop.f32.mrb[76].mxu0 }
 0x842   :  { %v4665_v30 = vpop.f32.mrb[77].mxu0 }
 0x843   :  { %v4666_v26 = vadd.f32 %v4665_v30, %v4664_v0  ;;  %v4667_v13 = vpop.f32.mrb[78].mxu0 }
 0x844   :  { %v4668_v48 = vpop.f32.mrb[79].mxu0 }
 0x845   :  { %v4669_v51 = vadd.f32 %v4668_v48, %v4667_v13  ;;  %v4159_v12 = vadd.f32 %v4666_v26, %v3622_v53 }
 0x847   :  { %v4162_v27 = vadd.f32 %v4669_v51, %v3622_v53 }
 0x849   :  { %v4097_v38 = vpop.f32.mrb[68].mxu1 }
 0x84a   :  { %v4864_v18 = vadd.f32 %v4097_v38, %v3614_v62  ;;  %v4099_v20 = vpop.f32.mrb[69].mxu1 }
 0x84b   :  { %v4865_v6 = vadd.f32 %v4099_v20, %v3618_v54  ;;  %v4101_v60 = vpop.f32.mrb[70].mxu1 }
 0x84c   :  { %4214 = vst [vmem:[#allocation8] sm:$0xff] %v4864_v18  ;;  %v4866_v61 = vadd.f32 %v4101_v60, %v3614_v62  ;;  %v4103_v5 = vpop.f32.mrb[71].mxu1 }
 0x84d   :  { %4215 = vst [vmem:[#allocation8 + $0x8] sm:$0xff] %v4865_v6  ;;  %v4867_v59 = vadd.f32 %v4103_v5, %v3618_v54 }
 0x84e   :  { %4217 = vst [vmem:[#allocation8 + $0x18] sm:$0xff] %v4866_v61 }
 0x84f   :  { %4218 = vst [vmem:[#allocation8 + $0x20] sm:$0xff] %v4867_v59 }
 0x859   :  { %v4107_v43 = vpop.f32.mrb[72].mxu1  ;;  %v4862_v22 = vpop.f32.mrb[80].mxu0 }
 0x85a   :  { %v4868_v58 = vadd.f32 %v4107_v43, %v3614_v62  ;;  %v4208_v52 = vadd.f32 %v4862_v22, %v4159_v12  ;;  %v4109_v7 = vpop.f32.mrb[73].mxu1  ;;  %v4199_v25 = vpop.f32.mrb[81].mxu0 }
 0x85b   :  { %v4869_v33 = vadd.f32 %v4109_v7, %v3618_v54  ;;  %v4200_v56 = vadd.f32 %v4199_v25, %v4151_v14  ;;  %v4111_v2 = vpop.f32.mrb[74].mxu1  ;;  %v4863_v31 = vpop.f32.mrb[82].mxu0 }
 0x85c   :  { %4220 = vst [vmem:[#allocation8 + $0x30] sm:$0xff] %v4868_v58  ;;  %4222 = vst [vmem:[#allocation8 + $0x40] sm:$0xff] %v4208_v52  ;;  %v4870_v17 = vadd.f32 %v4111_v2, %v3614_v62  ;;  %v4211_v47 = vadd.f32 %v4863_v31, %v4162_v27  ;;  %v4113_v3 = vpop.f32.mrb[75].mxu1  ;;  %v4202_v8 = vpop.f32.mrb[83].mxu0 }
 0x85d   :  { %4221 = vst [vmem:[#allocation8 + $0x38] sm:$0xff] %v4869_v33  ;;  %4216 = vst [vmem:[#allocation8 + $0x10] sm:$0xff] %v4200_v56  ;;  %v4871_v35 = vadd.f32 %v4113_v3, %v3618_v54  ;;  %v4203_v23 = vadd.f32 %v4202_v8, %v4154_v32 }
 0x85e   :  { %4223 = vst [vmem:[#allocation8 + $0x48] sm:$0xff] %v4870_v17  ;;  %4225 = vst [vmem:[#allocation8 + $0x58] sm:$0xff] %v4211_v47 }
 0x85f   :  { %4224 = vst [vmem:[#allocation8 + $0x50] sm:$0xff] %v4871_v35  ;;  %4219 = vst [vmem:[#allocation8 + $0x28] sm:$0xff] %v4203_v23 }
 0x860   :  { %5537 = shalt.err (!%p5534_p0)
}
 0x861   :  { %s5538_s9 = scalar_lea.hbm %s6259_s4, 1536 }
 0x862   :  { %p5539_p1 = scmp.ne.s32.totalorder %s6259_s4, %s5538_s9  ;;  %p5542_p2 = scmp.lt.u32.totalorder %s5538_s9, %s6259_s4 }
 0x864   :  { %p5544_p3 = pnand %p5542_p2, %p5539_p1 }
 0x866   :  { %5547 = shalt.err (!%p5544_p3)
}
 0x867   :  { %4237 = dma.vmem_to_hbm [thread:$0]  %s4232_s5, 1536, %s6259_s4, [#allocation4], %s5558_s1, %s5558_s1, %s5559_s13  }
 0x868   :  { %5552 = dma.done.wait [#allocation4], 1536  }
 0x869   :  { %5553 = vsyncadd [#allocation4], 4294965760 }
 0x86a   :  { %4241 = vsyncpa [#allocation3], 1 }
 0x86b   :  { %4242 = vsyncpa [#allocation6], 1 }
 0x86c   :  { %4243 = vsyncpa [#allocation4], 1 }

</bundles_post_ra>
